<compile_context>
chip_gen: v7x
topology: tpu7x:2x2x1
jax: 0.10.0
libtpu: 0.0.40
codegen_flags: <defaults>
</compile_context>

<pallas_src>
import numpy as np
import jax
import jax.numpy as jnp
from jax.experimental import pallas as pl
from jax.experimental.pallas import tpu as pltpu


# ----------------------------- Pallas kernels ------------------------------ #

def _roi_pool_kernel(ridx_ref, bins_ref, x_ref, out_ref):
    # ridx_ref (scalar prefetch, SMEM) is only consumed by the x index_map.
    del ridx_ref
    r = pl.program_id(0)
    P = bins_ref.shape[1] // 4          # bins layout: [hstart | hend | wstart | wend]
    x = x_ref[0].astype(jnp.float32)    # (H, W, C), C on lanes; bf16 -> f32 for VPU
    H, W, C = x.shape
    SENT = -3.0e38                      # finite "-inf" sentinel

    w_iota = jax.lax.broadcasted_iota(jnp.int32, (1, W, 1), 1)
    h_iota = jax.lax.broadcasted_iota(jnp.int32, (1, H, 1), 1)

    # stage 1: masked max over W per w-bin -> (P_w, H, C); empty w-bins -> 0
    # (emptiness is a scalar test on the SMEM bin bounds -> no extra XLU reduce)
    cols = []
    for q in range(P):
        ws = bins_ref[r, 2 * P + q]
        we = bins_ref[r, 3 * P + q]
        mw = (w_iota >= ws) & (w_iota < we)                     # (1, W, 1)
        cmax = jnp.max(jnp.where(mw, x, SENT), axis=1)          # (H, C)
        valid = (we > ws).astype(jnp.float32)                   # scalar 0/1
        cols.append(cmax * valid)
    xw = jnp.stack(cols, axis=0)                                # (P_w, H, C)

    # stage 2: masked max over H per h-bin -> (P_h, P_w, C); empty h-bins -> 0
    rows = []
    for p in range(P):
        hs = bins_ref[r, p]
        he = bins_ref[r, P + p]
        mh = (h_iota >= hs) & (h_iota < he)                     # (1, H, 1)
        rmax = jnp.max(jnp.where(mh, xw, SENT), axis=1)         # (P_w, C)
        valid = (he > hs).astype(jnp.float32)                   # scalar 0/1
        rows.append(rmax * valid)
    pooled = jnp.stack(rows, axis=0)                            # (P_h, P_w, C)
    out_ref[0] = pooled.astype(out_ref.dtype)


def _head_kernel(pool_ref, wc_ref, bc_ref, wh_ref, bh_ref,
                 fc7_ref, head_ref):
    GPP, C = pool_ref.shape             # (G * P*P, C), bf16
    G, F = fc7_ref.shape
    PP = GPP // G

    p = pool_ref[...]                                                       # bf16
    # classifier: 1x1 conv as one big bf16 MXU matmul (f32 accum) + bias + ReLU
    h = jnp.dot(p, wc_ref[...], preferred_element_type=jnp.float32)         # (GPP, F)
    h = jnp.maximum(h + bc_ref[...], 0.0)

    # per-roi global average pool over the P*P positions via a block-diagonal
    # averaging matmul (keeps everything on the MXU, no in-kernel reshape).
    g_iota = jax.lax.broadcasted_iota(jnp.int32, (G, GPP), 0)
    j_iota = jax.lax.broadcasted_iota(jnp.int32, (G, GPP), 1)
    seg = jnp.where((j_iota >= g_iota * PP) & (j_iota < (g_iota + 1) * PP), 1.0, 0.0)
    fc7 = jnp.dot(seg, h, preferred_element_type=jnp.float32) * (1.0 / PP)  # (G, F)

    fc7_ref[...] = fc7
    # fused cls_loc + score matmul; output is lane-padded to 128 so the store
    # is a full unmasked vst (sliced back apart in the XLA wrapper).
    head_ref[...] = jnp.dot(fc7, wh_ref[...],
                            preferred_element_type=jnp.float32) + bh_ref[...]


# ------------------------------ JAX glue ----------------------------------- #

def _roi_bins(rois_fmap, roi_size, spatial_scale, H, W):
    """torchvision RoIPool integer bin boundaries (clipped to the feature map)."""
    P = roi_size
    rsw = jnp.round(rois_fmap[:, 0] * spatial_scale).astype(jnp.int32)
    rsh = jnp.round(rois_fmap[:, 1] * spatial_scale).astype(jnp.int32)
    rew = jnp.round(rois_fmap[:, 2] * spatial_scale).astype(jnp.int32)
    reh = jnp.round(rois_fmap[:, 3] * spatial_scale).astype(jnp.int32)
    roi_w = jnp.maximum(rew - rsw + 1, 1).astype(jnp.float32)
    roi_h = jnp.maximum(reh - rsh + 1, 1).astype(jnp.float32)
    bin_h = roi_h / P
    bin_w = roi_w / P
    pidx = jnp.arange(P, dtype=jnp.float32)
    hstart = jnp.floor(pidx[None, :] * bin_h[:, None]).astype(jnp.int32) + rsh[:, None]
    hend = jnp.ceil((pidx[None, :] + 1.0) * bin_h[:, None]).astype(jnp.int32) + rsh[:, None]
    wstart = jnp.floor(pidx[None, :] * bin_w[:, None]).astype(jnp.int32) + rsw[:, None]
    wend = jnp.ceil((pidx[None, :] + 1.0) * bin_w[:, None]).astype(jnp.int32) + rsw[:, None]
    hstart = jnp.clip(hstart, 0, H)
    hend = jnp.clip(hend, 0, H)
    wstart = jnp.clip(wstart, 0, W)
    wend = jnp.clip(wend, 0, W)
    return hstart, hend, wstart, wend


def _scale_rois(rois_flat, img_size, H, W):
    # rois_feature_map[:, [0,2]] = rois[:, [0,2]] / img_W * W_feat, etc.
    return jnp.stack([
        rois_flat[:, 0] / img_size[1] * W,
        rois_flat[:, 1] / img_size[0] * H,
        rois_flat[:, 2] / img_size[1] * W,
        rois_flat[:, 3] / img_size[0] * H,
    ], axis=1)


def resnet_roi_head_forward(x, rois, roi_indices, img_size, params,
                            n_class, roi_size=7, spatial_scale=1.0, stage='val'):
    n, C, H, W = x.shape
    P = roi_size
    F = params['w_cls_conv'].shape[1]
    L4 = params['w_loc'].shape[1]
    NC = params['w_score'].shape[1]

    rois_flat = rois.reshape(-1, 4).astype(jnp.float32)          # flatten(rois, 0, 1)
    ridx = roi_indices.reshape(-1).astype(jnp.int32)             # flatten(roi_indices, 0, 1)
    R = rois_flat.shape[0]

    rois_fmap = _scale_rois(rois_flat, img_size, H, W)
    hstart, hend, wstart, wend = _roi_bins(rois_fmap, P, spatial_scale, H, W)
    # one packed int32 bins array, scalar-prefetched into SMEM
    bins = jnp.concatenate([hstart, hend, wstart, wend], axis=1).astype(jnp.int32)

    # channels-last + bf16 feature map for the DMA; consecutive rois of the same
    # image share the block index so Pallas keeps the image tile resident.
    x_nhwc = jnp.transpose(x, (0, 2, 3, 1)).astype(jnp.bfloat16)

    pool4 = pl.pallas_call(
        _roi_pool_kernel,
        out_shape=jax.ShapeDtypeStruct((R, P, P, C), jnp.bfloat16),
        grid_spec=pltpu.PrefetchScalarGridSpec(
            num_scalar_prefetch=2,
            grid=(R,),
            in_specs=[
                pl.BlockSpec((1, H, W, C), lambda r, ridx, bins: (ridx[r], 0, 0, 0)),
            ],
            out_specs=pl.BlockSpec((1, P, P, C), lambda r, ridx, bins: (r, 0, 0, 0)),
        ),
        compiler_params=pltpu.CompilerParams(dimension_semantics=("parallel",)),
    )(ridx, bins, x_nhwc)

    # (R, P, P, C) -> (R*P*P, C): contiguous metadata reshape, no transpose.
    pool_flat = pool4.reshape(R * P * P, C)

    # batch G rois per head grid step (G*P*P rows per MXU matmul, sublane-aligned)
    G = 8
    R_pad = ((R + G - 1) // G) * G
    if R_pad != R:
        pool_flat = jnp.pad(pool_flat, ((0, (R_pad - R) * P * P), (0, 0)))

    wc = params['w_cls_conv'].astype(jnp.bfloat16)     # bf16 MXU operand
    bc = params['b_cls_conv'].astype(jnp.float32)

    # fuse cls_loc + score into one lane-padded (F, HP) weight so the head
    # output store is lane-dense (HP multiple of 128).
    HP = max(128, ((L4 + NC + 127) // 128) * 128)
    w_head = jnp.zeros((F, HP), dtype=jnp.float32)
    w_head = w_head.at[:, :L4].set(params['w_loc'].astype(jnp.float32))
    w_head = w_head.at[:, L4:L4 + NC].set(params['w_score'].astype(jnp.float32))
    b_head = jnp.zeros((1, HP), dtype=jnp.float32)
    b_head = b_head.at[:, :L4].set(params['b_loc'].astype(jnp.float32))
    b_head = b_head.at[:, L4:L4 + NC].set(params['b_score'].astype(jnp.float32))

    fc7_p, head_p = pl.pallas_call(
        _head_kernel,
        out_shape=(jax.ShapeDtypeStruct((R_pad, F), jnp.float32),
                   jax.ShapeDtypeStruct((R_pad, HP), jnp.float32)),
        grid_spec=pltpu.PrefetchScalarGridSpec(
            num_scalar_prefetch=0,
            grid=(R_pad // G,),
            in_specs=[
                pl.BlockSpec((G * P * P, C), lambda g: (g, 0)),
                pl.BlockSpec((C, F), lambda g: (0, 0)),
                pl.BlockSpec((1, F), lambda g: (0, 0)),
                pl.BlockSpec((F, HP), lambda g: (0, 0)),
                pl.BlockSpec((1, HP), lambda g: (0, 0)),
            ],
            out_specs=[
                pl.BlockSpec((G, F), lambda g: (g, 0)),
                pl.BlockSpec((G, HP), lambda g: (g, 0)),
            ],
        ),
        compiler_params=pltpu.CompilerParams(dimension_semantics=("parallel",)),
    )(pool_flat, wc, bc, w_head, b_head)

    fc7 = fc7_p[:R]                                              # (R, 2048)
    roi_cls_locs = head_p[:R, :L4].reshape(n, -1, L4)            # (n, R/n, n_class*4)
    roi_scores = head_p[:R, L4:L4 + NC].reshape(n, -1, NC)       # (n, R/n, n_class)

    if stage in ('train', 'forward'):
        return roi_cls_locs, roi_scores, fc7
    if stage == 'val':
        return roi_cls_locs, roi_scores
    raise ValueError('stage key error')


# -------------------------- pure-JAX reference ------------------------------ #

def reference_forward(x, rois, roi_indices, img_size, params,
                      n_class, roi_size=7, spatial_scale=1.0):
    n, C, H, W = x.shape
    P = roi_size
    rois_flat = rois.reshape(-1, 4).astype(jnp.float32)
    ridx = roi_indices.reshape(-1).astype(jnp.int32)
    rois_fmap = _scale_rois(rois_flat, img_size, H, W)
    hstart, hend, wstart, wend = _roi_bins(rois_fmap, P, spatial_scale, H, W)

    def pool_one(b, hs, he, ws, we):
        feat = x[b].astype(jnp.float32)                          # (C, H, W)
        hi = jnp.arange(H)
        wi = jnp.arange(W)
        mh = (hi[None, :] >= hs[:, None]) & (hi[None, :] < he[:, None])   # (P, H)
        mw = (wi[None, :] >= ws[:, None]) & (wi[None, :] < we[:, None])   # (P, W)
        xm = jnp.where(mh[None, :, :, None], feat[:, None, :, :], -jnp.inf)
        xh = xm.max(axis=2)                                               # (C, P, W)
        xm2 = jnp.where(mw[None, None, :, :], xh[:, :, None, :], -jnp.inf)
        p = xm2.max(axis=3)                                               # (C, P, P)
        return jnp.where(jnp.isneginf(p), 0.0, p)

    pool = jax.vmap(pool_one)(ridx, hstart, hend, wstart, wend)  # (R, C, P, P)
    pf = pool.transpose(0, 2, 3, 1).reshape(-1, P * P, C)
    h = jnp.maximum(
        jnp.einsum('rpc,cf->rpf', pf, params['w_cls_conv']) + params['b_cls_conv'][None],
        0.0)
    fc7 = h.mean(axis=1)
    locs = fc7 @ params['w_loc'] + params['b_loc']
    scores = fc7 @ params['w_score'] + params['b_score']
    return (locs.reshape(n, -1, locs.shape[-1]),
            scores.reshape(n, -1, scores.shape[-1]))


# --------------------------------- main ------------------------------------ #

if __name__ == "__main__":
    key = jax.random.PRNGKey(0)
    n, C, H, W = 2, 128, 16, 16         # feature map (NCHW); C=128 keeps lanes dense
    img_size = (32.0, 32.0)             # (img_H, img_W)
    n_class = 8
    roi_size = 7
    spatial_scale = 1.0
    num_rois = 4                        # rois per image -> R = 8
    F = 2048                            # module hard-codes Linear(2048, ...)

    keys = jax.random.split(key, 8)
    x = jax.random.normal(keys[0], (n, C, H, W), dtype=jnp.float32)

    x1 = jax.random.uniform(keys[1], (n, num_rois), minval=0.0, maxval=18.0)
    y1 = jax.random.uniform(keys[2], (n, num_rois), minval=0.0, maxval=18.0)
    bw = jax.random.uniform(keys[3], (n, num_rois), minval=4.0, maxval=13.0)
    bh = jax.random.uniform(keys[4], (n, num_rois), minval=4.0, maxval=13.0)
    rois = jnp.stack([x1, y1,
                      jnp.minimum(x1 + bw, 31.0),
                      jnp.minimum(y1 + bh, 31.0)], axis=-1)            # (n, num_rois, 4)
    roi_indices = jnp.tile(jnp.arange(n, dtype=jnp.int32)[:, None], (1, num_rois))

    # deterministic parameter init (normal_init semantics: biases zero,
    # cls_loc std=0.001, score std=0.01; classifier weight arbitrary synthetic)
    params = {
        'w_cls_conv': jax.random.normal(keys[5], (C, F), dtype=jnp.float32) * 0.05,
        'b_cls_conv': jnp.zeros((1, F), dtype=jnp.float32),
        'w_loc': jax.random.normal(keys[6], (F, n_class * 4), dtype=jnp.float32) * 0.001,
        'b_loc': jnp.zeros((1, n_class * 4), dtype=jnp.float32),
        'w_score': jax.random.normal(keys[7], (F, n_class), dtype=jnp.float32) * 0.01,
        'b_score': jnp.zeros((1, n_class), dtype=jnp.float32),
    }

    roi_cls_locs, roi_scores = resnet_roi_head_forward(
        x, rois, roi_indices, img_size, params,
        n_class=n_class, roi_size=roi_size, spatial_scale=spatial_scale, stage='val')
    jax.block_until_ready((roi_cls_locs, roi_scores))

    ref_locs, ref_scores = reference_forward(
        x, rois, roi_indices, img_size, params, n_class, roi_size, spatial_scale)
    np.testing.assert_allclose(np.asarray(roi_cls_locs), np.asarray(ref_locs),
                               rtol=2e-2, atol=2e-2)
    np.testing.assert_allclose(np.asarray(roi_scores), np.asarray(ref_scores),
                               rtol=2e-2, atol=2e-2)
    assert roi_cls_locs.shape == (n, num_rois, n_class * 4)
    assert roi_scores.shape == (n, num_rois, n_class)
    print("KERNEL_OK")
</pallas_src>

<mosaic_0001>
module attributes {stable_mosaic.version = 11 : i64} {
  func.func @_roi_pool_kernel(%arg0: i32, %arg1: memref<8xi32, #tpu.memory_space<smem>>, %arg2: memref<8x28xi32, #tpu.memory_space<smem>>, %arg3: memref<1x16x16x128xbf16, #tpu.memory_space<vmem>>, %arg4: memref<1x7x7x128xbf16, #tpu.memory_space<vmem>>) attributes {dimension_semantics = [#tpu.dimension_semantics<parallel>], iteration_bounds = array<i64: 8>, scalar_prefetch = 2 : i64, scratch_operands = 0 : i64, tpu.core_type = #tpu.core_type<tc>, window_params = [{transform_indices = @transform_0, window_bounds = array<i64: 1, 16, 16, 128>}, {transform_indices = @transform_1, window_bounds = array<i64: 1, 7, 7, 128>}]} {
    %c0 = arith.constant 0 : index
    %c0_0 = arith.constant 0 : index
    %c0_1 = arith.constant 0 : index
    %c0_2 = arith.constant 0 : index
    %0 = vector.load %arg3[%c0, %c0_0, %c0_1, %c0_2] : memref<1x16x16x128xbf16, #tpu.memory_space<vmem>>, vector<1x16x16x128xbf16>
    %1 = vector.shape_cast %0 : vector<1x16x16x128xbf16> to vector<16x16x128xbf16>
    %2 = arith.extf %1 : vector<16x16x128xbf16> to vector<16x16x128xf32>
    %3 = tpu.iota {dimensions = array<i32: 1>} : vector<1x16x1xi32>
    %4 = tpu.iota {dimensions = array<i32: 1>} : vector<1x16x1xi32>
    %5 = arith.index_cast %arg0 : i32 to index
    %c14 = arith.constant 14 : index
    %6 = memref.load %arg2[%5, %c14] : memref<8x28xi32, #tpu.memory_space<smem>>
    %7 = arith.index_cast %arg0 : i32 to index
    %c21 = arith.constant 21 : index
    %8 = memref.load %arg2[%7, %c21] : memref<8x28xi32, #tpu.memory_space<smem>>
    %9 = vector.broadcast %6 : i32 to vector<1x16x1xi32>
    %10 = arith.cmpi sge, %3, %9 : vector<1x16x1xi32>
    %11 = vector.broadcast %8 : i32 to vector<1x16x1xi32>
    %12 = arith.cmpi slt, %3, %11 : vector<1x16x1xi32>
    %13 = arith.andi %10, %12 : vector<1x16x1xi1>
    %cst = arith.constant -3.000000e+38 : f32
    %14 = vector.shape_cast %13 : vector<1x16x1xi1> to vector<1x16x1xi1>
    %15 = vector.broadcast %14 : vector<1x16x1xi1> to vector<16x16x128xi1>
    %16 = vector.broadcast %cst : f32 to vector<16x16x128xf32>
    %17 = arith.select %15, %2, %16 : vector<16x16x128xi1>, vector<16x16x128xf32>
    %cst_3 = arith.constant dense<0xFF800000> : vector<16x128xf32>
    %18 = vector.multi_reduction <maximumf>, %17, %cst_3 [1] : vector<16x16x128xf32> to vector<16x128xf32>
    %19 = arith.cmpi sgt, %8, %6 : i32
    %20 = arith.extui %19 : i1 to i32
    %21 = arith.sitofp %20 : i32 to f32
    %22 = vector.broadcast %21 : f32 to vector<16x128xf32>
    %23 = arith.mulf %18, %22 : vector<16x128xf32>
    %24 = arith.index_cast %arg0 : i32 to index
    %c15 = arith.constant 15 : index
    %25 = memref.load %arg2[%24, %c15] : memref<8x28xi32, #tpu.memory_space<smem>>
    %26 = arith.index_cast %arg0 : i32 to index
    %c22 = arith.constant 22 : index
    %27 = memref.load %arg2[%26, %c22] : memref<8x28xi32, #tpu.memory_space<smem>>
    %28 = vector.broadcast %25 : i32 to vector<1x16x1xi32>
    %29 = arith.cmpi sge, %3, %28 : vector<1x16x1xi32>
    %30 = vector.broadcast %27 : i32 to vector<1x16x1xi32>
    %31 = arith.cmpi slt, %3, %30 : vector<1x16x1xi32>
    %32 = arith.andi %29, %31 : vector<1x16x1xi1>
    %cst_4 = arith.constant -3.000000e+38 : f32
    %33 = vector.shape_cast %32 : vector<1x16x1xi1> to vector<1x16x1xi1>
    %34 = vector.broadcast %33 : vector<1x16x1xi1> to vector<16x16x128xi1>
    %35 = vector.broadcast %cst_4 : f32 to vector<16x16x128xf32>
    %36 = arith.select %34, %2, %35 : vector<16x16x128xi1>, vector<16x16x128xf32>
    %cst_5 = arith.constant dense<0xFF800000> : vector<16x128xf32>
    %37 = vector.multi_reduction <maximumf>, %36, %cst_5 [1] : vector<16x16x128xf32> to vector<16x128xf32>
    %38 = arith.cmpi sgt, %27, %25 : i32
    %39 = arith.extui %38 : i1 to i32
    %40 = arith.sitofp %39 : i32 to f32
    %41 = vector.broadcast %40 : f32 to vector<16x128xf32>
    %42 = arith.mulf %37, %41 : vector<16x128xf32>
    %43 = arith.index_cast %arg0 : i32 to index
    %c16 = arith.constant 16 : index
    %44 = memref.load %arg2[%43, %c16] : memref<8x28xi32, #tpu.memory_space<smem>>
    %45 = arith.index_cast %arg0 : i32 to index
    %c23 = arith.constant 23 : index
    %46 = memref.load %arg2[%45, %c23] : memref<8x28xi32, #tpu.memory_space<smem>>
    %47 = vector.broadcast %44 : i32 to vector<1x16x1xi32>
    %48 = arith.cmpi sge, %3, %47 : vector<1x16x1xi32>
    %49 = vector.broadcast %46 : i32 to vector<1x16x1xi32>
    %50 = arith.cmpi slt, %3, %49 : vector<1x16x1xi32>
    %51 = arith.andi %48, %50 : vector<1x16x1xi1>
    %cst_6 = arith.constant -3.000000e+38 : f32
    %52 = vector.shape_cast %51 : vector<1x16x1xi1> to vector<1x16x1xi1>
    %53 = vector.broadcast %52 : vector<1x16x1xi1> to vector<16x16x128xi1>
    %54 = vector.broadcast %cst_6 : f32 to vector<16x16x128xf32>
    %55 = arith.select %53, %2, %54 : vector<16x16x128xi1>, vector<16x16x128xf32>
    %cst_7 = arith.constant dense<0xFF800000> : vector<16x128xf32>
    %56 = vector.multi_reduction <maximumf>, %55, %cst_7 [1] : vector<16x16x128xf32> to vector<16x128xf32>
    %57 = arith.cmpi sgt, %46, %44 : i32
    %58 = arith.extui %57 : i1 to i32
    %59 = arith.sitofp %58 : i32 to f32
    %60 = vector.broadcast %59 : f32 to vector<16x128xf32>
    %61 = arith.mulf %56, %60 : vector<16x128xf32>
    %62 = arith.index_cast %arg0 : i32 to index
    %c17 = arith.constant 17 : index
    %63 = memref.load %arg2[%62, %c17] : memref<8x28xi32, #tpu.memory_space<smem>>
    %64 = arith.index_cast %arg0 : i32 to index
    %c24 = arith.constant 24 : index
    %65 = memref.load %arg2[%64, %c24] : memref<8x28xi32, #tpu.memory_space<smem>>
    %66 = vector.broadcast %63 : i32 to vector<1x16x1xi32>
    %67 = arith.cmpi sge, %3, %66 : vector<1x16x1xi32>
    %68 = vector.broadcast %65 : i32 to vector<1x16x1xi32>
    %69 = arith.cmpi slt, %3, %68 : vector<1x16x1xi32>
    %70 = arith.andi %67, %69 : vector<1x16x1xi1>
    %cst_8 = arith.constant -3.000000e+38 : f32
    %71 = vector.shape_cast %70 : vector<1x16x1xi1> to vector<1x16x1xi1>
    %72 = vector.broadcast %71 : vector<1x16x1xi1> to vector<16x16x128xi1>
    %73 = vector.broadcast %cst_8 : f32 to vector<16x16x128xf32>
    %74 = arith.select %72, %2, %73 : vector<16x16x128xi1>, vector<16x16x128xf32>
    %cst_9 = arith.constant dense<0xFF800000> : vector<16x128xf32>
    %75 = vector.multi_reduction <maximumf>, %74, %cst_9 [1] : vector<16x16x128xf32> to vector<16x128xf32>
    %76 = arith.cmpi sgt, %65, %63 : i32
    %77 = arith.extui %76 : i1 to i32
    %78 = arith.sitofp %77 : i32 to f32
    %79 = vector.broadcast %78 : f32 to vector<16x128xf32>
    %80 = arith.mulf %75, %79 : vector<16x128xf32>
    %81 = arith.index_cast %arg0 : i32 to index
    %c18 = arith.constant 18 : index
    %82 = memref.load %arg2[%81, %c18] : memref<8x28xi32, #tpu.memory_space<smem>>
    %83 = arith.index_cast %arg0 : i32 to index
    %c25 = arith.constant 25 : index
    %84 = memref.load %arg2[%83, %c25] : memref<8x28xi32, #tpu.memory_space<smem>>
    %85 = vector.broadcast %82 : i32 to vector<1x16x1xi32>
    %86 = arith.cmpi sge, %3, %85 : vector<1x16x1xi32>
    %87 = vector.broadcast %84 : i32 to vector<1x16x1xi32>
    %88 = arith.cmpi slt, %3, %87 : vector<1x16x1xi32>
    %89 = arith.andi %86, %88 : vector<1x16x1xi1>
    %cst_10 = arith.constant -3.000000e+38 : f32
    %90 = vector.shape_cast %89 : vector<1x16x1xi1> to vector<1x16x1xi1>
    %91 = vector.broadcast %90 : vector<1x16x1xi1> to vector<16x16x128xi1>
    %92 = vector.broadcast %cst_10 : f32 to vector<16x16x128xf32>
    %93 = arith.select %91, %2, %92 : vector<16x16x128xi1>, vector<16x16x128xf32>
    %cst_11 = arith.constant dense<0xFF800000> : vector<16x128xf32>
    %94 = vector.multi_reduction <maximumf>, %93, %cst_11 [1] : vector<16x16x128xf32> to vector<16x128xf32>
    %95 = arith.cmpi sgt, %84, %82 : i32
    %96 = arith.extui %95 : i1 to i32
    %97 = arith.sitofp %96 : i32 to f32
    %98 = vector.broadcast %97 : f32 to vector<16x128xf32>
    %99 = arith.mulf %94, %98 : vector<16x128xf32>
    %100 = arith.index_cast %arg0 : i32 to index
    %c19 = arith.constant 19 : index
    %101 = memref.load %arg2[%100, %c19] : memref<8x28xi32, #tpu.memory_space<smem>>
    %102 = arith.index_cast %arg0 : i32 to index
    %c26 = arith.constant 26 : index
    %103 = memref.load %arg2[%102, %c26] : memref<8x28xi32, #tpu.memory_space<smem>>
    %104 = vector.broadcast %101 : i32 to vector<1x16x1xi32>
    %105 = arith.cmpi sge, %3, %104 : vector<1x16x1xi32>
    %106 = vector.broadcast %103 : i32 to vector<1x16x1xi32>
    %107 = arith.cmpi slt, %3, %106 : vector<1x16x1xi32>
    %108 = arith.andi %105, %107 : vector<1x16x1xi1>
    %cst_12 = arith.constant -3.000000e+38 : f32
    %109 = vector.shape_cast %108 : vector<1x16x1xi1> to vector<1x16x1xi1>
    %110 = vector.broadcast %109 : vector<1x16x1xi1> to vector<16x16x128xi1>
    %111 = vector.broadcast %cst_12 : f32 to vector<16x16x128xf32>
    %112 = arith.select %110, %2, %111 : vector<16x16x128xi1>, vector<16x16x128xf32>
    %cst_13 = arith.constant dense<0xFF800000> : vector<16x128xf32>
    %113 = vector.multi_reduction <maximumf>, %112, %cst_13 [1] : vector<16x16x128xf32> to vector<16x128xf32>
    %114 = arith.cmpi sgt, %103, %101 : i32
    %115 = arith.extui %114 : i1 to i32
    %116 = arith.sitofp %115 : i32 to f32
    %117 = vector.broadcast %116 : f32 to vector<16x128xf32>
    %118 = arith.mulf %113, %117 : vector<16x128xf32>
    %119 = arith.index_cast %arg0 : i32 to index
    %c20 = arith.constant 20 : index
    %120 = memref.load %arg2[%119, %c20] : memref<8x28xi32, #tpu.memory_space<smem>>
    %121 = arith.index_cast %arg0 : i32 to index
    %c27 = arith.constant 27 : index
    %122 = memref.load %arg2[%121, %c27] : memref<8x28xi32, #tpu.memory_space<smem>>
    %123 = vector.broadcast %120 : i32 to vector<1x16x1xi32>
    %124 = arith.cmpi sge, %3, %123 : vector<1x16x1xi32>
    %125 = vector.broadcast %122 : i32 to vector<1x16x1xi32>
    %126 = arith.cmpi slt, %3, %125 : vector<1x16x1xi32>
    %127 = arith.andi %124, %126 : vector<1x16x1xi1>
    %cst_14 = arith.constant -3.000000e+38 : f32
    %128 = vector.shape_cast %127 : vector<1x16x1xi1> to vector<1x16x1xi1>
    %129 = vector.broadcast %128 : vector<1x16x1xi1> to vector<16x16x128xi1>
    %130 = vector.broadcast %cst_14 : f32 to vector<16x16x128xf32>
    %131 = arith.select %129, %2, %130 : vector<16x16x128xi1>, vector<16x16x128xf32>
    %cst_15 = arith.constant dense<0xFF800000> : vector<16x128xf32>
    %132 = vector.multi_reduction <maximumf>, %131, %cst_15 [1] : vector<16x16x128xf32> to vector<16x128xf32>
    %133 = arith.cmpi sgt, %122, %120 : i32
    %134 = arith.extui %133 : i1 to i32
    %135 = arith.sitofp %134 : i32 to f32
    %136 = vector.broadcast %135 : f32 to vector<16x128xf32>
    %137 = arith.mulf %132, %136 : vector<16x128xf32>
    %138 = vector.shape_cast %23 : vector<16x128xf32> to vector<1x16x128xf32>
    %139 = vector.shape_cast %42 : vector<16x128xf32> to vector<1x16x128xf32>
    %140 = vector.shape_cast %61 : vector<16x128xf32> to vector<1x16x128xf32>
    %141 = vector.shape_cast %80 : vector<16x128xf32> to vector<1x16x128xf32>
    %142 = vector.shape_cast %99 : vector<16x128xf32> to vector<1x16x128xf32>
    %143 = vector.shape_cast %118 : vector<16x128xf32> to vector<1x16x128xf32>
    %144 = vector.shape_cast %137 : vector<16x128xf32> to vector<1x16x128xf32>
    %145 = tpu.concatenate %138, %139, %140, %141, %142, %143, %144 in 0 : vector<1x16x128xf32>, vector<1x16x128xf32>, vector<1x16x128xf32>, vector<1x16x128xf32>, vector<1x16x128xf32>, vector<1x16x128xf32>, vector<1x16x128xf32> -> vector<7x16x128xf32>
    %146 = arith.index_cast %arg0 : i32 to index
    %c0_16 = arith.constant 0 : index
    %147 = memref.load %arg2[%146, %c0_16] : memref<8x28xi32, #tpu.memory_space<smem>>
    %148 = arith.index_cast %arg0 : i32 to index
    %c7 = arith.constant 7 : index
    %149 = memref.load %arg2[%148, %c7] : memref<8x28xi32, #tpu.memory_space<smem>>
    %150 = vector.broadcast %147 : i32 to vector<1x16x1xi32>
    %151 = arith.cmpi sge, %4, %150 : vector<1x16x1xi32>
    %152 = vector.broadcast %149 : i32 to vector<1x16x1xi32>
    %153 = arith.cmpi slt, %4, %152 : vector<1x16x1xi32>
    %154 = arith.andi %151, %153 : vector<1x16x1xi1>
    %cst_17 = arith.constant -3.000000e+38 : f32
    %155 = vector.shape_cast %154 : vector<1x16x1xi1> to vector<1x16x1xi1>
    %156 = vector.broadcast %155 : vector<1x16x1xi1> to vector<7x16x128xi1>
    %157 = vector.broadcast %cst_17 : f32 to vector<7x16x128xf32>
    %158 = arith.select %156, %145, %157 : vector<7x16x128xi1>, vector<7x16x128xf32>
    %cst_18 = arith.constant dense<0xFF800000> : vector<7x128xf32>
    %159 = vector.multi_reduction <maximumf>, %158, %cst_18 [1] : vector<7x16x128xf32> to vector<7x128xf32>
    %160 = arith.cmpi sgt, %149, %147 : i32
    %161 = arith.extui %160 : i1 to i32
    %162 = arith.sitofp %161 : i32 to f32
    %163 = vector.broadcast %162 : f32 to vector<7x128xf32>
    %164 = arith.mulf %159, %163 : vector<7x128xf32>
    %165 = arith.index_cast %arg0 : i32 to index
    %c1 = arith.constant 1 : index
    %166 = memref.load %arg2[%165, %c1] : memref<8x28xi32, #tpu.memory_space<smem>>
    %167 = arith.index_cast %arg0 : i32 to index
    %c8 = arith.constant 8 : index
    %168 = memref.load %arg2[%167, %c8] : memref<8x28xi32, #tpu.memory_space<smem>>
    %169 = vector.broadcast %166 : i32 to vector<1x16x1xi32>
    %170 = arith.cmpi sge, %4, %169 : vector<1x16x1xi32>
    %171 = vector.broadcast %168 : i32 to vector<1x16x1xi32>
    %172 = arith.cmpi slt, %4, %171 : vector<1x16x1xi32>
    %173 = arith.andi %170, %172 : vector<1x16x1xi1>
    %cst_19 = arith.constant -3.000000e+38 : f32
    %174 = vector.shape_cast %173 : vector<1x16x1xi1> to vector<1x16x1xi1>
    %175 = vector.broadcast %174 : vector<1x16x1xi1> to vector<7x16x128xi1>
    %176 = vector.broadcast %cst_19 : f32 to vector<7x16x128xf32>
    %177 = arith.select %175, %145, %176 : vector<7x16x128xi1>, vector<7x16x128xf32>
    %cst_20 = arith.constant dense<0xFF800000> : vector<7x128xf32>
    %178 = vector.multi_reduction <maximumf>, %177, %cst_20 [1] : vector<7x16x128xf32> to vector<7x128xf32>
    %179 = arith.cmpi sgt, %168, %166 : i32
    %180 = arith.extui %179 : i1 to i32
    %181 = arith.sitofp %180 : i32 to f32
    %182 = vector.broadcast %181 : f32 to vector<7x128xf32>
    %183 = arith.mulf %178, %182 : vector<7x128xf32>
    %184 = arith.index_cast %arg0 : i32 to index
    %c2 = arith.constant 2 : index
    %185 = memref.load %arg2[%184, %c2] : memref<8x28xi32, #tpu.memory_space<smem>>
    %186 = arith.index_cast %arg0 : i32 to index
    %c9 = arith.constant 9 : index
    %187 = memref.load %arg2[%186, %c9] : memref<8x28xi32, #tpu.memory_space<smem>>
    %188 = vector.broadcast %185 : i32 to vector<1x16x1xi32>
    %189 = arith.cmpi sge, %4, %188 : vector<1x16x1xi32>
    %190 = vector.broadcast %187 : i32 to vector<1x16x1xi32>
    %191 = arith.cmpi slt, %4, %190 : vector<1x16x1xi32>
    %192 = arith.andi %189, %191 : vector<1x16x1xi1>
    %cst_21 = arith.constant -3.000000e+38 : f32
    %193 = vector.shape_cast %192 : vector<1x16x1xi1> to vector<1x16x1xi1>
    %194 = vector.broadcast %193 : vector<1x16x1xi1> to vector<7x16x128xi1>
    %195 = vector.broadcast %cst_21 : f32 to vector<7x16x128xf32>
    %196 = arith.select %194, %145, %195 : vector<7x16x128xi1>, vector<7x16x128xf32>
    %cst_22 = arith.constant dense<0xFF800000> : vector<7x128xf32>
    %197 = vector.multi_reduction <maximumf>, %196, %cst_22 [1] : vector<7x16x128xf32> to vector<7x128xf32>
    %198 = arith.cmpi sgt, %187, %185 : i32
    %199 = arith.extui %198 : i1 to i32
    %200 = arith.sitofp %199 : i32 to f32
    %201 = vector.broadcast %200 : f32 to vector<7x128xf32>
    %202 = arith.mulf %197, %201 : vector<7x128xf32>
    %203 = arith.index_cast %arg0 : i32 to index
    %c3 = arith.constant 3 : index
    %204 = memref.load %arg2[%203, %c3] : memref<8x28xi32, #tpu.memory_space<smem>>
    %205 = arith.index_cast %arg0 : i32 to index
    %c10 = arith.constant 10 : index
    %206 = memref.load %arg2[%205, %c10] : memref<8x28xi32, #tpu.memory_space<smem>>
    %207 = vector.broadcast %204 : i32 to vector<1x16x1xi32>
    %208 = arith.cmpi sge, %4, %207 : vector<1x16x1xi32>
    %209 = vector.broadcast %206 : i32 to vector<1x16x1xi32>
    %210 = arith.cmpi slt, %4, %209 : vector<1x16x1xi32>
    %211 = arith.andi %208, %210 : vector<1x16x1xi1>
    %cst_23 = arith.constant -3.000000e+38 : f32
    %212 = vector.shape_cast %211 : vector<1x16x1xi1> to vector<1x16x1xi1>
    %213 = vector.broadcast %212 : vector<1x16x1xi1> to vector<7x16x128xi1>
    %214 = vector.broadcast %cst_23 : f32 to vector<7x16x128xf32>
    %215 = arith.select %213, %145, %214 : vector<7x16x128xi1>, vector<7x16x128xf32>
    %cst_24 = arith.constant dense<0xFF800000> : vector<7x128xf32>
    %216 = vector.multi_reduction <maximumf>, %215, %cst_24 [1] : vector<7x16x128xf32> to vector<7x128xf32>
    %217 = arith.cmpi sgt, %206, %204 : i32
    %218 = arith.extui %217 : i1 to i32
    %219 = arith.sitofp %218 : i32 to f32
    %220 = vector.broadcast %219 : f32 to vector<7x128xf32>
    %221 = arith.mulf %216, %220 : vector<7x128xf32>
    %222 = arith.index_cast %arg0 : i32 to index
    %c4 = arith.constant 4 : index
    %223 = memref.load %arg2[%222, %c4] : memref<8x28xi32, #tpu.memory_space<smem>>
    %224 = arith.index_cast %arg0 : i32 to index
    %c11 = arith.constant 11 : index
    %225 = memref.load %arg2[%224, %c11] : memref<8x28xi32, #tpu.memory_space<smem>>
    %226 = vector.broadcast %223 : i32 to vector<1x16x1xi32>
    %227 = arith.cmpi sge, %4, %226 : vector<1x16x1xi32>
    %228 = vector.broadcast %225 : i32 to vector<1x16x1xi32>
    %229 = arith.cmpi slt, %4, %228 : vector<1x16x1xi32>
    %230 = arith.andi %227, %229 : vector<1x16x1xi1>
    %cst_25 = arith.constant -3.000000e+38 : f32
    %231 = vector.shape_cast %230 : vector<1x16x1xi1> to vector<1x16x1xi1>
    %232 = vector.broadcast %231 : vector<1x16x1xi1> to vector<7x16x128xi1>
    %233 = vector.broadcast %cst_25 : f32 to vector<7x16x128xf32>
    %234 = arith.select %232, %145, %233 : vector<7x16x128xi1>, vector<7x16x128xf32>
    %cst_26 = arith.constant dense<0xFF800000> : vector<7x128xf32>
    %235 = vector.multi_reduction <maximumf>, %234, %cst_26 [1] : vector<7x16x128xf32> to vector<7x128xf32>
    %236 = arith.cmpi sgt, %225, %223 : i32
    %237 = arith.extui %236 : i1 to i32
    %238 = arith.sitofp %237 : i32 to f32
    %239 = vector.broadcast %238 : f32 to vector<7x128xf32>
    %240 = arith.mulf %235, %239 : vector<7x128xf32>
    %241 = arith.index_cast %arg0 : i32 to index
    %c5 = arith.constant 5 : index
    %242 = memref.load %arg2[%241, %c5] : memref<8x28xi32, #tpu.memory_space<smem>>
    %243 = arith.index_cast %arg0 : i32 to index
    %c12 = arith.constant 12 : index
    %244 = memref.load %arg2[%243, %c12] : memref<8x28xi32, #tpu.memory_space<smem>>
    %245 = vector.broadcast %242 : i32 to vector<1x16x1xi32>
    %246 = arith.cmpi sge, %4, %245 : vector<1x16x1xi32>
    %247 = vector.broadcast %244 : i32 to vector<1x16x1xi32>
    %248 = arith.cmpi slt, %4, %247 : vector<1x16x1xi32>
    %249 = arith.andi %246, %248 : vector<1x16x1xi1>
    %cst_27 = arith.constant -3.000000e+38 : f32
    %250 = vector.shape_cast %249 : vector<1x16x1xi1> to vector<1x16x1xi1>
    %251 = vector.broadcast %250 : vector<1x16x1xi1> to vector<7x16x128xi1>
    %252 = vector.broadcast %cst_27 : f32 to vector<7x16x128xf32>
    %253 = arith.select %251, %145, %252 : vector<7x16x128xi1>, vector<7x16x128xf32>
    %cst_28 = arith.constant dense<0xFF800000> : vector<7x128xf32>
    %254 = vector.multi_reduction <maximumf>, %253, %cst_28 [1] : vector<7x16x128xf32> to vector<7x128xf32>
    %255 = arith.cmpi sgt, %244, %242 : i32
    %256 = arith.extui %255 : i1 to i32
    %257 = arith.sitofp %256 : i32 to f32
    %258 = vector.broadcast %257 : f32 to vector<7x128xf32>
    %259 = arith.mulf %254, %258 : vector<7x128xf32>
    %260 = arith.index_cast %arg0 : i32 to index
    %c6 = arith.constant 6 : index
    %261 = memref.load %arg2[%260, %c6] : memref<8x28xi32, #tpu.memory_space<smem>>
    %262 = arith.index_cast %arg0 : i32 to index
    %c13 = arith.constant 13 : index
    %263 = memref.load %arg2[%262, %c13] : memref<8x28xi32, #tpu.memory_space<smem>>
    %264 = vector.broadcast %261 : i32 to vector<1x16x1xi32>
    %265 = arith.cmpi sge, %4, %264 : vector<1x16x1xi32>
    %266 = vector.broadcast %263 : i32 to vector<1x16x1xi32>
    %267 = arith.cmpi slt, %4, %266 : vector<1x16x1xi32>
    %268 = arith.andi %265, %267 : vector<1x16x1xi1>
    %cst_29 = arith.constant -3.000000e+38 : f32
    %269 = vector.shape_cast %268 : vector<1x16x1xi1> to vector<1x16x1xi1>
    %270 = vector.broadcast %269 : vector<1x16x1xi1> to vector<7x16x128xi1>
    %271 = vector.broadcast %cst_29 : f32 to vector<7x16x128xf32>
    %272 = arith.select %270, %145, %271 : vector<7x16x128xi1>, vector<7x16x128xf32>
    %cst_30 = arith.constant dense<0xFF800000> : vector<7x128xf32>
    %273 = vector.multi_reduction <maximumf>, %272, %cst_30 [1] : vector<7x16x128xf32> to vector<7x128xf32>
    %274 = arith.cmpi sgt, %263, %261 : i32
    %275 = arith.extui %274 : i1 to i32
    %276 = arith.sitofp %275 : i32 to f32
    %277 = vector.broadcast %276 : f32 to vector<7x128xf32>
    %278 = arith.mulf %273, %277 : vector<7x128xf32>
    %279 = vector.shape_cast %164 : vector<7x128xf32> to vector<1x7x128xf32>
    %280 = vector.shape_cast %183 : vector<7x128xf32> to vector<1x7x128xf32>
    %281 = vector.shape_cast %202 : vector<7x128xf32> to vector<1x7x128xf32>
    %282 = vector.shape_cast %221 : vector<7x128xf32> to vector<1x7x128xf32>
    %283 = vector.shape_cast %240 : vector<7x128xf32> to vector<1x7x128xf32>
    %284 = vector.shape_cast %259 : vector<7x128xf32> to vector<1x7x128xf32>
    %285 = vector.shape_cast %278 : vector<7x128xf32> to vector<1x7x128xf32>
    %286 = tpu.concatenate %279, %280, %281, %282, %283, %284, %285 in 0 : vector<1x7x128xf32>, vector<1x7x128xf32>, vector<1x7x128xf32>, vector<1x7x128xf32>, vector<1x7x128xf32>, vector<1x7x128xf32>, vector<1x7x128xf32> -> vector<7x7x128xf32>
    %287 = arith.truncf %286 : vector<7x7x128xf32> to vector<7x7x128xbf16>
    %c0_31 = arith.constant 0 : index
    %c0_32 = arith.constant 0 : index
    %c0_33 = arith.constant 0 : index
    %c0_34 = arith.constant 0 : index
    %288 = vector.load %arg4[%c0_31, %c0_32, %c0_33, %c0_34] : memref<1x7x7x128xbf16, #tpu.memory_space<vmem>>, vector<1x7x7x128xbf16>
    %289 = vector.shape_cast %288 : vector<1x7x7x128xbf16> to vector<7x7x128xbf16>
    %290 = vector.shape_cast %287 : vector<7x7x128xbf16> to vector<1x7x7x128xbf16>
    tpu.vector_store %arg4[%c0_31, %c0_32, %c0_33, %c0_34], %290 {strides = array<i32>} : memref<1x7x7x128xbf16, #tpu.memory_space<vmem>>, vector<1x7x7x128xbf16>,
    return
  }
  func.func @transform_0(%arg0: i32, %arg1: memref<8xi32, #tpu.memory_space<smem>>, %arg2: memref<8x28xi32, #tpu.memory_space<smem>>) -> (i32, i32, i32, i32) {
    %0 = arith.index_cast %arg0 : i32 to index
    %1 = memref.load %arg1[%0] : memref<8xi32, #tpu.memory_space<smem>>
    %c0_i32 = arith.constant 0 : i32
    %c0_i32_0 = arith.constant 0 : i32
    %c0_i32_1 = arith.constant 0 : i32
    %c0_i32_2 = arith.constant 0 : i32
    return %1, %c0_i32, %c0_i32_0, %c0_i32_1 : i32, i32, i32, i32
  }
  func.func @transform_1(%arg0: i32, %arg1: memref<8xi32, #tpu.memory_space<smem>>, %arg2: memref<8x28xi32, #tpu.memory_space<smem>>) -> (i32, i32, i32, i32) {
    %c0_i32 = arith.constant 0 : i32
    %c0_i32_0 = arith.constant 0 : i32
    %c0_i32_1 = arith.constant 0 : i32
    %c0_i32_2 = arith.constant 0 : i32
    return %arg0, %c0_i32, %c0_i32_0, %c0_i32_1 : i32, i32, i32, i32
  }
}

</mosaic_0001>

<bundles_post_ra>
// kernel: tpu_custom_call.1
= control target key start
LH: loop header
LB: loop body
LE: loop exit
PB: predicated region body
PF: predicated region fallthrough
CT: control target
= control target key end

     0   :  { %s6312_s0 = inlined_call_operand.hbm [shape: s32[8], index: 0, kind: input, shape index: {}]   ;;  %s6313_s2 = inlined_call_operand.hbm [shape: bf16[2,16,16,128], index: 2, kind: input, shape index: {}]   ;;  %s6314_s3 = inlined_call_operand.vmem [shape: bf16[8,7,7,128], index: 3, kind: output, shape index: {}]   ;;  %s6315_s1 = inlined_call_operand.hbm [shape: s32[8,28], index: 1, kind: input, shape index: {}]  }
   0x1   :  { %s3107_s14 = scalar_lea.hbm %s6312_s0, 16 }
   0x2   :  { %p3108_p0 = scmp.ne.s32.totalorder %s6312_s0, %s3107_s14  ;;  %p3111_p1 = scmp.lt.u32.totalorder %s3107_s14, %s6312_s0 }
   0x4   :  { %p3113_p2 = pnand %p3111_p1, %p3108_p0 }
   0x6   :  { %3116 = shalt.err (!%p3113_p2)  }
   0x7   :  { %s3195_s19 = smov [#allocation3]   ;;  %s3117_s24 = scalar_lea.hbm %s6315_s1, 128 }
   0x8   :  { %9 = dma.hbm_to_smem %s6312_s0, 16, %s3195_s19, [#allocation2] }
   0x9   :  { %p3118_p3 = scmp.ne.s32.totalorder %s6315_s1, %s3117_s24  ;;  %p3121_p4 = scmp.lt.u32.totalorder %s3117_s24, %s6315_s1 }
   0xb   :  { %p3123_p5 = pnand %p3121_p4, %p3118_p3 }
   0xd   :  { %3126 = shalt.err (!%p3123_p5)  }
   0xe   :  { %s3196_s29 = smov [#allocation4]  }
   0xf   :  { %11 = dma.hbm_to_smem %s6315_s1, 128, %s3196_s29, [#allocation2] }
  0x10   :  { %3173 = dma.done.wait [#allocation2], 144 }
  0x11   :  { %3174 = vsyncadd [#allocation2], 4294967152 }
  0x12   :  { %13 = sfence }
  0x13   :  { %14 = vsyncpa [#allocation6], 0 }
  0x14   :  { %16 = vsyncpa [#allocation6 + $0x1], 0  ;;  %s3244_s0 = smov 0   ;;  %s3246_s5 = smov 0  }
  0x15   :  { %s3248_s6 = smov 0   ;;  %s3250_s7 = smov 0  }
  0x16 LB: > { %s3260_s1 = sadd.s32 4294967295, %s3193_s7   ;;  %s3262_s8 = sadd.s32 1, %s3193_s7   ;;  %s3193_s7 = sphi %s3250_s7, %s6876_s7   ;;  %s3189_s6 = sphi %s3248_s6, %s6875_s6   ;;  %s3185_s5 = sphi %s3246_s5, %s6874_s5   ;;  %s3181_s0 = sphi %s3244_s0, %s6873_s0  }
  0x17   : > { %s26_s9 = sld [smem:[#allocation3 + %s3193_s7]]  ;;  %p38_p6 = scmp.ne.s32.totalorder %s3189_s6, %s3185_s5 }
  0x18   : > { %s27_s10 = sld [smem:[#allocation3 + %s3262_s8]]  ;;  %p39_p7 = scmp.eq.s32.totalorder %s3193_s7, 0 }
  0x19   : > { %p44_p8 = scmp.ne.s32.totalorder %s3185_s5, %s3181_s0  ;;  %p45_p9 = scmp.eq.s32.totalorder %s3260_s1, 0 }
  0x1a   : > { %s31_s11 = sadd.s32 1, %s3189_s6  ;;  %p40_p10 = por %p39_p7, %p38_p6 }
  0x1b   : > { %p3270_p11 = por %p45_p9, %p44_p8  ;;  %s94_s13 = sand.u32 1, %s3189_s6  }
  0x1c   : > { %p3070_p12 = scmp.lt.s32.totalorder %s3193_s7, 8  ;;  %s2872_s15 = sshll.u32 %s94_s13, 7 }
  0x1d   : > { %s6376_s12 = scalar_select %p3270_p11, 1, 0 }
  0x1e   : > { %s28_s14 = ssub.s32 %s26_s9, %s27_s10  ;;  %p3275_p0 = pnand %p3070_p12, %p40_p10 }
  0x1f   : > { %p29_p13 = scmp.eq.s32.totalorder %s28_s14, 0  ;;  %s98_s21 = scalar_lea.vmem [#allocation5], %s2872_s15 }
  0x20   : > { %s3060_s18 = scalar_select %p40_p10, [#allocation3], [#allocation7] }
  0x21   : > { %s3280_s17 = scalar_select %p29_p13, %s3189_s6, %s31_s11  }
  0x22   : > { %s3061_s19 = scalar_select %p40_p10, %s3193_s7, 0 }
  0x23   : > { %s6878_s18 = smov (!%p3070_p12, %s3060_s18), [#allocation8]  ;;  %s106_s22 = sshll.u32 %s98_s21, 4  ;;  %s3282_s22 = int_to_ptr.vmem [resolvable:$true] %s106_s22 }
  0x24   : > { %s6880_s19 = smov (!%p3070_p12, %s3061_s19), 0  ;;  %p2875_p1 = scmp.ge.s32.totalorder %s3193_s7, 1 }
  0x25   : > { %s99_s20 = sld [smem:[%s6878_s18 + %s6880_s19]]  ;;  %p114_p2 = scmp.lt.s32.totalorder %s3193_s7, 9 }
  0x26   : > { %s3293_s28 = scalar_lea.sflag [#allocation6], %s94_s13  ;;  %p3129_p5 = pneg %p3275_p0 }
  0x27   : > { %p3284_p3 = pnand %p2875_p1, %p114_p2  ;;  %s3132_s0 = scalar_lea.hbm %s6313_s2, 4096 }
  0x2b   : > { %s2930_s24 = sshll.u32 %s99_s20, 11 }
  0x2c   : > { %s3291_s27 = scalar_lea.hbm %s6313_s2, %s2930_s24 }
  0x2d   : > { %s3127_s29 = scalar_lea.hbm %s3291_s27, 2048  ;;  %p3133_p8 = scmp.lt.u32.totalorder %s3291_s27, %s6313_s2 }
  0x2e   : > { %p3128_p4 = scmp.ne.s32.totalorder %s3291_s27, %s3127_s29  ;;  %p3134_p9 = scmp.lt.u32.totalorder %s3132_s0, %s3127_s29 }
  0x2f   : > { %p3136_p12 = scmp.lt.u32.totalorder %s3127_s29, %s3291_s27 }
  0x30   : > { %p3130_p6 = pnand %p3129_p5, %p3128_p4  ;;  %p3135_p10 = por %p3134_p9, %p3133_p8 }
  0x32   : > { %p3131_p7 = pneg %p3130_p6  ;;  %p3137_p13 = por %p3136_p12, %p3135_p10 }
  0x34   : > { %p3138_p1 = pnand %p3137_p13, %p3131_p7 }
  0x36   : > { %3141 = shalt.err (!%p3138_p1)
}
  0x37   : > { %s3142_s10 = scalar_lea.vmem %s3282_s22, 2048  ;;  %s3197_s11 = smov [#allocation5]  }
  0x38   : > { %p3143_p2 = scmp.ne.s32.totalorder %s3282_s22, %s3142_s10  ;;  %s3147_s13 = sshll.u32 %s3197_s11, 4  ;;  %s3148_s13 = int_to_ptr.vmem [resolvable:$false] %s3147_s13 }
  0x39   : > { %s3149_s14 = scalar_lea.vmem %s3148_s13, 4096  ;;  %p3150_p11 = scmp.lt.s32.totalorder %s3282_s22, %s3148_s13 }
  0x3a   : > { %p3145_p4 = pnand %p3143_p2, %p3129_p5  ;;  %p3151_p8 = scmp.lt.s32.totalorder %s3149_s14, %s3142_s10 }
  0x3c   : > { %p3146_p6 = pneg %p3145_p4  ;;  %p3152_p9 = por %p3151_p8, %p3150_p11 }
  0x3e   : > { %p3153_p10 = pnand %p3152_p9, %p3146_p6 }
  0x40   : > { %3156 = shalt.err (!%p3153_p10)
}
  0x41   : > { %s3198_s15 = smov 64   ;;  %s3199_s18 = smov 4  }
  0x42   : > { %3069 = dma.hbm_to_vmem [thread:$0]  (!%p3275_p0), %s3291_s27, 2048, %s3282_s22, %s3293_s28, %s3198_s15, %s3198_s15, %s3199_s18  }
  0x43   : > { %118 = sbr.rel (%p3284_p3) target bundleno = 638 (0x27e), region = 24 }
  0x4a   : > { %s120_s19 = sand.u32 1, %s3185_s5   ;;  %p6379_p11 = scmp.ne.s32.totalorder %s6376_s12, 0 }
  0x4b   : > { %s2876_s20 = sshll.u32 %s120_s19, 7  ;;  %s121_s21 = scalar_lea.sflag [#allocation6], %s120_s19 }
  0x4c   : > { %s3324_s24 = scalar_lea.vmem [#allocation5], %s2876_s20 }
  0x4d   : > { %3176 = dma.done.wait (%p6379_p11), %s121_s21, 2048  }
  0x4e   : > { %3178 = vsyncadd (%p6379_p11), %s121_s21, 4294965248  ;;  %v213_v0 = vlaneseq  ;;  %s3331_s16 = sshll.u32 %s3260_s1, 7  ;;  %v2981_v2 = vld [vmem:[%s3324_s24] sm:$0xff]   ;;  %v3044_v3 = vld [vmem:[%s3324_s24 + $0x8] sm:$0xff]  }
  0x4f   : > { %s217_s22 = sadd.s32 14, %s3331_s16  ;;  %s219_s23 = sadd.s32 21, %s3331_s16  ;;  %v3045_v4 = vld [vmem:[%s3324_s24 + $0x10] sm:$0xff]   ;;  %v3046_v5 = vld [vmem:[%s3324_s24 + $0x18] sm:$0xff]   ;;  %v3047_v6 = vld [vmem:[%s3324_s24 + $0x20] sm:$0xff]   ;;  %v3350_v9 = vunpack.c.l.bf16 %v2981_v2  ;;  %v3352_v10 = vunpack.c.h.bf16 %v2981_v2  ;;  %v3354_v11 = vunpack.c.l.bf16 %v3044_v3  ;;  %v3356_v12 = vunpack.c.h.bf16 %v3044_v3 }
  0x50   : > { %v3335_v1 = vshrl.u32 %v213_v0, 7  ;;  %s3337_s12 = sld [smem:[#allocation4 + %s217_s22]]  ;;  %v3048_v7 = vld [vmem:[%s3324_s24 + $0x28] sm:$0xff]   ;;  %v3049_v13 = vld [vmem:[%s3324_s24 + $0x30] sm:$0xff]   ;;  %v3050_v14 = vld [vmem:[%s3324_s24 + $0x38] sm:$0xff]   ;;  %v3360_v15 = vunpack.c.l.bf16 %v3045_v4  ;;  %v3362_v16 = vunpack.c.h.bf16 %v3045_v4  ;;  %v3364_v17 = vunpack.c.l.bf16 %v3046_v5  ;;  %s397_s26 = sadd.s32 15, %s3331_s16 }
  0x51   : > { %s3339_s25 = sld [smem:[#allocation4 + %s219_s23]]  ;;  %v3366_v18 = vunpack.c.h.bf16 %v3046_v5  ;;  %v3051_v19 = vld [vmem:[%s3324_s24 + $0x40] sm:$0xff]   ;;  %v3369_v20 = vunpack.c.l.bf16 %v3047_v6  ;;  %v3371_v21 = vunpack.c.h.bf16 %v3047_v6  ;;  %v3373_v22 = vunpack.c.l.bf16 %v3048_v7  ;;  %v3052_v28 = vld [vmem:[%s3324_s24 + $0x48] sm:$0xff]   ;;  %v3053_v29 = vld [vmem:[%s3324_s24 + $0x50] sm:$0xff]   ;;  %s399_s27 = sadd.s32 22, %s3331_s16 }
  0x52   : > { %6380 = vst [vmem:[#allocation11_spill] sm:$0xff] %v3335_v1  ;;  %v3348_v8 = vadd.s32 8, %v3335_v1  ;;  %v3375_v23 = vunpack.c.h.bf16 %v3048_v7  ;;  %v3378_v24 = vunpack.c.l.bf16 %v3049_v13  ;;  %v3380_v25 = vunpack.c.h.bf16 %v3049_v13  ;;  %v3054_v32 = vld [vmem:[%s3324_s24 + $0x58] sm:$0xff]   ;;  %v3055_v33 = vld [vmem:[%s3324_s24 + $0x60] sm:$0xff]   ;;  %v3056_v36 = vld [vmem:[%s3324_s24 + $0x68] sm:$0xff]   ;;  %s3420_s28 = sld [smem:[#allocation4 + %s397_s26]] }
  0x53   : > { %v3382_v26 = vunpack.c.l.bf16 %v3050_v14  ;;  %v3384_v27 = vunpack.c.h.bf16 %v3050_v14  ;;  %v3391_v30 = vunpack.c.l.bf16 %v3051_v19  ;;  %v3393_v31 = vunpack.c.h.bf16 %v3051_v19  ;;  %s3422_s29 = sld [smem:[#allocation4 + %s399_s27]]  ;;  %v3057_v47 = vld [vmem:[%s3324_s24 + $0x70] sm:$0xff]   ;;  %v3058_v48 = vld [vmem:[%s3324_s24 + $0x78] sm:$0xff]   ;;  %s577_s9 = sadd.s32 16, %s3331_s16 }
  0x54   : > { %6381 = vst [vmem:[#allocation12_spill] sm:$0xff] %v3348_v8  ;;  %6382 = vst [vmem:[#allocation13_spill] sm:$0xff] %v3375_v23  ;;  %v3408_v38 = vunpack.c.l.bf16 %v3052_v28  ;;  %v3410_v39 = vunpack.c.h.bf16 %v3052_v28  ;;  %v3412_v40 = vunpack.c.l.bf16 %v3053_v29  ;;  %v3414_v41 = vunpack.c.h.bf16 %v3053_v29  ;;  %s579_s10 = sadd.s32 23, %s3331_s16  ;;  %s3816_s11 = sld [smem:[#allocation4 + %s577_s9]] }
  0x55   : > { %6383 = vst [vmem:[#allocation14_spill] sm:$0xff] %v3378_v24  ;;  %6384 = vst [vmem:[#allocation15_spill] sm:$0xff] %v3380_v25  ;;  %v3424_v43 = vunpack.c.l.bf16 %v3054_v32  ;;  %v3426_v44 = vunpack.c.h.bf16 %v3054_v32  ;;  %v3428_v45 = vunpack.c.l.bf16 %v3055_v33  ;;  %v3430_v46 = vunpack.c.h.bf16 %v3055_v33  ;;  %s3818_s13 = sld [smem:[#allocation4 + %s579_s10]]  ;;  %s757_s14 = sadd.s32 17, %s3331_s16 }
  0x56   : > { %6385 = vst [vmem:[#allocation16_spill] sm:$0xff] %v3382_v26  ;;  %6386 = vst [vmem:[#allocation17_spill] sm:$0xff] %v3384_v27  ;;  %v221_v34 = vstv %s3337_s12  ;;  %v3445_v50 = vunpack.c.l.bf16 %v3056_v36  ;;  %v3456_v54 = vunpack.c.h.bf16 %v3056_v36  ;;  %v3467_v58 = vunpack.c.l.bf16 %v3057_v47  ;;  %s3841_s15 = sld [smem:[#allocation4 + %s757_s14]]  ;;  %s759_s18 = sadd.s32 24, %s3331_s16 }
  0x57   : > { %p377_p0 = scmp.gt.s32.totalorder %s3339_s25, %s3337_s12  ;;  %6387 = vst [vmem:[#allocation18_spill] sm:$0xff] %v3391_v30  ;;  %6388 = vst [vmem:[#allocation19_spill] sm:$0xff] %v3393_v31  ;;  %v224_v35 = vstv %s3339_s25  ;;  %vm222_vm0 = vcmp.ge.s32.totalorder %v3335_v1, %v221_v34  ;;  %vm3402_vm1 = vcmp.ge.s32.totalorder %v3348_v8, %v221_v34  ;;  %v3478_v62 = vunpack.c.h.bf16 %v3057_v47  ;;  %s3893_s20 = sld [smem:[#allocation4 + %s759_s18]] }
  0x58   : > { %vm225_vm2 = vcmp.lt.s32.totalorder %v3335_v1, %v224_v35  ;;  %vm226_vm3 = vcmp.lt.s32.totalorder %v3348_v8, %v224_v35  ;;  %6391 = vst [vmem:[#allocation20_spill] sm:$0xff] %v3408_v38  ;;  %6392 = vst [vmem:[#allocation21_spill] sm:$0xff] %v3410_v39  ;;  %v3490_v3 = vunpack.c.l.bf16 %v3058_v48  ;;  %v3492_v4 = vunpack.c.h.bf16 %v3058_v48  ;;  %s937_s23 = sadd.s32 18, %s3331_s16  ;;  %s939_s12 = sadd.s32 25, %s3331_s16 }
  0x59   : > { %6393 = vst [vmem:[#allocation22_spill] sm:$0xff] %v3412_v40  ;;  %6394 = vst [vmem:[#allocation23_spill] sm:$0xff] %v3414_v41  ;;  %s3443_s30 = scalar_select %p377_p0, 1, 0 }
  0x5a   : > { %vm3416_vm4 = vmand %vm222_vm0, %vm225_vm2  ;;  %6397 = vst [vmem:[#allocation24_spill] sm:$0xff] %v3424_v43  ;;  %p557_p3 = scmp.gt.s32.totalorder %s3422_s29, %s3420_s28  ;;  %s4042_s25 = sld [smem:[#allocation4 + %s937_s23]] }
  0x5b   : > { %6398 = vst [vmem:[#allocation25_spill] sm:$0xff] %v3426_v44  ;;  %6399 = vst [vmem:[#allocation26_spill] sm:$0xff] %v3428_v45  ;;  %v233_v51 = vsel %vm3416_vm4, %v3350_v9, -3e+38  ;;  %v235_v52 = vsel %vm3416_vm4, %v3354_v11, -3e+38  ;;  %s379_s4 = scvt.s32.f32 %s3443_s30  ;;  %p737_p5 = scmp.gt.s32.totalorder %s3818_s13, %s3816_s11 }
  0x5c   : > { %6400 = vst [vmem:[#allocation27_spill] sm:$0xff] %v3430_v46  ;;  %vm3436_vm5 = vmand %vm3402_vm1, %vm226_vm3  ;;  %v237_v53 = vsel %vm3416_vm4, %v3360_v15, -3e+38  ;;  %v239_v59 = vsel %vm3416_vm4, %v3364_v17, -3e+38  ;;  %s4044_s26 = sld [smem:[#allocation4 + %s939_s12]] }
  0x5d   : > { %6403 = vst [vmem:[#allocation28_spill] sm:$0xff] %v3445_v50  ;;  %6404 = vst [vmem:[#allocation29_spill] sm:$0xff] %v3456_v54  ;;  %v234_v55 = vsel %vm3436_vm5, %v3352_v10, -3e+38  ;;  %v236_v56 = vsel %vm3436_vm5, %v3356_v12, -3e+38  ;;  %v3508_v35 = vstv %s379_s4  ;;  %p917_p7 = scmp.gt.s32.totalorder %s3893_s20, %s3841_s15 }
  0x5e   : > { %v238_v57 = vsel %vm3436_vm5, %v3362_v16, -3e+38  ;;  %6405 = vst [vmem:[#allocation30_spill] sm:$0xff] %v3467_v58  ;;  %v240_v60 = vsel %vm3436_vm5, %v3366_v18, -3e+38  ;;  %6406 = vst [vmem:[#allocation31_spill] sm:$0xff] %v3478_v62  ;;  %v265_v14 = vmax.f32 %v233_v51, %v234_v55  ;;  %v272_v19 = vmax.f32 %v235_v52, %v236_v56 }
  0x5f   : > { %v241_v61 = vsel %vm3416_vm4, %v3369_v20, -3e+38  ;;  %v242_v63 = vsel %vm3436_vm5, %v3371_v21, -3e+38  ;;  %v243_v0 = vsel %vm3416_vm4, %v3373_v22, -3e+38  ;;  %v279_v28 = vmax.f32 %v237_v53, %v238_v57 }
  0x60   : > { %v244_v2 = vsel %vm3436_vm5, %v3375_v23, -3e+38  ;;  %6407 = vst [vmem:[#allocation32_spill] sm:$0xff] %v3490_v3  ;;  %6408 = vst [vmem:[#allocation33_spill] sm:$0xff] %v3492_v4  ;;  %v245_v5 = vsel %vm3416_vm4, %v3378_v24, -3e+38  ;;  %v286_v29 = vmax.f32 %v239_v59, %v240_v60  ;;  %v293_v32 = vmax.f32 %v241_v61, %v242_v63 }
  0x61   : > { %v246_v6 = vsel %vm3436_vm5, %v3380_v25, -3e+38  ;;  %v247_v7 = vsel %vm3416_vm4, %v3382_v26, -3e+38  ;;  %v248_v13 = vsel %vm3436_vm5, %v3384_v27, -3e+38  ;;  %v300_v33 = vmax.f32 %v243_v0, %v244_v2 }
  0x62   : > { %v307_v34 = vmax.f32 %v245_v5, %v246_v6  ;;  %v249_v47 = vsel %vm3416_vm4, %v3391_v30, -3e+38  ;;  %v250_v48 = vsel %vm3436_vm5, %v3393_v31, -3e+38  ;;  %v251_v51 = vsel %vm3416_vm4, %v3408_v38, -3e+38  ;;  %p1097_p12 = scmp.gt.s32.totalorder %s4044_s26, %s4042_s25 }
  0x63   : > { %v314_v52 = vmax.f32 %v247_v7, %v248_v13  ;;  %v252_v53 = vsel %vm3436_vm5, %v3410_v39, -3e+38  ;;  %v253_v55 = vsel %vm3416_vm4, %v3412_v40, -3e+38  ;;  %v266_v56 = vrot.slane %v265_v14, 4  ;;  %s1119_s4 = sadd.s32 26, %s3331_s16 }
  0x64   : > { %v273_v57 = vrot.slane %v272_v19, 4  ;;  %v280_v59 = vrot.slane %v279_v28, 4  ;;  %v287_v60 = vrot.slane %v286_v29, 4  ;;  %v294_v61 = vrot.slane %v293_v32, 4  ;;  %s3530_s0 = scalar_select %p557_p3, 1, 0 }
  0x65   : > { %v301_v63 = vrot.slane %v300_v33, 4  ;;  %v267_v0 = vmax.f32 %v265_v14, %v266_v56  ;;  %v308_v5 = vrot.slane %v307_v34, 4  ;;  %v315_v6 = vrot.slane %v314_v52, 4  ;;  %s3855_s19 = scalar_select %p737_p5, 1, 0 }
  0x66   : > { %v274_v2 = vmax.f32 %v272_v19, %v273_v57  ;;  %v281_v7 = vmax.f32 %v279_v28, %v280_v59  ;;  %v288_v13 = vmax.f32 %v286_v29, %v287_v60  ;;  %v295_v37 = vmax.f32 %v293_v32, %v294_v61  ;;  %s559_s7 = scvt.s32.f32 %s3530_s0  ;;  %s4289_s0 = sld [smem:[#allocation4 + %s1119_s4]] }
  0x67   : > { %v302_v36 = vmax.f32 %v300_v33, %v301_v63  ;;  %v268_v39 = vrot.slane %v267_v0, 2  ;;  %v309_v38 = vmax.f32 %v307_v34, %v308_v5  ;;  %v316_v31 = vmax.f32 %v314_v52, %v315_v6  ;;  %s739_s21 = scvt.s32.f32 %s3855_s19  ;;  %s1297_s10 = sadd.s32 20, %s3331_s16 }
  0x68   : > { %v275_v40 = vrot.slane %v274_v2, 2  ;;  %v254_v30 = vsel %vm3436_vm5, %v3414_v41, -3e+38  ;;  %v255_v14 = vsel %vm3416_vm4, %v3424_v43, -3e+38  ;;  %v282_v56 = vrot.slane %v281_v7, 2 }
  0x69   : > { %v289_v19 = vrot.slane %v288_v13, 2  ;;  %v256_v28 = vsel %vm3436_vm5, %v3426_v44, -3e+38  ;;  %v257_v29 = vsel %vm3416_vm4, %v3428_v45, -3e+38  ;;  %v296_v32 = vrot.slane %v295_v37, 2 }
  0x6a   : > { %v303_v33 = vrot.slane %v302_v36, 2  ;;  %v3545_v34 = vmax.f32 %v267_v0, %v268_v39  ;;  %v3547_v52 = vmax.f32 %v274_v2, %v275_v40  ;;  %v310_v57 = vrot.slane %v309_v38, 2  ;;  %s3986_s24 = scalar_select %p917_p7, 1, 0 }
  0x6b   : > { %v317_v59 = vrot.slane %v316_v31, 2  ;;  %v258_v60 = vsel %vm3436_vm5, %v3430_v46, -3e+38  ;;  %v259_v61 = vsel %vm3416_vm4, %v3445_v50, -3e+38  ;;  %v3555_v63 = vmax.f32 %v281_v7, %v282_v56  ;;  %s4780_s19 = sld [smem:[#allocation4 + %s3331_s16]] }
  0x6c   : > { %v3557_v5 = vmax.f32 %v288_v13, %v289_v19  ;;  %v260_v39 = vsel %vm3436_vm5, %v3456_v54, -3e+38  ;;  %v261_v40 = vsel %vm3416_vm4, %v3467_v58, -3e+38  ;;  %v262_v0 = vsel %vm3436_vm5, %v3478_v62, -3e+38  ;;  %s919_s22 = scvt.s32.f32 %s3986_s24 }
  0x6d   : > { %v3568_v2 = vstv %s559_s7  ;;  %v263_v6 = vsel %vm3416_vm4, %v3490_v3, -3e+38  ;;  %v264_v7 = vsel %vm3436_vm5, %v3492_v4, -3e+38  ;;  %v3576_v13 = vmax.f32 %v295_v37, %v296_v32  ;;  %s4099_s27 = scalar_select %p1097_p12, 1, 0 }
  0x6e   : > { %6409 = vst [vmem:[#allocation34_spill] sm:$0xff] %v3568_v2  ;;  %v3578_v56 = vmax.f32 %v302_v36, %v303_v33  ;;  %v270_v19 = vrot.slane %v3545_v34, 1  ;;  %v277_v58 = vrot.slane %v3547_v52, 1  ;;  %v3582_v54 = vmax.f32 %v309_v38, %v310_v57  ;;  %s1895_s24 = sadd.s32 1, %s3331_s16  ;;  %s1987_s4 = sadd.s32 9, %s3331_s16 }
  0x6f   : > { %v3584_v62 = vmax.f32 %v316_v31, %v317_v59  ;;  %v284_v2 = vrot.slane %v3555_v63, 1  ;;  %v291_v42 = vrot.slane %v3557_v5, 1  ;;  %v321_v3 = vmax.f32 %v249_v47, %v250_v48  ;;  %s5336_s12 = sld [smem:[#allocation4 + %s1895_s24]]  ;;  %p144_p0 = scmp.lt.s32.totalorder %s3260_s1, 7 }
  0x70   : > { %v328_v50 = vmax.f32 %v251_v51, %v252_v53  ;;  %v335_v49 = vmax.f32 %v253_v55, %v254_v30  ;;  %v342_v37 = vmax.f32 %v255_v14, %v256_v28  ;;  %v349_v36 = vmax.f32 %v257_v29, %v258_v60 }
  0x71   : > { %v356_v32 = vmax.f32 %v259_v61, %v260_v39  ;;  %v322_v33 = vrot.slane %v321_v3, 4  ;;  %v363_v46 = vmax.f32 %v261_v40, %v262_v0  ;;  %v370_v38 = vmax.f32 %v263_v6, %v264_v7  ;;  %s6882_s1 = smov (!%p144_p0, %s3260_s1), 7 }
  0x72   : > { %v329_v4 = vrot.slane %v328_v50, 4  ;;  %v336_v31 = vrot.slane %v335_v49, 4  ;;  %v343_v57 = vrot.slane %v342_v37, 4  ;;  %v350_v59 = vrot.slane %v349_v36, 4 }
  0x73   : > { %v357_v45 = vrot.slane %v356_v32, 4  ;;  %v323_v44 = vmax.f32 %v321_v3, %v322_v33  ;;  %v364_v47 = vrot.slane %v363_v46, 4  ;;  %v371_v48 = vrot.slane %v370_v38, 4 }
  0x74   : > { %v330_v43 = vmax.f32 %v328_v50, %v329_v4  ;;  %v6410_v30 = vstv %s3420_s28  ;;  %v6413_v53 = vstv %s3422_s29  ;;  %v337_v14 = vmax.f32 %v335_v49, %v336_v31  ;;  %s1099_s28 = scvt.s32.f32 %s4099_s27  ;;  %s1117_s29 = sadd.s32 19, %s3331_s16 }
  0x75   : > { %vm3591_vm6 = vcmp.ge.s32.totalorder %v3335_v1, %v6410_v30  ;;  %vm3598_vm7 = vcmp.lt.s32.totalorder %v3335_v1, %v6413_v53  ;;  %v344_v28 = vmax.f32 %v342_v37, %v343_v57  ;;  %v351_v29 = vmax.f32 %v349_v36, %v350_v59  ;;  %s4236_s30 = sld [smem:[#allocation4 + %s1117_s29]] }
  0x76   : > { %v358_v60 = vmax.f32 %v356_v32, %v357_v45  ;;  %v6416_v3 = vmov %v6410_v30  ;;  %v6419_v4 = vmov %v6413_v53  ;;  %v324_v39 = vrot.slane %v323_v44, 2  ;;  %vm3632_vm10 = vmand %vm3591_vm6, %vm3598_vm7 }
  0x77   : > { %vm3605_vm8 = vcmp.ge.s32.totalorder %v3348_v8, %v6416_v3  ;;  %vm3612_vm9 = vcmp.lt.s32.totalorder %v3348_v8, %v6419_v4  ;;  %v331_v40 = vrot.slane %v330_v43, 2  ;;  %v365_v0 = vmax.f32 %v363_v46, %v364_v47 }
  0x78   : > { %v372_v6 = vmax.f32 %v370_v38, %v371_v48  ;;  %v338_v7 = vrot.slane %v337_v14, 2  ;;  %v345_v49 = vrot.slane %v344_v28, 2  ;;  %v352_v37 = vrot.slane %v351_v29, 2  ;;  %vm3640_vm11 = vmand %vm3605_vm8, %vm3612_vm9 }
  0x79   : > { %v359_v45 = vrot.slane %v358_v60, 2  ;;  %v325_v36 = vmax.f32 %v323_v44, %v324_v39  ;;  %v332_v32 = vmax.f32 %v330_v43, %v331_v40  ;;  %v366_v33 = vrot.slane %v365_v0, 2 }
  0x7a   : > { %v373_v31 = vrot.slane %v372_v6, 2  ;;  %v339_v57 = vmax.f32 %v337_v14, %v338_v7  ;;  %v346_v59 = vmax.f32 %v344_v28, %v345_v49  ;;  %v353_v30 = vmax.f32 %v351_v29, %v352_v37 }
  0x7b   : > { %v360_v53 = vmax.f32 %v358_v60, %v359_v45  ;;  %v298_v3 = vrot.slane %v3576_v13, 1  ;;  %v305_v4 = vrot.slane %v3578_v56, 1  ;;  %v367_v8 = vmax.f32 %v365_v0, %v366_v33  ;;  %p1277_p13 = scmp.gt.s32.totalorder %s4289_s0, %s4236_s30 }
  0x7c   : > { %v374_v1 = vmax.f32 %v372_v6, %v373_v31  ;;  %v312_v46 = vrot.slane %v3582_v54, 1  ;;  %v319_v38 = vrot.slane %v3584_v62, 1  ;;  %v326_v47 = vrot.slane %v325_v36, 1 }
  0x7d   : > { %v333_v48 = vrot.slane %v332_v32, 1  ;;  %v340_v44 = vrot.slane %v339_v57, 1  ;;  %v347_v43 = vrot.slane %v346_v59, 1  ;;  %v354_v39 = vrot.slane %v353_v30, 1  ;;  %s4318_s7 = scalar_select %p1277_p13, 1, 0 }
  0x7e   : > { %v361_v40 = vrot.slane %v360_v53, 1  ;;  %v271_v14 = vmax.f32 %v3545_v34, %v270_v19  ;;  %v278_v28 = vmax.f32 %v3547_v52, %v277_v58  ;;  %v368_v29 = vrot.slane %v367_v8, 1 }
  0x7f   : > { %v375_v60 = vrot.slane %v374_v1, 1  ;;  %v285_v7 = vmax.f32 %v3555_v63, %v284_v2  ;;  %v292_v0 = vmax.f32 %v3557_v5, %v291_v42  ;;  %v299_v6 = vmax.f32 %v3576_v13, %v298_v3  ;;  %s1279_s9 = scvt.s32.f32 %s4318_s7  ;;  %s2075_s7 = sadd.s32 3, %s3331_s16 }
  0x80   : > { %v306_v49 = vmax.f32 %v3578_v56, %v305_v4  ;;  %v313_v37 = vmax.f32 %v3582_v54, %v312_v46  ;;  %v320_v45 = vmax.f32 %v3584_v62, %v319_v38  ;;  %v327_v33 = vmax.f32 %v325_v36, %v326_v47 }
  0x81   : > { %v334_v31 = vmax.f32 %v332_v32, %v333_v48  ;;  %v341_v34 = vmax.f32 %v339_v57, %v340_v44  ;;  %v348_v52 = vmax.f32 %v346_v59, %v347_v43  ;;  %v355_v63 = vmax.f32 %v353_v30, %v354_v39 }
  0x82   : > { %v362_v5 = vmax.f32 %v360_v53, %v361_v40  ;;  %v3644_v62 = vmax.f32 %v367_v8, %v368_v29  ;;  %v3646_v2 = vmax.f32 %v374_v1, %v375_v60  ;;  %v3649_v13 = vmul.f32 %v3508_v35, %v271_v14 }
  0x83   : > { %v3652_v56 = vmul.f32 %v3508_v35, %v278_v28  ;;  %v3655_v19 = vmul.f32 %v3508_v35, %v285_v7  ;;  %v3658_v42 = vmul.f32 %v3508_v35, %v292_v0  ;;  %v3661_v51 = vmul.f32 %v3508_v35, %v299_v6  ;;  %v6438_v7 = vld [vmem:[#allocation18_spill] sm:$0xff] }
  0x84   : > { %6426 = vst [vmem:[#allocation35_spill] sm:$0xff] %v3649_v13  ;;  %v413_v1 = vsel %vm3632_vm10, %v3350_v9, -3e+38  ;;  %v3667_v8 = vmul.f32 %v3508_v35, %v306_v49  ;;  %v414_v55 = vsel %vm3640_vm11, %v3352_v10, -3e+38  ;;  %v3679_v36 = vmul.f32 %v3508_v35, %v313_v37 }
  0x85   : > { %6427 = vst [vmem:[#allocation36_spill] sm:$0xff] %v3652_v56  ;;  %6428 = vst [vmem:[#allocation37_spill] sm:$0xff] %v3655_v19  ;;  %v415_v50 = vsel %vm3632_vm10, %v3354_v11, -3e+38  ;;  %v416_v61 = vsel %vm3640_vm11, %v3356_v12, -3e+38  ;;  %v3691_v30 = vmul.f32 %v3508_v35, %v320_v45  ;;  %v3703_v46 = vmul.f32 %v3508_v35, %v327_v33 }
  0x86   : > { %6429 = vst [vmem:[#allocation38_spill] sm:$0xff] %v3658_v42  ;;  %6430 = vst [vmem:[#allocation39_spill] sm:$0xff] %v3661_v51  ;;  %v417_v32 = vsel %vm3632_vm10, %v3360_v15, -3e+38  ;;  %v418_v57 = vsel %vm3640_vm11, %v3362_v16, -3e+38  ;;  %v3715_v44 = vmul.f32 %v3508_v35, %v334_v31  ;;  %v3727_v14 = vmul.f32 %v3508_v35, %v341_v34 }
  0x87   : > { %6431 = vst [vmem:[#allocation40_spill] sm:$0xff] %v3667_v8  ;;  %6432 = vst [vmem:[#allocation41_spill] sm:$0xff] %v3679_v36  ;;  %v419_v59 = vsel %vm3632_vm10, %v3364_v17, -3e+38  ;;  %v420_v53 = vsel %vm3640_vm11, %v3366_v18, -3e+38  ;;  %v3730_v28 = vmul.f32 %v3508_v35, %v348_v52  ;;  %v445_v29 = vmax.f32 %v413_v1, %v414_v55 }
  0x88   : > { %6433 = vst [vmem:[#allocation42_spill] sm:$0xff] %v3691_v30  ;;  %v421_v3 = vsel %vm3632_vm10, %v3369_v20, -3e+38  ;;  %v422_v4 = vsel %vm3640_vm11, %v3371_v21, -3e+38  ;;  %6434 = vst [vmem:[#allocation43_spill] sm:$0xff] %v3703_v46  ;;  %v452_v60 = vmax.f32 %v415_v50, %v416_v61  ;;  %v459_v6 = vmax.f32 %v417_v32, %v418_v57 }
  0x89   : > { %v423_v38 = vsel %vm3632_vm10, %v3373_v22, -3e+38  ;;  %v424_v47 = vsel %vm3640_vm11, %v3375_v23, -3e+38  ;;  %v425_v48 = vsel %vm3632_vm10, %v3378_v24, -3e+38  ;;  %v466_v49 = vmax.f32 %v419_v59, %v420_v53 }
  0x8a   : > { %6435 = vst [vmem:[#allocation44_spill] sm:$0xff] %v3715_v44  ;;  %v426_v43 = vsel %vm3640_vm11, %v3380_v25, -3e+38  ;;  %v427_v39 = vsel %vm3632_vm10, %v3382_v26, -3e+38  ;;  %6436 = vst [vmem:[#allocation45_spill] sm:$0xff] %v3727_v14  ;;  %v473_v37 = vmax.f32 %v421_v3, %v422_v4  ;;  %v480_v31 = vmax.f32 %v423_v38, %v424_v47 }
  0x8b   : > { %v428_v40 = vsel %vm3640_vm11, %v3384_v27, -3e+38  ;;  %6437 = vst [vmem:[#allocation46_spill] sm:$0xff] %v3730_v28  ;;  %v429_v0 = vsel %vm3632_vm10, %v6438_v7, -3e+38  ;;  %v6439_v45 = vld [vmem:[#allocation19_spill] sm:$0xff]  ;;  %v487_v46 = vmax.f32 %v425_v48, %v426_v43  ;;  %v3739_v14 = vmul.f32 %v3508_v35, %v355_v63 }
  0x8c   : > { %v430_v33 = vsel %vm3640_vm11, %v6439_v45, -3e+38  ;;  %v494_v34 = vmax.f32 %v427_v39, %v428_v40  ;;  %v6441_v52 = vld [vmem:[#allocation20_spill] sm:$0xff]  ;;  %v6442_v55 = vld [vmem:[#allocation21_spill] sm:$0xff]  ;;  %v6443_v61 = vld [vmem:[#allocation22_spill] sm:$0xff]  ;;  %v3751_v57 = vmul.f32 %v3508_v35, %v362_v5  ;;  %v446_v38 = vrot.slane %v445_v29, 4 }
  0x8d   : > { %6440 = vst [vmem:[#allocation47_spill] sm:$0xff] %v3739_v14  ;;  %v431_v1 = vsel %vm3632_vm10, %v6441_v52, -3e+38  ;;  %v432_v50 = vsel %vm3640_vm11, %v6442_v55, -3e+38  ;;  %v6445_v59 = vld [vmem:[#allocation24_spill] sm:$0xff] }
  0x8e   : > { %v433_v32 = vsel %vm3632_vm10, %v6443_v61, -3e+38  ;;  %6444 = vst [vmem:[#allocation48_spill] sm:$0xff] %v3751_v57  ;;  %v434_v63 = vsel %vm3640_vm11, %v3414_v41, -3e+38  ;;  %v6446_v3 = vld [vmem:[#allocation25_spill] sm:$0xff]  ;;  %v447_v14 = vmax.f32 %v445_v29, %v446_v38 }
  0x8f   : > { %v435_v53 = vsel %vm3632_vm10, %v6445_v59, -3e+38  ;;  %v436_v4 = vsel %vm3640_vm11, %v6446_v3, -3e+38  ;;  %v453_v47 = vrot.slane %v452_v60, 4  ;;  %v460_v48 = vrot.slane %v459_v6, 4 }
  0x90   : > { %v467_v43 = vrot.slane %v466_v49, 4  ;;  %v474_v39 = vrot.slane %v473_v37, 4  ;;  %v481_v40 = vrot.slane %v480_v31, 4  ;;  %v488_v5 = vrot.slane %v487_v46, 4  ;;  %v6448_v41 = vld [vmem:[#allocation26_spill] sm:$0xff]  ;;  %v6449_v29 = vld [vmem:[#allocation27_spill] sm:$0xff] }
  0x91   : > { %v495_v57 = vrot.slane %v494_v34, 4  ;;  %v454_v28 = vmax.f32 %v452_v60, %v453_v47  ;;  %v461_v44 = vmax.f32 %v459_v6, %v460_v48  ;;  %v448_v42 = vrot.slane %v447_v14, 2  ;;  %v6450_v6 = vld [vmem:[#allocation28_spill] sm:$0xff]  ;;  %v6451_v48 = vld [vmem:[#allocation29_spill] sm:$0xff] }
  0x92   : > { %v468_v30 = vmax.f32 %v466_v49, %v467_v43  ;;  %v475_v36 = vmax.f32 %v473_v37, %v474_v39  ;;  %v482_v8 = vmax.f32 %v480_v31, %v481_v40  ;;  %v489_v51 = vmax.f32 %v487_v46, %v488_v5  ;;  %v6452_v39 = vld [vmem:[#allocation30_spill] sm:$0xff] }
  0x93   : > { %v496_v13 = vmax.f32 %v494_v34, %v495_v57  ;;  %v455_v19 = vrot.slane %v454_v28, 2  ;;  %v462_v56 = vrot.slane %v461_v44, 2  ;;  %v3764_v59 = vmul.f32 %v3508_v35, %v3644_v62 }
  0x94   : > { %v469_v3 = vrot.slane %v468_v30, 2  ;;  %v437_v61 = vsel %vm3632_vm10, %v6448_v41, -3e+38  ;;  %v438_v60 = vsel %vm3640_vm11, %v6449_v29, -3e+38  ;;  %v476_v49 = vrot.slane %v475_v36, 2 }
  0x95   : > { %6447 = vst [vmem:[#allocation49_spill] sm:$0xff] %v3764_v59  ;;  %v439_v46 = vsel %vm3632_vm10, %v6450_v6, -3e+38  ;;  %v483_v37 = vrot.slane %v482_v8, 2  ;;  %v490_v31 = vrot.slane %v489_v51, 2  ;;  %v497_v34 = vrot.slane %v496_v13, 2 }
  0x96   : > { %v3775_v57 = vmax.f32 %v447_v14, %v448_v42  ;;  %v3777_v62 = vmax.f32 %v454_v28, %v455_v19  ;;  %v3779_v38 = vmax.f32 %v461_v44, %v462_v56  ;;  %v3781_v47 = vmax.f32 %v468_v30, %v469_v3  ;;  %v6454_v19 = vld [vmem:[#allocation31_spill] sm:$0xff]  ;;  %v6455_v30 = vld [vmem:[#allocation32_spill] sm:$0xff]  ;;  %v6456_v14 = vld [vmem:[#allocation33_spill] sm:$0xff] }
  0x97   : > { %v440_v43 = vsel %vm3640_vm11, %v6451_v48, -3e+38  ;;  %v441_v40 = vsel %vm3632_vm10, %v6452_v39, -3e+38  ;;  %v501_v5 = vmax.f32 %v429_v0, %v430_v33  ;;  %v508_v59 = vmax.f32 %v431_v1, %v432_v50 }
  0x98   : > { %v3791_v42 = vmul.f32 %v3508_v35, %v3646_v2  ;;  %v442_v56 = vsel %vm3640_vm11, %v6454_v19, -3e+38  ;;  %v443_v44 = vsel %vm3632_vm10, %v6455_v30, -3e+38  ;;  %v444_v28 = vsel %vm3640_vm11, %v6456_v14, -3e+38 }
  0x99   : > { %v3802_v3 = vmax.f32 %v475_v36, %v476_v49  ;;  %v3804_v0 = vmax.f32 %v482_v8, %v483_v37  ;;  %v3806_v33 = vmax.f32 %v489_v51, %v490_v31  ;;  %v3808_v35 = vmax.f32 %v496_v13, %v497_v34 }
  0x9a   : > { %6453 = vst [vmem:[#allocation50_spill] sm:$0xff] %v3791_v42  ;;  %v450_v2 = vrot.slane %v3775_v57, 1  ;;  %v457_v1 = vrot.slane %v3777_v62, 1  ;;  %v464_v50 = vrot.slane %v3779_v38, 1  ;;  %v471_v58 = vrot.slane %v3781_v47, 1 }
  0x9b   : > { %v502_v42 = vrot.slane %v501_v5, 4  ;;  %v509_v30 = vrot.slane %v508_v59, 4  ;;  %v515_v54 = vmax.f32 %v433_v32, %v434_v63  ;;  %v522_v14 = vmax.f32 %v435_v53, %v436_v4 }
  0x9c   : > { %v529_v36 = vmax.f32 %v437_v61, %v438_v60  ;;  %v536_v8 = vmax.f32 %v439_v46, %v440_v43  ;;  %v543_v51 = vmax.f32 %v441_v40, %v442_v56  ;;  %v550_v49 = vmax.f32 %v443_v44, %v444_v28 }
  0x9d   : > { %v503_v13 = vmax.f32 %v501_v5, %v502_v42  ;;  %v510_v37 = vmax.f32 %v508_v59, %v509_v30  ;;  %v516_v31 = vrot.slane %v515_v54, 4  ;;  %v523_v34 = vrot.slane %v522_v14, 4 }
  0x9e   : > { %v530_v19 = vrot.slane %v529_v36, 4  ;;  %v537_v39 = vrot.slane %v536_v8, 4  ;;  %v544_v48 = vrot.slane %v543_v51, 4  ;;  %v551_v6 = vrot.slane %v550_v49, 4 }
  0x9f   : > { %v504_v29 = vrot.slane %v503_v13, 2  ;;  %v511_v41 = vrot.slane %v510_v37, 2  ;;  %v517_v55 = vmax.f32 %v515_v54, %v516_v31  ;;  %v524_v52 = vmax.f32 %v522_v14, %v523_v34 }
  0xa0   : > { %v531_v61 = vmax.f32 %v529_v36, %v530_v19  ;;  %v538_v32 = vmax.f32 %v536_v8, %v537_v39  ;;  %v545_v63 = vmax.f32 %v543_v51, %v544_v48  ;;  %v552_v53 = vmax.f32 %v550_v49, %v551_v6 }
  0xa1   : > { %v505_v4 = vmax.f32 %v503_v13, %v504_v29  ;;  %v512_v60 = vmax.f32 %v510_v37, %v511_v41  ;;  %v518_v46 = vrot.slane %v517_v55, 2  ;;  %v525_v59 = vrot.slane %v524_v52, 2 }
  0xa2   : > { %v532_v43 = vrot.slane %v531_v61, 2  ;;  %v539_v40 = vrot.slane %v538_v32, 2  ;;  %v546_v5 = vrot.slane %v545_v63, 2  ;;  %v553_v42 = vrot.slane %v552_v53, 2 }
  0xa3   : > { %v478_v56 = vrot.slane %v3802_v3, 1  ;;  %v485_v30 = vrot.slane %v3804_v0, 1  ;;  %v519_v19 = vmax.f32 %v517_v55, %v518_v46  ;;  %v526_v39 = vmax.f32 %v524_v52, %v525_v59  ;;  %v6462_v59 = vld [vmem:[#allocation11_spill] sm:$0xff] }
  0xa4   : > { %v533_v48 = vmax.f32 %v531_v61, %v532_v43  ;;  %v540_v6 = vmax.f32 %v538_v32, %v539_v40  ;;  %v547_v29 = vmax.f32 %v545_v63, %v546_v5  ;;  %v554_v41 = vmax.f32 %v552_v53, %v553_v42  ;;  %v6463_v43 = vld [vmem:[#allocation12_spill] sm:$0xff] }
  0xa5   : > { %v492_v44 = vrot.slane %v3806_v33, 1  ;;  %v499_v14 = vrot.slane %v3808_v35, 1  ;;  %v506_v28 = vrot.slane %v505_v4, 1  ;;  %v513_v54 = vrot.slane %v512_v60, 1 }
  0xa6   : > { %v451_v36 = vmax.f32 %v3775_v57, %v450_v2  ;;  %v458_v8 = vmax.f32 %v3777_v62, %v457_v1  ;;  %v520_v51 = vrot.slane %v519_v19, 1  ;;  %v527_v55 = vrot.slane %v526_v39, 1 }
  0xa7   : > { %v534_v52 = vrot.slane %v533_v48, 1  ;;  %v541_v49 = vrot.slane %v540_v6, 1  ;;  %v548_v13 = vrot.slane %v547_v29, 1  ;;  %v555_v37 = vrot.slane %v554_v41, 1 }
  0xa8   : > { %v465_v31 = vmax.f32 %v3779_v38, %v464_v50  ;;  %v472_v34 = vmax.f32 %v3781_v47, %v471_v58  ;;  %v479_v61 = vmax.f32 %v3802_v3, %v478_v56  ;;  %v486_v32 = vmax.f32 %v3804_v0, %v485_v30  ;;  %v6457_v47 = vld [vmem:[#allocation34_spill] sm:$0xff] }
  0xa9   : > { %v493_v57 = vmax.f32 %v3806_v33, %v492_v44  ;;  %v500_v62 = vmax.f32 %v3808_v35, %v499_v14  ;;  %v507_v2 = vmax.f32 %v505_v4, %v506_v28  ;;  %v514_v1 = vmax.f32 %v512_v60, %v513_v54 }
  0xaa   : > { %v521_v38 = vmax.f32 %v519_v19, %v520_v51  ;;  %v528_v50 = vmax.f32 %v526_v39, %v527_v55  ;;  %v3836_v58 = vmul.f32 %v6457_v47, %v451_v36  ;;  %v3839_v3 = vmul.f32 %v6457_v47, %v458_v8 }
  0xab   : > { %v535_v0 = vmax.f32 %v533_v48, %v534_v52  ;;  %v542_v63 = vmax.f32 %v540_v6, %v541_v49  ;;  %v549_v53 = vmax.f32 %v547_v29, %v548_v13  ;;  %v556_v33 = vmax.f32 %v554_v41, %v555_v37 }
  0xac   : > { %6458 = vst [vmem:[#allocation34_spill] sm:$0xff] %v3836_v58  ;;  %6459 = vst [vmem:[#allocation51_spill] sm:$0xff] %v3839_v3  ;;  %v3845_v35 = vmul.f32 %v6457_v47, %v465_v31  ;;  %v3848_v4 = vmul.f32 %v6457_v47, %v472_v34  ;;  %v581_v60 = vstv %s3816_s11  ;;  %v584_v46 = vstv %s3818_s13  ;;  %s1299_s11 = sadd.s32 27, %s3331_s16  ;;  %s4755_s13 = sld [smem:[#allocation4 + %s1297_s10]] }
  0xad   : > { %vm582_vm12 = vcmp.ge.s32.totalorder %v6462_v59, %v581_v60  ;;  %vm583_vm13 = vcmp.ge.s32.totalorder %v6463_v43, %v581_v60  ;;  %vm585_vm14 = vcmp.lt.s32.totalorder %v6462_v59, %v584_v46  ;;  %vm586_vm15 = vcmp.lt.s32.totalorder %v6463_v43, %v584_v46  ;;  %s4757_s14 = sld [smem:[#allocation4 + %s1299_s11]] }
  0xae   : > { %6460 = vst [vmem:[#allocation52_spill] sm:$0xff] %v3845_v35  ;;  %6461 = vst [vmem:[#allocation53_spill] sm:$0xff] %v3848_v4  ;;  %v3862_v40 = vmul.f32 %v6457_v47, %v479_v61  ;;  %v3865_v5 = vmul.f32 %v6457_v47, %v486_v32  ;;  %v3868_v42 = vmul.f32 %v6457_v47, %v493_v57  ;;  %s5539_s11 = sld [smem:[#allocation4 + %s2075_s7]] }
  0xaf   : > { %v3871_v56 = vmul.f32 %v6457_v47, %v500_v62  ;;  %vm3873_vm0 = vmand %vm582_vm12, %vm585_vm14  ;;  %v3878_v19 = vmul.f32 %v6457_v47, %v507_v2  ;;  %v3881_v39 = vmul.f32 %v6457_v47, %v514_v1  ;;  %v3884_v48 = vmul.f32 %v6457_v47, %v521_v38 }
  0xb0   : > { %6464 = vst [vmem:[#allocation54_spill] sm:$0xff] %v3862_v40  ;;  %6465 = vst [vmem:[#allocation55_spill] sm:$0xff] %v3865_v5  ;;  %v3887_v6 = vmul.f32 %v6457_v47, %v528_v50  ;;  %v3896_v41 = vmul.f32 %v6457_v47, %v535_v0  ;;  %v593_v44 = vsel %vm3873_vm0, %v3350_v9, -3e+38  ;;  %v595_v14 = vsel %vm3873_vm0, %v3354_v11, -3e+38 }
  0xb1   : > { %6466 = vst [vmem:[#allocation56_spill] sm:$0xff] %v3868_v42  ;;  %6467 = vst [vmem:[#allocation57_spill] sm:$0xff] %v3871_v56  ;;  %v597_v28 = vsel %vm3873_vm0, %v3360_v15, -3e+38  ;;  %v3909_v54 = vmul.f32 %v6457_v47, %v542_v63  ;;  %v3921_v55 = vmul.f32 %v6457_v47, %v549_v53  ;;  %v599_v52 = vsel %vm3873_vm0, %v3364_v17, -3e+38 }
  0xb2   : > { %6470 = vst [vmem:[#allocation58_spill] sm:$0xff] %v3878_v19  ;;  %6471 = vst [vmem:[#allocation59_spill] sm:$0xff] %v3881_v39  ;;  %v601_v13 = vsel %vm3873_vm0, %v3369_v20, -3e+38  ;;  %v3933_v37 = vmul.f32 %v6457_v47, %v556_v33  ;;  %v603_v34 = vsel %vm3873_vm0, %v3373_v22, -3e+38  ;;  %v3950_v62 = vstv %s739_s21 }
  0xb3   : > { %6472 = vst [vmem:[#allocation60_spill] sm:$0xff] %v3884_v48  ;;  %6473 = vst [vmem:[#allocation61_spill] sm:$0xff] %v3887_v6  ;;  %v605_v32 = vsel %vm3873_vm0, %v3378_v24, -3e+38  ;;  %v607_v1 = vsel %vm3873_vm0, %v3382_v26, -3e+38  ;;  %p1457_p1 = scmp.gt.s32.totalorder %s4757_s14, %s4755_s13 }
  0xb4   : > { %vm3889_vm1 = vmand %vm583_vm13, %vm586_vm15  ;;  %6476 = vst [vmem:[#allocation62_spill] sm:$0xff] %v3896_v41  ;;  %v609_v60 = vsel %vm3873_vm0, %v6438_v7, -3e+38 }
  0xb5   : > { %6477 = vst [vmem:[#allocation63_spill] sm:$0xff] %v3909_v54  ;;  %v594_v36 = vsel %vm3889_vm1, %v3352_v10, -3e+38  ;;  %v596_v8 = vsel %vm3889_vm1, %v3356_v12, -3e+38  ;;  %6478 = vst [vmem:[#allocation64_spill] sm:$0xff] %v3921_v55 }
  0xb6   : > { %v598_v51 = vsel %vm3889_vm1, %v3362_v16, -3e+38  ;;  %v600_v49 = vsel %vm3889_vm1, %v3366_v18, -3e+38  ;;  %6479 = vst [vmem:[#allocation65_spill] sm:$0xff] %v3933_v37  ;;  %v625_v50 = vmax.f32 %v593_v44, %v594_v36  ;;  %v632_v47 = vmax.f32 %v595_v14, %v596_v8  ;;  %v6480_v55 = vld [vmem:[#allocation20_spill] sm:$0xff] }
  0xb7   : > { %v602_v31 = vsel %vm3889_vm1, %v3371_v21, -3e+38  ;;  %v604_v61 = vsel %vm3889_vm1, %v3375_v23, -3e+38  ;;  %v606_v57 = vsel %vm3889_vm1, %v3380_v25, -3e+38  ;;  %v639_v0 = vmax.f32 %v597_v28, %v598_v51 }
  0xb8   : > { %v608_v38 = vsel %vm3889_vm1, %v3384_v27, -3e+38  ;;  %v646_v63 = vmax.f32 %v599_v52, %v600_v49  ;;  %v653_v53 = vmax.f32 %v601_v13, %v602_v31  ;;  %v660_v33 = vmax.f32 %v603_v34, %v604_v61  ;;  %v6481_v14 = vld [vmem:[#allocation21_spill] sm:$0xff]  ;;  %v6482_v36 = vld [vmem:[#allocation22_spill] sm:$0xff]  ;;  %v6483_v52 = vld [vmem:[#allocation23_spill] sm:$0xff] }
  0xb9   : > { %v610_v46 = vsel %vm3889_vm1, %v6439_v45, -3e+38  ;;  %v667_v2 = vmax.f32 %v605_v32, %v606_v57  ;;  %v611_v44 = vsel %vm3873_vm0, %v6480_v55, -3e+38  ;;  %v612_v28 = vsel %vm3889_vm1, %v6481_v14, -3e+38 }
  0xba   : > { %v613_v8 = vsel %vm3873_vm0, %v6482_v36, -3e+38  ;;  %v674_v51 = vmax.f32 %v607_v1, %v608_v38  ;;  %v614_v49 = vsel %vm3889_vm1, %v6483_v52, -3e+38  ;;  %v6484_v13 = vld [vmem:[#allocation24_spill] sm:$0xff]  ;;  %v626_v34 = vrot.slane %v625_v50, 4 }
  0xbb   : > { %v615_v31 = vsel %vm3873_vm0, %v6484_v13, -3e+38  ;;  %v633_v61 = vrot.slane %v632_v47, 4  ;;  %v640_v32 = vrot.slane %v639_v0, 4  ;;  %v647_v57 = vrot.slane %v646_v63, 4  ;;  %v6485_v52 = vld [vmem:[#allocation25_spill] sm:$0xff] }
  0xbc   : > { %v654_v37 = vrot.slane %v653_v53, 4  ;;  %v661_v54 = vrot.slane %v660_v33, 4  ;;  %v627_v19 = vmax.f32 %v625_v50, %v626_v34  ;;  %v668_v38 = vrot.slane %v667_v2, 4  ;;  %v6488_v34 = vld [vmem:[#allocation28_spill] sm:$0xff]  ;;  %s4769_s18 = scalar_select %p1457_p1, 1, 0 }
  0xbd   : > { %v634_v1 = vmax.f32 %v632_v47, %v633_v61  ;;  %v675_v41 = vrot.slane %v674_v51, 4  ;;  %v641_v6 = vmax.f32 %v639_v0, %v640_v32  ;;  %v648_v48 = vmax.f32 %v646_v63, %v647_v57  ;;  %v6486_v47 = vld [vmem:[#allocation26_spill] sm:$0xff] }
  0xbe   : > { %v655_v39 = vmax.f32 %v653_v53, %v654_v37  ;;  %v662_v56 = vmax.f32 %v660_v33, %v661_v54  ;;  %v628_v42 = vrot.slane %v627_v19, 2  ;;  %v669_v40 = vmax.f32 %v667_v2, %v668_v38  ;;  %v6487_v33 = vld [vmem:[#allocation27_spill] sm:$0xff]  ;;  %s1459_s21 = scvt.s32.f32 %s4769_s18  ;;  %s2165_s18 = sadd.s32 4, %s3331_s16 }
  0xbf   : > { %v635_v5 = vrot.slane %v634_v1, 2  ;;  %v676_v58 = vmax.f32 %v674_v51, %v675_v41  ;;  %v642_v4 = vrot.slane %v641_v6, 2  ;;  %v649_v35 = vrot.slane %v648_v48, 2 }
  0xc0   : > { %v656_v3 = vrot.slane %v655_v39, 2  ;;  %v663_v13 = vrot.slane %v662_v56, 2  ;;  %v616_v50 = vsel %vm3889_vm1, %v6485_v52, -3e+38  ;;  %v617_v0 = vsel %vm3873_vm0, %v6486_v47, -3e+38 }
  0xc1   : > { %v3995_v63 = vmax.f32 %v627_v19, %v628_v42  ;;  %v3997_v54 = vmax.f32 %v634_v1, %v635_v5  ;;  %v3999_v37 = vmax.f32 %v641_v6, %v642_v4  ;;  %v4001_v41 = vmax.f32 %v648_v48, %v649_v35  ;;  %v6489_v5 = vld [vmem:[#allocation29_spill] sm:$0xff]  ;;  %v6490_v35 = vld [vmem:[#allocation30_spill] sm:$0xff]  ;;  %v6491_v48 = vld [vmem:[#allocation31_spill] sm:$0xff] }
  0xc2   : > { %v670_v2 = vrot.slane %v669_v40, 2  ;;  %v677_v53 = vrot.slane %v676_v58, 2  ;;  %v618_v51 = vsel %vm3889_vm1, %v6487_v33, -3e+38  ;;  %v619_v61 = vsel %vm3873_vm0, %v6488_v34, -3e+38 }
  0xc3   : > { %v4009_v32 = vmax.f32 %v655_v39, %v656_v3  ;;  %v4011_v42 = vmax.f32 %v662_v56, %v663_v13  ;;  %v620_v4 = vsel %vm3889_vm1, %v6489_v5, -3e+38  ;;  %v621_v19 = vsel %vm3873_vm0, %v6490_v35, -3e+38  ;;  %v6493_v1 = vld [vmem:[#allocation32_spill] sm:$0xff]  ;;  %v6494_v56 = vld [vmem:[#allocation33_spill] sm:$0xff] }
  0xc4   : > { %v622_v6 = vsel %vm3889_vm1, %v6491_v48, -3e+38  ;;  %v4022_v57 = vstv %s919_s22  ;;  %v623_v3 = vsel %vm3873_vm0, %v6493_v1, -3e+38  ;;  %v624_v39 = vsel %vm3889_vm1, %v6494_v56, -3e+38 }
  0xc5   : > { %6492 = vst [vmem:[#allocation66_spill] sm:$0xff] %v4022_v57  ;;  %v4034_v34 = vmax.f32 %v669_v40, %v670_v2  ;;  %v4036_v48 = vmax.f32 %v676_v58, %v677_v53  ;;  %v681_v1 = vmax.f32 %v609_v60, %v610_v46  ;;  %v688_v33 = vmax.f32 %v611_v44, %v612_v28  ;;  %s1897_s22 = sadd.s32 8, %s3331_s16 }
  0xc6   : > { %v695_v29 = vmax.f32 %v613_v8, %v614_v49  ;;  %v702_v56 = vmax.f32 %v615_v31, %v616_v50  ;;  %v709_v13 = vmax.f32 %v617_v0, %v618_v51  ;;  %v716_v38 = vmax.f32 %v619_v61, %v620_v4 }
  0xc7   : > { %v682_v47 = vrot.slane %v681_v1, 4  ;;  %v689_v35 = vrot.slane %v688_v33, 4  ;;  %v723_v52 = vmax.f32 %v621_v19, %v622_v6  ;;  %v730_v5 = vmax.f32 %v623_v3, %v624_v39 }
  0xc8   : > { %v696_v40 = vrot.slane %v695_v29, 4  ;;  %v703_v2 = vrot.slane %v702_v56, 4  ;;  %v710_v58 = vrot.slane %v709_v13, 4  ;;  %v717_v53 = vrot.slane %v716_v38, 4 }
  0xc9   : > { %v683_v36 = vmax.f32 %v681_v1, %v682_v47  ;;  %v690_v57 = vmax.f32 %v688_v33, %v689_v35  ;;  %v724_v14 = vrot.slane %v723_v52, 4  ;;  %v731_v30 = vrot.slane %v730_v5, 4 }
  0xca   : > { %v697_v60 = vmax.f32 %v695_v29, %v696_v40  ;;  %v704_v46 = vmax.f32 %v702_v56, %v703_v2  ;;  %v711_v44 = vmax.f32 %v709_v13, %v710_v58  ;;  %v718_v28 = vmax.f32 %v716_v38, %v717_v53 }
  0xcb   : > { %v684_v8 = vrot.slane %v683_v36, 2  ;;  %v691_v49 = vrot.slane %v690_v57, 2  ;;  %v725_v31 = vmax.f32 %v723_v52, %v724_v14  ;;  %v732_v50 = vmax.f32 %v730_v5, %v731_v30 }
  0xcc   : > { %v698_v0 = vrot.slane %v697_v60, 2  ;;  %v705_v51 = vrot.slane %v704_v46, 2  ;;  %v712_v61 = vrot.slane %v711_v44, 2  ;;  %v719_v4 = vrot.slane %v718_v28, 2 }
  0xcd   : > { %v685_v47 = vmax.f32 %v683_v36, %v684_v8  ;;  %v692_v33 = vmax.f32 %v690_v57, %v691_v49  ;;  %v726_v35 = vrot.slane %v725_v31, 2  ;;  %v733_v19 = vrot.slane %v732_v50, 2 }
  0xce   : > { %v6495_v6 = vstv %s3841_s15  ;;  %v699_v14 = vmax.f32 %v697_v60, %v698_v0  ;;  %v706_v52 = vmax.f32 %v704_v46, %v705_v51  ;;  %v713_v5 = vmax.f32 %v711_v44, %v712_v61  ;;  %s1478_s15 = sadd.s32 7, %s3331_s16 }
  0xcf   : > { %vm4049_vm2 = vcmp.ge.s32.totalorder %v6462_v59, %v6495_v6  ;;  %v720_v3 = vmax.f32 %v718_v28, %v719_v4  ;;  %v6498_v56 = vmov %v6495_v6  ;;  %v672_v36 = vrot.slane %v4034_v34, 1 }
  0xd0   : > { %vm4056_vm3 = vcmp.ge.s32.totalorder %v6463_v43, %v6498_v56  ;;  %v679_v57 = vrot.slane %v4036_v48, 1  ;;  %v727_v13 = vmax.f32 %v725_v31, %v726_v35  ;;  %v734_v38 = vmax.f32 %v732_v50, %v733_v19 }
  0xd1   : > { %v686_v30 = vrot.slane %v685_v47, 1  ;;  %v693_v29 = vrot.slane %v692_v33, 1  ;;  %v700_v40 = vrot.slane %v699_v14, 1  ;;  %v707_v2 = vrot.slane %v706_v52, 1 }
  0xd2   : > { %v714_v58 = vrot.slane %v713_v5, 1  ;;  %v721_v53 = vrot.slane %v720_v3, 1  ;;  %v728_v60 = vrot.slane %v727_v13, 1  ;;  %v735_v46 = vrot.slane %v734_v38, 1 }
  0xd3   : > { %v6501_v44 = vrot.slane %v3995_v63, 1  ;;  %v6502_v8 = vrot.slane %v3997_v54, 1  ;;  %v6503_v0 = vrot.slane %v3999_v37, 1  ;;  %v6504_v50 = vrot.slane %v4001_v41, 1 }
  0xd4   : > { %v6505_v61 = vrot.slane %v4009_v32, 1  ;;  %v6506_v35 = vrot.slane %v4011_v42, 1  ;;  %v680_v19 = vmax.f32 %v4036_v48, %v679_v57  ;;  %v694_v6 = vmax.f32 %v692_v33, %v693_v29 }
  0xd5   : > { %v631_v28 = vmax.f32 %v3995_v63, %v6501_v44  ;;  %v638_v49 = vmax.f32 %v3997_v54, %v6502_v8  ;;  %v645_v31 = vmax.f32 %v3999_v37, %v6503_v0  ;;  %v652_v51 = vmax.f32 %v4001_v41, %v6504_v50 }
  0xd6   : > { %v659_v4 = vmax.f32 %v4009_v32, %v6505_v61  ;;  %v666_v63 = vmax.f32 %v4011_v42, %v6506_v35  ;;  %v673_v54 = vmax.f32 %v4034_v34, %v672_v36  ;;  %v687_v37 = vmax.f32 %v685_v47, %v686_v30 }
  0xd7   : > { %v701_v41 = vmax.f32 %v699_v14, %v700_v40  ;;  %v708_v56 = vmax.f32 %v706_v52, %v707_v2  ;;  %v715_v44 = vmax.f32 %v713_v5, %v714_v58  ;;  %v722_v8 = vmax.f32 %v720_v3, %v721_v53 }
  0xd8   : > { %v729_v0 = vmax.f32 %v727_v13, %v728_v60  ;;  %v736_v32 = vmax.f32 %v734_v38, %v735_v46  ;;  %v4085_v50 = vmul.f32 %v3950_v62, %v631_v28  ;;  %v4088_v61 = vmul.f32 %v3950_v62, %v638_v49 }
  0xd9   : > { %v4091_v34 = vmul.f32 %v3950_v62, %v645_v31  ;;  %v4094_v42 = vmul.f32 %v3950_v62, %v652_v51  ;;  %v4102_v48 = vmul.f32 %v3950_v62, %v659_v4  ;;  %v4105_v47 = vmul.f32 %v3950_v62, %v666_v63  ;;  %v6530_v51 = vld [vmem:[#allocation21_spill] sm:$0xff] }
  0xda   : > { %6507 = vst [vmem:[#allocation67_spill] sm:$0xff] %v4085_v50  ;;  %6508 = vst [vmem:[#allocation68_spill] sm:$0xff] %v4088_v61  ;;  %v6513_v33 = vstv %s3893_s20  ;;  %v4114_v52 = vmul.f32 %v3950_v62, %v673_v54  ;;  %v4117_v5 = vmul.f32 %v3950_v62, %v680_v19  ;;  %v4120_v3 = vmul.f32 %v3950_v62, %v687_v37  ;;  %s4782_s20 = sld [smem:[#allocation4 + %s1478_s15]] }
  0xdb   : > { %6509 = vst [vmem:[#allocation69_spill] sm:$0xff] %v4091_v34  ;;  %6510 = vst [vmem:[#allocation70_spill] sm:$0xff] %v4094_v42  ;;  %vm765_vm4 = vcmp.lt.s32.totalorder %v6462_v59, %v6513_v33  ;;  %v6514_v14 = vmov %v6513_v33  ;;  %v4123_v36 = vmul.f32 %v3950_v62, %v694_v6  ;;  %v4132_v13 = vmul.f32 %v3950_v62, %v701_v41 }
  0xdc   : > { %6511 = vst [vmem:[#allocation71_spill] sm:$0xff] %v4102_v48  ;;  %6512 = vst [vmem:[#allocation72_spill] sm:$0xff] %v4105_v47  ;;  %vm766_vm5 = vcmp.lt.s32.totalorder %v6463_v43, %v6514_v14  ;;  %v4135_v38 = vmul.f32 %v3950_v62, %v708_v56  ;;  %v4138_v30 = vmul.f32 %v3950_v62, %v715_v44  ;;  %v4200_v41 = vstv %s1099_s28  ;;  %s1985_s28 = sadd.s32 2, %s3331_s16 }
  0xdd   : > { %6515 = vst [vmem:[#allocation73_spill] sm:$0xff] %v4114_v52  ;;  %6516 = vst [vmem:[#allocation74_spill] sm:$0xff] %v4117_v5  ;;  %v4141_v29 = vmul.f32 %v3950_v62, %v722_v8  ;;  %v4150_v40 = vmul.f32 %v3950_v62, %v729_v0  ;;  %v4163_v53 = vmul.f32 %v3950_v62, %v736_v32 }
  0xde   : > { %6517 = vst [vmem:[#allocation75_spill] sm:$0xff] %v4120_v3  ;;  %6518 = vst [vmem:[#allocation76_spill] sm:$0xff] %v4123_v36 }
  0xdf   : > { %vm4127_vm6 = vmand %vm4049_vm2, %vm765_vm4  ;;  %6521 = vst [vmem:[#allocation77_spill] sm:$0xff] %v4132_v13 }
  0xe0   : > { %6522 = vst [vmem:[#allocation78_spill] sm:$0xff] %v4135_v38  ;;  %6523 = vst [vmem:[#allocation79_spill] sm:$0xff] %v4138_v30  ;;  %v773_v2 = vsel %vm4127_vm6, %v3350_v9, -3e+38  ;;  %v775_v58 = vsel %vm4127_vm6, %v3354_v11, -3e+38  ;;  %p1884_p2 = scmp.gt.s32.totalorder %s4782_s20, %s4780_s19 }
  0xe1   : > { %6524 = vst [vmem:[#allocation80_spill] sm:$0xff] %v4141_v29  ;;  %vm4145_vm7 = vmand %vm4056_vm3, %vm766_vm5  ;;  %v777_v39 = vsel %vm4127_vm6, %v3360_v15, -3e+38  ;;  %v779_v49 = vsel %vm4127_vm6, %v3364_v17, -3e+38 }
  0xe2   : > { %6527 = vst [vmem:[#allocation81_spill] sm:$0xff] %v4150_v40  ;;  %6528 = vst [vmem:[#allocation82_spill] sm:$0xff] %v4163_v53  ;;  %v774_v60 = vsel %vm4145_vm7, %v3352_v10, -3e+38  ;;  %v776_v46 = vsel %vm4145_vm7, %v3356_v12, -3e+38 }
  0xe3   : > { %v778_v28 = vsel %vm4145_vm7, %v3362_v16, -3e+38  ;;  %v780_v62 = vsel %vm4145_vm7, %v3366_v18, -3e+38  ;;  %v781_v31 = vsel %vm4127_vm6, %v3369_v20, -3e+38  ;;  %v805_v6 = vmax.f32 %v773_v2, %v774_v60 }
  0xe4   : > { %v782_v4 = vsel %vm4145_vm7, %v3371_v21, -3e+38  ;;  %v783_v35 = vsel %vm4127_vm6, %v3373_v22, -3e+38  ;;  %v784_v63 = vsel %vm4145_vm7, %v3375_v23, -3e+38  ;;  %v812_v8 = vmax.f32 %v775_v58, %v776_v46 }
  0xe5   : > { %v785_v19 = vsel %vm4127_vm6, %v3378_v24, -3e+38  ;;  %v786_v37 = vsel %vm4145_vm7, %v3380_v25, -3e+38  ;;  %6529 = vst [vmem:[#allocation83_spill] sm:$0xff] %v4200_v41  ;;  %v819_v0 = vmax.f32 %v777_v39, %v778_v28  ;;  %v826_v33 = vmax.f32 %v779_v49, %v780_v62  ;;  %v6531_v46 = vld [vmem:[#allocation22_spill] sm:$0xff] }
  0xe6   : > { %v787_v56 = vsel %vm4127_vm6, %v3382_v26, -3e+38  ;;  %v788_v44 = vsel %vm4145_vm7, %v3384_v27, -3e+38  ;;  %v833_v14 = vmax.f32 %v781_v31, %v782_v4  ;;  %v840_v54 = vmax.f32 %v783_v35, %v784_v63  ;;  %v6532_v49 = vld [vmem:[#allocation23_spill] sm:$0xff]  ;;  %v6533_v31 = vld [vmem:[#allocation24_spill] sm:$0xff] }
  0xe7   : > { %v790_v2 = vsel %vm4145_vm7, %v6439_v45, -3e+38  ;;  %v791_v60 = vsel %vm4127_vm6, %v6480_v55, -3e+38  ;;  %v792_v58 = vsel %vm4145_vm7, %v6530_v51, -3e+38  ;;  %v847_v39 = vmax.f32 %v785_v19, %v786_v37 }
  0xe8   : > { %v793_v28 = vsel %vm4127_vm6, %v6531_v46, -3e+38  ;;  %v794_v62 = vsel %vm4145_vm7, %v6532_v49, -3e+38  ;;  %v795_v4 = vsel %vm4127_vm6, %v6533_v31, -3e+38  ;;  %v854_v35 = vmax.f32 %v787_v56, %v788_v44 }
  0xe9   : > { %v6534_v63 = vld [vmem:[#allocation25_spill] sm:$0xff]  ;;  %v6535_v53 = vld [vmem:[#allocation26_spill] sm:$0xff]  ;;  %v806_v37 = vrot.slane %v805_v6, 4  ;;  %v813_v40 = vrot.slane %v812_v8, 4  ;;  %v820_v29 = vrot.slane %v819_v0, 4  ;;  %v827_v3 = vrot.slane %v826_v33, 4 }
  0xea   : > { %v796_v32 = vsel %vm4145_vm7, %v6534_v63, -3e+38  ;;  %v797_v19 = vsel %vm4127_vm6, %v6535_v53, -3e+38  ;;  %v834_v30 = vrot.slane %v833_v14, 4  ;;  %v841_v38 = vrot.slane %v840_v54, 4 }
  0xeb   : > { %v807_v13 = vmax.f32 %v805_v6, %v806_v37  ;;  %v814_v36 = vmax.f32 %v812_v8, %v813_v40  ;;  %v848_v5 = vrot.slane %v847_v39, 4  ;;  %v855_v56 = vrot.slane %v854_v35, 4  ;;  %s5316_s23 = scalar_select %p1884_p2, 1, 0 }
  0xec   : > { %v821_v44 = vmax.f32 %v819_v0, %v820_v29  ;;  %v828_v52 = vmax.f32 %v826_v33, %v827_v3  ;;  %v835_v50 = vmax.f32 %v833_v14, %v834_v30  ;;  %v842_v47 = vmax.f32 %v840_v54, %v841_v38  ;;  %v6537_v54 = vld [vmem:[#allocation28_spill] sm:$0xff]  ;;  %v6542_v14 = vld [vmem:[#allocation33_spill] sm:$0xff] }
  0xed   : > { %v808_v48 = vrot.slane %v807_v13, 2  ;;  %v815_v42 = vrot.slane %v814_v36, 2  ;;  %v849_v34 = vmax.f32 %v847_v39, %v848_v5  ;;  %v856_v61 = vmax.f32 %v854_v35, %v855_v56  ;;  %v6536_v5 = vld [vmem:[#allocation27_spill] sm:$0xff]  ;;  %v6541_v33 = vld [vmem:[#allocation32_spill] sm:$0xff] }
  0xee   : > { %v822_v41 = vrot.slane %v821_v44, 2  ;;  %v829_v53 = vrot.slane %v828_v52, 2  ;;  %v836_v63 = vrot.slane %v835_v50, 2  ;;  %v843_v31 = vrot.slane %v842_v47, 2 }
  0xef   : > { %v4238_v49 = vmax.f32 %v807_v13, %v808_v48  ;;  %v4240_v46 = vmax.f32 %v814_v36, %v815_v42  ;;  %v850_v40 = vrot.slane %v849_v34, 2  ;;  %v857_v6 = vrot.slane %v856_v61, 2  ;;  %v6538_v13 = vld [vmem:[#allocation29_spill] sm:$0xff] }
  0xf0   : > { %v4242_v8 = vmax.f32 %v821_v44, %v822_v41  ;;  %v4244_v3 = vmax.f32 %v828_v52, %v829_v53  ;;  %v4246_v38 = vmax.f32 %v835_v50, %v836_v63  ;;  %v4248_v30 = vmax.f32 %v842_v47, %v843_v31  ;;  %v6539_v50 = vld [vmem:[#allocation30_spill] sm:$0xff]  ;;  %v6540_v53 = vld [vmem:[#allocation31_spill] sm:$0xff] }
  0xf1   : > { %v798_v29 = vsel %vm4145_vm7, %v6536_v5, -3e+38  ;;  %v799_v48 = vsel %vm4127_vm6, %v6537_v54, -3e+38  ;;  %v4256_v42 = vmax.f32 %v849_v34, %v850_v40  ;;  %v4258_v36 = vmax.f32 %v856_v61, %v857_v6 }
  0xf2   : > { %v800_v52 = vsel %vm4145_vm7, %v6538_v13, -3e+38  ;;  %v801_v47 = vsel %vm4127_vm6, %v6539_v50, -3e+38  ;;  %v802_v41 = vsel %vm4145_vm7, %v6540_v53, -3e+38  ;;  %v868_v0 = vmax.f32 %v791_v60, %v792_v58 }
  0xf3   : > { %v803_v34 = vsel %vm4127_vm6, %v6541_v33, -3e+38  ;;  %v804_v61 = vsel %vm4145_vm7, %v6542_v14, -3e+38  ;;  %v810_v39 = vrot.slane %v4238_v49, 1  ;;  %v817_v31 = vrot.slane %v4240_v46, 1 }
  0xf4   : > { %v824_v35 = vrot.slane %v4242_v8, 1  ;;  %v831_v63 = vrot.slane %v4244_v3, 1  ;;  %v838_v37 = vrot.slane %v4246_v38, 1  ;;  %v845_v56 = vrot.slane %v4248_v30, 1 }
  0xf5   : > { %v852_v44 = vrot.slane %v4256_v42, 1  ;;  %v859_v40 = vrot.slane %v4258_v36, 1  ;;  %v6543_v1 = vsel %vm4127_vm6, %v6438_v7, -3e+38  ;;  %v875_v14 = vmax.f32 %v793_v28, %v794_v62 }
  0xf6   : > { %v861_v6 = vmax.f32 %v6543_v1, %v790_v2  ;;  %v882_v33 = vmax.f32 %v795_v4, %v796_v32  ;;  %v889_v53 = vmax.f32 %v797_v19, %v798_v29  ;;  %v896_v50 = vmax.f32 %v799_v48, %v800_v52 }
  0xf7   : > { %v869_v54 = vrot.slane %v868_v0, 4  ;;  %v903_v5 = vmax.f32 %v801_v47, %v802_v41  ;;  %v910_v51 = vmax.f32 %v803_v34, %v804_v61  ;;  %v876_v55 = vrot.slane %v875_v14, 4 }
  0xf8   : > { %v862_v13 = vrot.slane %v861_v6, 4  ;;  %v883_v45 = vrot.slane %v882_v33, 4  ;;  %v890_v27 = vrot.slane %v889_v53, 4  ;;  %v897_v26 = vrot.slane %v896_v50, 4 }
  0xf9   : > { %v870_v24 = vmax.f32 %v868_v0, %v869_v54  ;;  %v904_v57 = vrot.slane %v903_v5, 4  ;;  %v911_v23 = vrot.slane %v910_v51, 4  ;;  %v877_v2 = vmax.f32 %v875_v14, %v876_v55 }
  0xfa   : > { %v863_v25 = vmax.f32 %v861_v6, %v862_v13  ;;  %v884_v32 = vmax.f32 %v882_v33, %v883_v45  ;;  %v891_v60 = vmax.f32 %v889_v53, %v890_v27  ;;  %v898_v58 = vmax.f32 %v896_v50, %v897_v26 }
  0xfb   : > { %v871_v62 = vrot.slane %v870_v24, 2  ;;  %v905_v4 = vmax.f32 %v903_v5, %v904_v57  ;;  %v912_v19 = vmax.f32 %v910_v51, %v911_v23  ;;  %v878_v29 = vrot.slane %v877_v2, 2 }
  0xfc   : > { %v864_v28 = vrot.slane %v863_v25, 2  ;;  %v885_v48 = vrot.slane %v884_v32, 2  ;;  %v892_v52 = vrot.slane %v891_v60, 2  ;;  %v899_v54 = vrot.slane %v898_v58, 2 }
  0xfd   : > { %v872_v47 = vmax.f32 %v870_v24, %v871_v62  ;;  %v906_v41 = vrot.slane %v905_v4, 2  ;;  %v913_v0 = vrot.slane %v912_v19, 2  ;;  %v6544_v55 = vstv %s4042_s25  ;;  %s5338_s25 = sld [smem:[#allocation4 + %s1897_s22]]  ;;  %s2255_s22 = sadd.s32 5, %s3331_s16 }
  0xfe   : > { %v865_v13 = vmax.f32 %v863_v25, %v864_v28  ;;  %vm4294_vm8 = vcmp.ge.s32.totalorder %v6462_v59, %v6544_v55  ;;  %v879_v26 = vmax.f32 %v877_v2, %v878_v29  ;;  %v886_v45 = vmax.f32 %v884_v32, %v885_v48 }
  0xff   : > { %v893_v5 = vmax.f32 %v891_v60, %v892_v52  ;;  %v900_v23 = vmax.f32 %v898_v58, %v899_v54  ;;  %v6547_v51 = vmov %v6544_v55  ;;  %v873_v24 = vrot.slane %v872_v47, 1 }
 0x100   : > { %vm4301_vm9 = vcmp.ge.s32.totalorder %v6463_v43, %v6547_v51  ;;  %v866_v25 = vrot.slane %v865_v13, 1  ;;  %v907_v53 = vmax.f32 %v905_v4, %v906_v41  ;;  %v914_v33 = vmax.f32 %v912_v19, %v913_v0 }
 0x101   : > { %v880_v34 = vrot.slane %v879_v26, 1  ;;  %v887_v14 = vrot.slane %v886_v45, 1  ;;  %v894_v61 = vrot.slane %v893_v5, 1  ;;  %v901_v1 = vrot.slane %v900_v23, 1 }
 0x102   : > { %v811_v6 = vmax.f32 %v4238_v49, %v810_v39  ;;  %v818_v57 = vmax.f32 %v4240_v46, %v817_v31  ;;  %v908_v2 = vrot.slane %v907_v53, 1  ;;  %v915_v32 = vrot.slane %v914_v33, 1  ;;  %v6550_v31 = vld [vmem:[#allocation66_spill] sm:$0xff] }
 0x103   : > { %v825_v60 = vmax.f32 %v4242_v8, %v824_v35  ;;  %v832_v58 = vmax.f32 %v4244_v3, %v831_v63  ;;  %v839_v28 = vmax.f32 %v4246_v38, %v838_v37  ;;  %v846_v62 = vmax.f32 %v4248_v30, %v845_v56  ;;  %p1974_p4 = scmp.gt.s32.totalorder %s5338_s25, %s5336_s12 }
 0x104   : > { %v853_v4 = vmax.f32 %v4256_v42, %v852_v44  ;;  %v860_v19 = vmax.f32 %v4258_v36, %v859_v40  ;;  %v867_v29 = vmax.f32 %v865_v13, %v866_v25  ;;  %v874_v48 = vmax.f32 %v872_v47, %v873_v24 }
 0x105   : > { %v881_v46 = vmax.f32 %v879_v26, %v880_v34  ;;  %v888_v49 = vmax.f32 %v886_v45, %v887_v14  ;;  %v895_v8 = vmax.f32 %v893_v5, %v894_v61  ;;  %v902_v3 = vmax.f32 %v900_v23, %v901_v1  ;;  %s5389_s27 = scalar_select %p1974_p4, 1, 0 }
 0x106   : > { %v909_v39 = vmax.f32 %v907_v53, %v908_v2  ;;  %v916_v38 = vmax.f32 %v914_v33, %v915_v32  ;;  %v4321_v30 = vmul.f32 %v6550_v31, %v811_v6  ;;  %v4324_v42 = vmul.f32 %v6550_v31, %v818_v57  ;;  %v6574_v32 = vld [vmem:[#allocation13_spill] sm:$0xff]  ;;  %v6583_v33 = vld [vmem:[#allocation23_spill] sm:$0xff] }
 0x107   : > { %v4327_v36 = vmul.f32 %v6550_v31, %v825_v60  ;;  %v4330_v35 = vmul.f32 %v6550_v31, %v832_v58  ;;  %v4333_v63 = vmul.f32 %v6550_v31, %v839_v28  ;;  %v4336_v37 = vmul.f32 %v6550_v31, %v846_v62  ;;  %v6575_v28 = vld [vmem:[#allocation14_spill] sm:$0xff]  ;;  %s1976_s29 = scvt.s32.f32 %s5389_s27 }
 0x108   : > { %6551 = vst [vmem:[#allocation66_spill] sm:$0xff] %v4321_v30  ;;  %6552 = vst [vmem:[#allocation84_spill] sm:$0xff] %v4324_v42  ;;  %v4339_v56 = vmul.f32 %v6550_v31, %v853_v4  ;;  %v4342_v44 = vmul.f32 %v6550_v31, %v860_v19  ;;  %v6559_v40 = vstv %s4044_s26  ;;  %v4352_v54 = vmul.f32 %v6550_v31, %v867_v29  ;;  %v6576_v4 = vld [vmem:[#allocation15_spill] sm:$0xff]  ;;  %v6577_v29 = vld [vmem:[#allocation16_spill] sm:$0xff]  ;;  %s1886_s26 = scvt.s32.f32 %s5316_s23 }
 0x109   : > { %6553 = vst [vmem:[#allocation85_spill] sm:$0xff] %v4327_v36  ;;  %6554 = vst [vmem:[#allocation86_spill] sm:$0xff] %v4330_v35  ;;  %vm945_vm10 = vcmp.lt.s32.totalorder %v6462_v59, %v6559_v40  ;;  %v6560_v52 = vmov %v6559_v40  ;;  %v4355_v13 = vmul.f32 %v6550_v31, %v874_v48  ;;  %v4358_v47 = vmul.f32 %v6550_v31, %v881_v46  ;;  %v6580_v40 = vld [vmem:[#allocation20_spill] sm:$0xff] }
 0x10a   : > { %6555 = vst [vmem:[#allocation87_spill] sm:$0xff] %v4333_v63  ;;  %6556 = vst [vmem:[#allocation88_spill] sm:$0xff] %v4336_v37  ;;  %vm946_vm11 = vcmp.lt.s32.totalorder %v6463_v43, %v6560_v52  ;;  %v4361_v41 = vmul.f32 %v6550_v31, %v888_v49  ;;  %v4370_v55 = vmul.f32 %v6550_v31, %v895_v8  ;;  %v4406_v34 = vstv %s1279_s9  ;;  %v6578_v49 = vld [vmem:[#allocation17_spill] sm:$0xff]  ;;  %s2077_s9 = sadd.s32 10, %s3331_s16 }
 0x10b   : > { %6557 = vst [vmem:[#allocation89_spill] sm:$0xff] %v4339_v56  ;;  %6558 = vst [vmem:[#allocation90_spill] sm:$0xff] %v4342_v44  ;;  %v4373_v26 = vmul.f32 %v6550_v31, %v902_v3  ;;  %v4376_v45 = vmul.f32 %v6550_v31, %v909_v39  ;;  %v4388_v23 = vmul.f32 %v6550_v31, %v916_v38  ;;  %v6579_v39 = vld [vmem:[#allocation19_spill] sm:$0xff]  ;;  %v6584_v38 = vld [vmem:[#allocation24_spill] sm:$0xff] }
 0x10c   : > { %6561 = vst [vmem:[#allocation91_spill] sm:$0xff] %v4352_v54  ;;  %6562 = vst [vmem:[#allocation92_spill] sm:$0xff] %v4355_v13  ;;  %v6585_v52 = vld [vmem:[#allocation25_spill] sm:$0xff] }
 0x10d   : > { %6563 = vst [vmem:[#allocation93_spill] sm:$0xff] %v4358_v47  ;;  %6564 = vst [vmem:[#allocation94_spill] sm:$0xff] %v4361_v41  ;;  %v6589_v54 = vld [vmem:[#allocation29_spill] sm:$0xff] }
 0x10e   : > { %vm4365_vm12 = vmand %vm4294_vm8, %vm945_vm10  ;;  %6567 = vst [vmem:[#allocation95_spill] sm:$0xff] %v4370_v55  ;;  %vm1605_vm10 = vcmask 1041409  }
 0x10f   : > { %6568 = vst [vmem:[#allocation96_spill] sm:$0xff] %v4373_v26  ;;  %6569 = vst [vmem:[#allocation97_spill] sm:$0xff] %v4376_v45  ;;  %v953_v27 = vsel %vm4365_vm12, %v3350_v9, -3e+38  ;;  %v955_v25 = vsel %vm4365_vm12, %v3354_v11, -3e+38 }
 0x110   : > { %vm4380_vm13 = vmand %vm4301_vm9, %vm946_vm11  ;;  %6572 = vst [vmem:[#allocation98_spill] sm:$0xff] %v4388_v23  ;;  %v957_v24 = vsel %vm4365_vm12, %v3360_v15, -3e+38  ;;  %v959_v14 = vsel %vm4365_vm12, %v3364_v17, -3e+38  ;;  %v6586_v45 = vld [vmem:[#allocation26_spill] sm:$0xff] }
 0x111   : > { %v954_v51 = vsel %vm4380_vm13, %v3352_v10, -3e+38  ;;  %v956_v50 = vsel %vm4380_vm13, %v3356_v12, -3e+38  ;;  %v958_v53 = vsel %vm4380_vm13, %v3362_v16, -3e+38 }
 0x112   : > { %6573 = vst [vmem:[#allocation99_spill] sm:$0xff] %v4406_v34  ;;  %v960_v61 = vsel %vm4380_vm13, %v3366_v18, -3e+38  ;;  %v961_v1 = vsel %vm4365_vm12, %v3369_v20, -3e+38  ;;  %v985_v6 = vmax.f32 %v953_v27, %v954_v51  ;;  %v992_v58 = vmax.f32 %v955_v25, %v956_v50  ;;  %v6581_v27 = vld [vmem:[#allocation21_spill] sm:$0xff] }
 0x113   : > { %v962_v57 = vsel %vm4380_vm13, %v3371_v21, -3e+38  ;;  %v963_v2 = vsel %vm4365_vm12, %v3373_v22, -3e+38  ;;  %v964_v60 = vsel %vm4380_vm13, %v6574_v32, -3e+38  ;;  %v999_v46 = vmax.f32 %v957_v24, %v958_v53 }
 0x114   : > { %v965_v62 = vsel %vm4365_vm12, %v6575_v28, -3e+38  ;;  %v966_v19 = vsel %vm4380_vm13, %v6576_v4, -3e+38  ;;  %v967_v48 = vsel %vm4365_vm12, %v6577_v29, -3e+38  ;;  %v1006_v31 = vmax.f32 %v959_v14, %v960_v61 }
 0x115   : > { %v968_v8 = vsel %vm4380_vm13, %v6578_v49, -3e+38  ;;  %v972_v51 = vsel %vm4380_vm13, %v6581_v27, -3e+38  ;;  %v1013_v25 = vmax.f32 %v961_v1, %v962_v57  ;;  %v1020_v50 = vmax.f32 %v963_v2, %v964_v60  ;;  %v6582_v24 = vld [vmem:[#allocation22_spill] sm:$0xff]  ;;  %v6587_v57 = vld [vmem:[#allocation27_spill] sm:$0xff] }
 0x116   : > { %v973_v53 = vsel %vm4365_vm12, %v6582_v24, -3e+38  ;;  %v974_v3 = vsel %vm4380_vm13, %v6583_v33, -3e+38  ;;  %v975_v14 = vsel %vm4365_vm12, %v6584_v38, -3e+38  ;;  %v1027_v61 = vmax.f32 %v965_v62, %v966_v19 }
 0x117   : > { %v976_v23 = vsel %vm4380_vm13, %v6585_v52, -3e+38  ;;  %v977_v1 = vsel %vm4365_vm12, %v6586_v45, -3e+38  ;;  %v978_v2 = vsel %vm4380_vm13, %v6587_v57, -3e+38  ;;  %v1034_v60 = vmax.f32 %v967_v48, %v968_v8 }
 0x118   : > { %v6588_v26 = vld [vmem:[#allocation28_spill] sm:$0xff]  ;;  %v980_v62 = vsel %vm4380_vm13, %v6589_v54, -3e+38  ;;  %v986_v19 = vrot.slane %v985_v6, 4  ;;  %v993_v41 = vrot.slane %v992_v58, 4  ;;  %v1000_v47 = vrot.slane %v999_v46, 4 }
 0x119   : > { %v979_v55 = vsel %vm4365_vm12, %v6588_v26, -3e+38  ;;  %v1007_v13 = vrot.slane %v1006_v31, 4  ;;  %v1014_v44 = vrot.slane %v1013_v25, 4  ;;  %v1021_v56 = vrot.slane %v1020_v50, 4 }
 0x11a   : > { %v987_v37 = vmax.f32 %v985_v6, %v986_v19  ;;  %v994_v63 = vmax.f32 %v992_v58, %v993_v41  ;;  %v1028_v30 = vrot.slane %v1027_v61, 4  ;;  %v1035_v35 = vrot.slane %v1034_v60, 4 }
 0x11b   : > { %v1001_v36 = vmax.f32 %v999_v46, %v1000_v47  ;;  %v1008_v48 = vmax.f32 %v1006_v31, %v1007_v13  ;;  %v1015_v8 = vmax.f32 %v1013_v25, %v1014_v44  ;;  %v1022_v42 = vmax.f32 %v1020_v50, %v1021_v56 }
 0x11c   : > { %v988_v34 = vrot.slane %v987_v37, 2  ;;  %v995_v26 = vrot.slane %v994_v63, 2  ;;  %v1029_v57 = vmax.f32 %v1027_v61, %v1028_v30  ;;  %v1036_v45 = vmax.f32 %v1034_v60, %v1035_v35  ;;  %v6590_v35 = vld [vmem:[#allocation30_spill] sm:$0xff] }
 0x11d   : > { %v1002_v52 = vrot.slane %v1001_v36, 2  ;;  %v1009_v54 = vrot.slane %v1008_v48, 2  ;;  %v1016_v38 = vrot.slane %v1015_v8, 2  ;;  %v1023_v33 = vrot.slane %v1022_v42, 2 }
 0x11e   : > { %v989_v24 = vmax.f32 %v987_v37, %v988_v34  ;;  %v996_v27 = vmax.f32 %v994_v63, %v995_v26  ;;  %v1030_v49 = vrot.slane %v1029_v57, 2  ;;  %v1037_v29 = vrot.slane %v1036_v45, 2  ;;  %v6591_v37 = vld [vmem:[#allocation31_spill] sm:$0xff]  ;;  %v6592_v26 = vld [vmem:[#allocation32_spill] sm:$0xff] }
 0x11f   : > { %v1003_v6 = vmax.f32 %v1001_v36, %v1002_v52  ;;  %v1010_v41 = vmax.f32 %v1008_v48, %v1009_v54  ;;  %v4474_v58 = vmax.f32 %v1015_v8, %v1016_v38  ;;  %v4476_v47 = vmax.f32 %v1022_v42, %v1023_v33  ;;  %v6593_v33 = vld [vmem:[#allocation33_spill] sm:$0xff] }
 0x120   : > { %v990_v44 = vrot.slane %v989_v24, 1  ;;  %v997_v56 = vrot.slane %v996_v27, 1  ;;  %v4478_v13 = vmax.f32 %v1029_v57, %v1030_v49  ;;  %v4480_v30 = vmax.f32 %v1036_v45, %v1037_v29 }
 0x121   : > { %v981_v46 = vsel %vm4365_vm12, %v6590_v35, -3e+38  ;;  %v982_v63 = vsel %vm4380_vm13, %v6591_v37, -3e+38  ;;  %v1004_v36 = vrot.slane %v1003_v6, 1  ;;  %v1011_v54 = vrot.slane %v1010_v41, 1 }
 0x122   : > { %v983_v42 = vsel %vm4365_vm12, %v6592_v26, -3e+38  ;;  %v984_v34 = vsel %vm4380_vm13, %v6593_v33, -3e+38  ;;  %v1018_v45 = vrot.slane %v4474_v58, 1  ;;  %v1025_v29 = vrot.slane %v4476_v47, 1 }
 0x123   : > { %v4496_v49 = vmax.f32 %v989_v24, %v990_v44  ;;  %v4498_v38 = vmax.f32 %v996_v27, %v997_v56  ;;  %v1032_v31 = vrot.slane %v4478_v13, 1  ;;  %v1039_v52 = vrot.slane %v4480_v30, 1 }
 0x124   : > { %v4502_v25 = vmax.f32 %v1003_v6, %v1004_v36  ;;  %v4504_v50 = vmax.f32 %v1010_v41, %v1011_v54  ;;  %v6594_v61 = vsel %vm4380_vm13, %v6579_v39, -3e+38  ;;  %v6595_v57 = vsel %vm4365_vm12, %v6438_v7, -3e+38 }
 0x125   : > { %v1041_v24 = vmax.f32 %v6595_v57, %v6594_v61  ;;  %v6596_v27 = vsel %vm4365_vm12, %v6580_v40, -3e+38  ;;  %v1055_v19 = vmax.f32 %v973_v53, %v974_v3  ;;  %v1062_v48 = vmax.f32 %v975_v14, %v976_v23 }
 0x126   : > { %v1048_v60 = vmax.f32 %v6596_v27, %v972_v51  ;;  %v1069_v8 = vmax.f32 %v977_v1, %v978_v2  ;;  %v1076_v6 = vmax.f32 %v979_v55, %v980_v62  ;;  %v1083_v44 = vmax.f32 %v981_v46, %v982_v63 }
 0x127   : > { %v1042_v41 = vrot.slane %v1041_v24, 4  ;;  %v1090_v56 = vmax.f32 %v983_v42, %v984_v34  ;;  %v1056_v36 = vrot.slane %v1055_v19, 4  ;;  %v1063_v54 = vrot.slane %v1062_v48, 4 }
 0x128   : > { %v1049_v5 = vrot.slane %v1048_v60, 4  ;;  %v1070_v61 = vrot.slane %v1069_v8, 4  ;;  %v1077_v57 = vrot.slane %v1076_v6, 4  ;;  %v1084_v26 = vrot.slane %v1083_v44, 4 }
 0x129   : > { %v1043_v0 = vmax.f32 %v1041_v24, %v1042_v41  ;;  %v1091_v51 = vrot.slane %v1090_v56, 4  ;;  %v6597_v3 = vstv %s4236_s30  ;;  %v6600_v55 = vstv %s4289_s0  ;;  %s5410_s30 = sld [smem:[#allocation4 + %s1985_s28]]  ;;  %s2345_s28 = sadd.s32 6, %s3331_s16 }
 0x12a   : > { %v1050_v33 = vmax.f32 %v1048_v60, %v1049_v5  ;;  %vm4521_vm14 = vcmp.ge.s32.totalorder %v6462_v59, %v6597_v3  ;;  %vm4528_vm15 = vcmp.lt.s32.totalorder %v6462_v59, %v6600_v55  ;;  %v1057_v14 = vmax.f32 %v1055_v19, %v1056_v36  ;;  %s5469_s0 = sld [smem:[#allocation4 + %s1987_s4]]  ;;  %s2347_s4 = sadd.s32 13, %s3331_s16 }
 0x12b   : > { %v1064_v1 = vmax.f32 %v1062_v48, %v1063_v54  ;;  %v1071_v2 = vmax.f32 %v1069_v8, %v1070_v61  ;;  %v1078_v62 = vmax.f32 %v1076_v6, %v1077_v57  ;;  %v6603_v46 = vmov %v6597_v3  ;;  %vm4564_vm2 = vmand %vm4521_vm14, %vm4528_vm15 }
 0x12c   : > { %vm4535_vm0 = vcmp.ge.s32.totalorder %v6463_v43, %v6603_v46  ;;  %v6606_v42 = vmov %v6600_v55  ;;  %v1044_v24 = vrot.slane %v1043_v0, 2  ;;  %v1051_v27 = vrot.slane %v1050_v33, 2 }
 0x12d   : > { %vm4542_vm1 = vcmp.lt.s32.totalorder %v6463_v43, %v6606_v42  ;;  %v1085_v60 = vmax.f32 %v1083_v44, %v1084_v26  ;;  %v1092_v41 = vmax.f32 %v1090_v56, %v1091_v51  ;;  %v1058_v19 = vrot.slane %v1057_v14, 2 }
 0x12e   : > { %v1065_v48 = vrot.slane %v1064_v1, 2  ;;  %v1072_v8 = vrot.slane %v1071_v2, 2  ;;  %v1079_v6 = vrot.slane %v1078_v62, 2  ;;  %v1045_v5 = vmax.f32 %v1043_v0, %v1044_v24  ;;  %vm4586_vm3 = vmand %vm4535_vm0, %vm4542_vm1 }
 0x12f   : > { %v1052_v36 = vmax.f32 %v1050_v33, %v1051_v27  ;;  %v1086_v54 = vrot.slane %v1085_v60, 2  ;;  %v1093_v61 = vrot.slane %v1092_v41, 2  ;;  %v1059_v57 = vmax.f32 %v1057_v14, %v1058_v19 }
 0x130   : > { %v1066_v3 = vmax.f32 %v1064_v1, %v1065_v48  ;;  %v1073_v55 = vmax.f32 %v1071_v2, %v1072_v8  ;;  %v1080_v46 = vmax.f32 %v1078_v62, %v1079_v6  ;;  %v1046_v42 = vrot.slane %v1045_v5, 1  ;;  %v6609_v8 = vld [vmem:[#allocation83_spill] sm:$0xff]  ;;  %p2064_p6 = scmp.gt.s32.totalorder %s5469_s0, %s5410_s30 }
 0x131   : > { %v1053_v43 = vrot.slane %v1052_v36, 1  ;;  %v1087_v59 = vmax.f32 %v1085_v60, %v1086_v54  ;;  %v1094_v37 = vmax.f32 %v1092_v41, %v1093_v61  ;;  %v1060_v35 = vrot.slane %v1059_v57, 1 }
 0x132   : > { %v1067_v40 = vrot.slane %v1066_v3, 1  ;;  %v1074_v26 = vrot.slane %v1073_v55, 1  ;;  %v1081_v44 = vrot.slane %v1080_v46, 1  ;;  %v1019_v56 = vmax.f32 %v4474_v58, %v1018_v45  ;;  %s5513_s10 = scalar_select %p2064_p6, 1, 0 }
 0x133   : > { %v1026_v51 = vmax.f32 %v4476_v47, %v1025_v29  ;;  %v1088_v0 = vrot.slane %v1087_v59, 1  ;;  %v1095_v33 = vrot.slane %v1094_v37, 1  ;;  %v1033_v24 = vmax.f32 %v4478_v13, %v1032_v31 }
 0x134   : > { %v1040_v14 = vmax.f32 %v4480_v30, %v1039_v52  ;;  %v1047_v1 = vmax.f32 %v1045_v5, %v1046_v42  ;;  %v1054_v2 = vmax.f32 %v1052_v36, %v1053_v43  ;;  %v1061_v62 = vmax.f32 %v1059_v57, %v1060_v35 }
 0x135   : > { %v1068_v27 = vmax.f32 %v1066_v3, %v1067_v40  ;;  %v1075_v60 = vmax.f32 %v1073_v55, %v1074_v26  ;;  %v1082_v41 = vmax.f32 %v1080_v46, %v1081_v44  ;;  %v1089_v19 = vmax.f32 %v1087_v59, %v1088_v0  ;;  %v6629_v0 = vld [vmem:[#allocation17_spill] sm:$0xff] }
 0x136   : > { %v4550_v48 = vmax.f32 %v1094_v37, %v1095_v33  ;;  %v4554_v58 = vmul.f32 %v6609_v8, %v4496_v49  ;;  %v4558_v47 = vmul.f32 %v6609_v8, %v4498_v38  ;;  %v4570_v59 = vmul.f32 %v6609_v8, %v4502_v25 }
 0x137   : > { %v4574_v40 = vmul.f32 %v6609_v8, %v4504_v50  ;;  %v4577_v13 = vmul.f32 %v6609_v8, %v1019_v56  ;;  %v4580_v30 = vmul.f32 %v6609_v8, %v1026_v51  ;;  %v4591_v37 = vmul.f32 %v6609_v8, %v1033_v24  ;;  %v6628_v56 = vld [vmem:[#allocation16_spill] sm:$0xff] }
 0x138   : > { %6610 = vst [vmem:[#allocation13_spill] sm:$0xff] %v4554_v58  ;;  %6611 = vst [vmem:[#allocation14_spill] sm:$0xff] %v4558_v47  ;;  %v4594_v45 = vmul.f32 %v6609_v8, %v1040_v14  ;;  %v4597_v29 = vmul.f32 %v6609_v8, %v1047_v1  ;;  %v4600_v49 = vmul.f32 %v6609_v8, %v1054_v2  ;;  %v1133_v52 = vsel %vm4564_vm2, %v3350_v9, -3e+38  ;;  %v6630_v2 = vld [vmem:[#allocation20_spill] sm:$0xff] }
 0x139   : > { %6614 = vst [vmem:[#allocation83_spill] sm:$0xff] %v4570_v59  ;;  %6615 = vst [vmem:[#allocation100_spill] sm:$0xff] %v4574_v40  ;;  %v4603_v38 = vmul.f32 %v6609_v8, %v1061_v62  ;;  %v4606_v31 = vmul.f32 %v6609_v8, %v1068_v27  ;;  %v1134_v25 = vsel %vm4586_vm3, %v3352_v10, -3e+38  ;;  %v4615_v50 = vmul.f32 %v6609_v8, %v1075_v60  ;;  %v6631_v60 = vld [vmem:[#allocation21_spill] sm:$0xff] }
 0x13a   : > { %6616 = vst [vmem:[#allocation101_spill] sm:$0xff] %v4577_v13  ;;  %6617 = vst [vmem:[#allocation102_spill] sm:$0xff] %v4580_v30  ;;  %v1135_v23 = vsel %vm4564_vm2, %v3354_v11, -3e+38  ;;  %v1136_v53 = vsel %vm4586_vm3, %v3356_v12, -3e+38  ;;  %v4627_v34 = vmul.f32 %v6609_v8, %v1082_v41  ;;  %v1165_v57 = vmax.f32 %v1133_v52, %v1134_v25 }
 0x13b   : > { %6620 = vst [vmem:[#allocation103_spill] sm:$0xff] %v4591_v37  ;;  %6621 = vst [vmem:[#allocation104_spill] sm:$0xff] %v4594_v45  ;;  %v1137_v63 = vsel %vm4564_vm2, %v3360_v15, -3e+38  ;;  %v1138_v6 = vsel %vm4586_vm3, %v3362_v16, -3e+38  ;;  %v1172_v3 = vmax.f32 %v1135_v23, %v1136_v53 }
 0x13c   : > { %6622 = vst [vmem:[#allocation105_spill] sm:$0xff] %v4597_v29  ;;  %6623 = vst [vmem:[#allocation106_spill] sm:$0xff] %v4600_v49  ;;  %v1139_v5 = vsel %vm4564_vm2, %v3364_v17, -3e+38  ;;  %v1140_v36 = vsel %vm4586_vm3, %v3366_v18, -3e+38  ;;  %v1179_v26 = vmax.f32 %v1137_v63, %v1138_v6  ;;  %v4687_v29 = vmul.f32 %v6609_v8, %v1089_v19 }
 0x13d   : > { %6624 = vst [vmem:[#allocation107_spill] sm:$0xff] %v4603_v38  ;;  %6625 = vst [vmem:[#allocation108_spill] sm:$0xff] %v4606_v31  ;;  %v1141_v54 = vsel %vm4564_vm2, %v3369_v20, -3e+38  ;;  %v1142_v61 = vsel %vm4586_vm3, %v3371_v21, -3e+38  ;;  %v1186_v24 = vmax.f32 %v1139_v5, %v1140_v36 }
 0x13e   : > { %6626 = vst [vmem:[#allocation109_spill] sm:$0xff] %v4615_v50  ;;  %6627 = vst [vmem:[#allocation110_spill] sm:$0xff] %v4627_v34  ;;  %v1143_v55 = vsel %vm4564_vm2, %v3373_v22, -3e+38  ;;  %v1144_v46 = vsel %vm4586_vm3, %v6574_v32, -3e+38  ;;  %v1193_v27 = vmax.f32 %v1141_v54, %v1142_v61 }
 0x13f   : > { %v1145_v42 = vsel %vm4564_vm2, %v6575_v28, -3e+38  ;;  %v1146_v44 = vsel %vm4586_vm3, %v6576_v4, -3e+38  ;;  %v1147_v51 = vsel %vm4564_vm2, %v6628_v56, -3e+38  ;;  %v1200_v63 = vmax.f32 %v1143_v55, %v1144_v46 }
 0x140   : > { %v1148_v33 = vsel %vm4586_vm3, %v6629_v0, -3e+38  ;;  %v1149_v14 = vsel %vm4564_vm2, %v6438_v7, -3e+38  ;;  %v1150_v1 = vsel %vm4586_vm3, %v6579_v39, -3e+38  ;;  %v1207_v61 = vmax.f32 %v1145_v42, %v1146_v44 }
 0x141   : > { %v1151_v62 = vsel %vm4564_vm2, %v6630_v2, -3e+38  ;;  %v1152_v41 = vsel %vm4586_vm3, %v6631_v60, -3e+38  ;;  %v6632_v52 = vld [vmem:[#allocation22_spill] sm:$0xff]  ;;  %v6633_v23 = vld [vmem:[#allocation23_spill] sm:$0xff]  ;;  %v1214_v34 = vmax.f32 %v1147_v51, %v1148_v33  ;;  %v1221_v51 = vmax.f32 %v1149_v14, %v1150_v1 }
 0x142   : > { %v6634_v6 = vld [vmem:[#allocation24_spill] sm:$0xff]  ;;  %v6635_v36 = vld [vmem:[#allocation25_spill] sm:$0xff]  ;;  %6636 = vst [vmem:[#allocation22_spill] sm:$0xff] %v4687_v29  ;;  %v6637_v50 = vld [vmem:[#allocation26_spill] sm:$0xff]  ;;  %v1228_v33 = vmax.f32 %v1151_v62, %v1152_v41  ;;  %v1166_v54 = vrot.slane %v1165_v57, 4  ;;  %v1173_v29 = vrot.slane %v1172_v3, 4 }
 0x143   : > { %v1157_v25 = vsel %vm4564_vm2, %v6637_v50, -3e+38  ;;  %v6638_v31 = vld [vmem:[#allocation27_spill] sm:$0xff]  ;;  %v6639_v46 = vld [vmem:[#allocation28_spill] sm:$0xff]  ;;  %v6640_v53 = vld [vmem:[#allocation29_spill] sm:$0xff]  ;;  %v1180_v38 = vrot.slane %v1179_v26, 4 }
 0x144   : > { %v1158_v55 = vsel %vm4586_vm3, %v6638_v31, -3e+38  ;;  %v1159_v5 = vsel %vm4564_vm2, %v6639_v46, -3e+38  ;;  %v1160_v42 = vsel %vm4586_vm3, %v6640_v53, -3e+38  ;;  %v1167_v13 = vmax.f32 %v1165_v57, %v1166_v54 }
 0x145   : > { %v6641_v44 = vld [vmem:[#allocation30_spill] sm:$0xff]  ;;  %v1187_v49 = vrot.slane %v1186_v24, 4  ;;  %v1194_v45 = vrot.slane %v1193_v27, 4  ;;  %v1201_v37 = vrot.slane %v1200_v63, 4  ;;  %v1208_v58 = vrot.slane %v1207_v61, 4 }
 0x146   : > { %v1161_v19 = vsel %vm4564_vm2, %v6641_v44, -3e+38  ;;  %v1215_v30 = vrot.slane %v1214_v34, 4  ;;  %v1174_v40 = vmax.f32 %v1172_v3, %v1173_v29  ;;  %v1181_v59 = vmax.f32 %v1179_v26, %v1180_v38 }
 0x147   : > { %v1188_v47 = vmax.f32 %v1186_v24, %v1187_v49  ;;  %v1195_v46 = vmax.f32 %v1193_v27, %v1194_v45  ;;  %v1202_v53 = vmax.f32 %v1200_v63, %v1201_v37  ;;  %v1209_v31 = vmax.f32 %v1207_v61, %v1208_v58 }
 0x148   : > { %v1216_v50 = vmax.f32 %v1214_v34, %v1215_v30  ;;  %v1168_v60 = vrot.slane %v1167_v13, 2  ;;  %v1175_v44 = vrot.slane %v1174_v40, 2  ;;  %v1182_v14 = vrot.slane %v1181_v59, 2 }
 0x149   : > { %v1189_v1 = vrot.slane %v1188_v47, 2  ;;  %v1196_v62 = vrot.slane %v1195_v46, 2  ;;  %v1203_v41 = vrot.slane %v1202_v53, 2  ;;  %v1210_v2 = vrot.slane %v1209_v31, 2 }
 0x14a   : > { %v1217_v39 = vrot.slane %v1216_v50, 2  ;;  %v1169_v7 = vmax.f32 %v1167_v13, %v1168_v60  ;;  %v1176_v0 = vmax.f32 %v1174_v40, %v1175_v44  ;;  %v1183_v56 = vmax.f32 %v1181_v59, %v1182_v14  ;;  %v6643_v59 = vld [vmem:[#allocation31_spill] sm:$0xff]  ;;  %v6644_v40 = vld [vmem:[#allocation32_spill] sm:$0xff] }
 0x14b   : > { %v1190_v4 = vmax.f32 %v1188_v47, %v1189_v1  ;;  %v4704_v57 = vmax.f32 %v1195_v46, %v1196_v62  ;;  %v4706_v29 = vmax.f32 %v1202_v53, %v1203_v41  ;;  %v4708_v45 = vmax.f32 %v1209_v31, %v1210_v2 }
 0x14c   : > { %v4710_v58 = vmax.f32 %v1216_v50, %v1217_v39  ;;  %v1170_v30 = vrot.slane %v1169_v7, 1  ;;  %v1177_v37 = vrot.slane %v1176_v0, 1  ;;  %v1184_v49 = vrot.slane %v1183_v56, 1  ;;  %v6645_v39 = vld [vmem:[#allocation33_spill] sm:$0xff] }
 0x14d   : > { %v1191_v38 = vrot.slane %v1190_v4, 1  ;;  %v4714_v13 = vmul.f32 %v6609_v8, %v4550_v48  ;;  %v1162_v47 = vsel %vm4586_vm3, %v6643_v59, -3e+38  ;;  %v1163_v31 = vsel %vm4564_vm2, %v6644_v40, -3e+38 }
 0x14e   : > { %v1164_v50 = vsel %vm4586_vm3, %v6645_v39, -3e+38  ;;  %v1198_v34 = vrot.slane %v4704_v57, 1  ;;  %v1205_v3 = vrot.slane %v4706_v29, 1  ;;  %v1212_v26 = vrot.slane %v4708_v45, 1 }
 0x14f   : > { %6642 = vst [vmem:[#allocation23_spill] sm:$0xff] %v4714_v13  ;;  %v1219_v48 = vrot.slane %v4710_v58, 1  ;;  %v4729_v8 = vmax.f32 %v1169_v7, %v1170_v30  ;;  %v4731_v24 = vmax.f32 %v1176_v0, %v1177_v37  ;;  %v4733_v2 = vmax.f32 %v1183_v56, %v1184_v49 }
 0x150   : > { %v4735_v27 = vmax.f32 %v1190_v4, %v1191_v38  ;;  %v1222_v60 = vrot.slane %v1221_v51, 4  ;;  %v1229_v53 = vrot.slane %v1228_v33, 4  ;;  %v6646_v63 = vsel %vm4586_vm3, %v6633_v23, -3e+38 }
 0x151   : > { %v6647_v54 = vsel %vm4564_vm2, %v6632_v52, -3e+38  ;;  %v6648_v56 = vsel %vm4586_vm3, %v6635_v36, -3e+38  ;;  %v6649_v4 = vsel %vm4564_vm2, %v6634_v6, -3e+38  ;;  %v1249_v61 = vmax.f32 %v1157_v25, %v1158_v55 }
 0x152   : > { %v1235_v7 = vmax.f32 %v6647_v54, %v6646_v63  ;;  %v1242_v0 = vmax.f32 %v6649_v4, %v6648_v56  ;;  %v1256_v46 = vmax.f32 %v1159_v5, %v1160_v42  ;;  %v1263_v44 = vmax.f32 %v1161_v19, %v1162_v47 }
 0x153   : > { %v1270_v14 = vmax.f32 %v1163_v31, %v1164_v50  ;;  %v1223_v1 = vmax.f32 %v1221_v51, %v1222_v60  ;;  %v1230_v62 = vmax.f32 %v1228_v33, %v1229_v53  ;;  %v1250_v35 = vrot.slane %v1249_v61, 4 }
 0x154   : > { %v1236_v41 = vrot.slane %v1235_v7, 4  ;;  %v1243_v30 = vrot.slane %v1242_v0, 4  ;;  %v1257_v37 = vrot.slane %v1256_v46, 4  ;;  %v1264_v49 = vrot.slane %v1263_v44, 4 }
 0x155   : > { %v1271_v38 = vrot.slane %v1270_v14, 4  ;;  %v1224_v43 = vrot.slane %v1223_v1, 2  ;;  %v1231_v63 = vrot.slane %v1230_v62, 2  ;;  %v1251_v25 = vmax.f32 %v1249_v61, %v1250_v35 }
 0x156   : > { %v1237_v54 = vmax.f32 %v1235_v7, %v1236_v41  ;;  %v1244_v56 = vmax.f32 %v1242_v0, %v1243_v30  ;;  %v1258_v5 = vmax.f32 %v1256_v46, %v1257_v37  ;;  %v1265_v55 = vmax.f32 %v1263_v44, %v1264_v49 }
 0x157   : > { %v1272_v42 = vmax.f32 %v1270_v14, %v1271_v38  ;;  %v1225_v19 = vmax.f32 %v1223_v1, %v1224_v43  ;;  %v1232_v51 = vmax.f32 %v1230_v62, %v1231_v63  ;;  %v1252_v31 = vrot.slane %v1251_v25, 2 }
 0x158   : > { %v1238_v33 = vrot.slane %v1237_v54, 2  ;;  %v1245_v47 = vrot.slane %v1244_v56, 2  ;;  %v1259_v50 = vrot.slane %v1258_v5, 2  ;;  %v1266_v60 = vrot.slane %v1265_v55, 2 }
 0x159   : > { %v1273_v53 = vrot.slane %v1272_v42, 2  ;;  %v1226_v4 = vrot.slane %v1225_v19, 1  ;;  %v1233_v13 = vrot.slane %v1232_v51, 1  ;;  %v1253_v0 = vmax.f32 %v1251_v25, %v1252_v31 }
 0x15a   : > { %v1239_v39 = vmax.f32 %v1237_v54, %v1238_v33  ;;  %v1246_v7 = vmax.f32 %v1244_v56, %v1245_v47  ;;  %v1260_v61 = vmax.f32 %v1258_v5, %v1259_v50  ;;  %v1267_v46 = vmax.f32 %v1265_v55, %v1266_v60  ;;  %v6654_v33 = vld [vmem:[#allocation11_spill] sm:$0xff]  ;;  %v6655_v47 = vld [vmem:[#allocation12_spill] sm:$0xff] }
 0x15b   : > { %v1274_v44 = vmax.f32 %v1272_v42, %v1273_v53  ;;  %v1199_v14 = vmax.f32 %v4704_v57, %v1198_v34  ;;  %v1206_v1 = vmax.f32 %v4706_v29, %v1205_v3  ;;  %v1254_v30 = vrot.slane %v1253_v0, 1  ;;  %v6650_v29 = vld [vmem:[#allocation99_spill] sm:$0xff] }
 0x15c   : > { %v1240_v62 = vrot.slane %v1239_v39, 1  ;;  %v1247_v41 = vrot.slane %v1246_v7, 1  ;;  %v1261_v35 = vrot.slane %v1260_v61, 1  ;;  %v1268_v37 = vrot.slane %v1267_v46, 1 }
 0x15d   : > { %v1275_v49 = vrot.slane %v1274_v44, 1  ;;  %v1213_v38 = vmax.f32 %v4708_v45, %v1212_v26  ;;  %v1220_v43 = vmax.f32 %v4710_v58, %v1219_v48  ;;  %v1227_v63 = vmax.f32 %v1225_v19, %v1226_v4 }
 0x15e   : > { %v1234_v54 = vmax.f32 %v1232_v51, %v1233_v13  ;;  %v1241_v57 = vmax.f32 %v1239_v39, %v1240_v62  ;;  %v1248_v34 = vmax.f32 %v1246_v7, %v1247_v41  ;;  %v4773_v3 = vmul.f32 %v6650_v29, %v4729_v8 }
 0x15f   : > { %v4777_v56 = vmul.f32 %v6650_v29, %v4731_v24  ;;  %v1255_v45 = vmax.f32 %v1253_v0, %v1254_v30  ;;  %v1262_v58 = vmax.f32 %v1260_v61, %v1261_v35  ;;  %v1269_v13 = vmax.f32 %v1267_v46, %v1268_v37 }
 0x160   : > { %v1276_v26 = vmax.f32 %v1274_v44, %v1275_v49  ;;  %v4786_v39 = vmul.f32 %v6650_v29, %v4733_v2  ;;  %v4790_v48 = vmul.f32 %v6650_v29, %v4735_v27  ;;  %v4793_v8 = vmul.f32 %v6650_v29, %v1199_v14  ;;  %v6664_v44 = vld [vmem:[#allocation36_spill] sm:$0xff]  ;;  %v6665_v49 = vld [vmem:[#allocation15_spill] sm:$0xff] }
 0x161   : > { %v4796_v24 = vmul.f32 %v6650_v29, %v1206_v1  ;;  %v4799_v25 = vmul.f32 %v6650_v29, %v1213_v38  ;;  %v4802_v5 = vmul.f32 %v6650_v29, %v1220_v43  ;;  %v4805_v55 = vmul.f32 %v6650_v29, %v1227_v63  ;;  %v6666_v43 = vld [vmem:[#allocation16_spill] sm:$0xff]  ;;  %v6667_v63 = vld [vmem:[#allocation17_spill] sm:$0xff] }
 0x162   : > { %v4808_v2 = vmul.f32 %v6650_v29, %v1234_v54  ;;  %v4812_v27 = vmul.f32 %v6650_v29, %v1241_v57  ;;  %v4815_v42 = vmul.f32 %v6650_v29, %v1248_v34  ;;  %v1301_v19 = vstv %s4755_s13  ;;  %v6668_v54 = vld [vmem:[#allocation18_spill] sm:$0xff]  ;;  %v6669_v34 = vld [vmem:[#allocation19_spill] sm:$0xff]  ;;  %s5541_s13 = sld [smem:[#allocation4 + %s2077_s9]] }
 0x163   : > { %6651 = vst [vmem:[#allocation24_spill] sm:$0xff] %v4805_v55  ;;  %v1304_v51 = vstv %s4757_s14  ;;  %vm1302_vm4 = vcmp.ge.s32.totalorder %v6654_v33, %v1301_v19  ;;  %vm1303_vm5 = vcmp.ge.s32.totalorder %v6655_v47, %v1301_v19  ;;  %v4824_v31 = vmul.f32 %v6650_v29, %v1255_v45  ;;  %s2066_s14 = scvt.s32.f32 %s5513_s10  ;;  %s3059_s10 = smul.u32 28, %s6882_s1 }
 0x164   : > { %6652 = vst [vmem:[#allocation25_spill] sm:$0xff] %v4812_v27  ;;  %6653 = vst [vmem:[#allocation31_spill] sm:$0xff] %v4815_v42  ;;  %vm1305_vm6 = vcmp.lt.s32.totalorder %v6654_v33, %v1304_v51  ;;  %vm1306_vm7 = vcmp.lt.s32.totalorder %v6655_v47, %v1304_v51  ;;  %v4827_v50 = vmul.f32 %v6650_v29, %v1262_v58  ;;  %v4849_v46 = vstv %s1459_s21  ;;  %v6671_v58 = vld [vmem:[#allocation21_spill] sm:$0xff]  ;;  %s2167_s21 = sadd.s32 11, %s3331_s16 }
 0x165   : > { %6656 = vst [vmem:[#allocation32_spill] sm:$0xff] %v4824_v31  ;;  %v4830_v60 = vmul.f32 %v6650_v29, %v1269_v13  ;;  %v4833_v53 = vmul.f32 %v6650_v29, %v1276_v26  ;;  %vm4835_vm8 = vmand %vm1302_vm4, %vm1305_vm6  ;;  %v6670_v29 = vld [vmem:[#allocation20_spill] sm:$0xff]  ;;  %vm1608_vm11 = vcmask 1042434   ;;  %vm1611_vm12 = vcmask 1043459   ;;  %s5670_s24 = sld [smem:[#allocation4 + %s2167_s21]] }
 0x166   : > { %6657 = vst [vmem:[#allocation99_spill] sm:$0xff] %v4827_v50  ;;  %vm4839_vm9 = vmand %vm1303_vm5, %vm1306_vm7  ;;  %v1313_v0 = vsel %vm4835_vm8, %v3350_v9, -3e+38  ;;  %v1315_v61 = vsel %vm4835_vm8, %v3354_v11, -3e+38  ;;  %vm1614_vm13 = vcmask 1044484  }
 0x167   : > { %6658 = vst [vmem:[#allocation11_spill] sm:$0xff] %v4830_v60  ;;  %6659 = vst [vmem:[#allocation12_spill] sm:$0xff] %v4833_v53  ;;  %v1314_v1 = vsel %vm4839_vm9, %v3352_v10, -3e+38  ;;  %v1316_v62 = vsel %vm4839_vm9, %v3356_v12, -3e+38 }
 0x168   : > { %v1317_v9 = vsel %vm4835_vm8, %v3360_v15, -3e+38  ;;  %v1318_v11 = vsel %vm4839_vm9, %v3362_v16, -3e+38  ;;  %v1319_v30 = vsel %vm4835_vm8, %v3364_v17, -3e+38  ;;  %v1345_v37 = vmax.f32 %v1313_v0, %v1314_v1  ;;  %p2154_p8 = scmp.gt.s32.totalorder %s5541_s13, %s5539_s11 }
 0x169   : > { %v1320_v10 = vsel %vm4839_vm9, %v3366_v18, -3e+38  ;;  %v1321_v12 = vsel %vm4835_vm8, %v3369_v20, -3e+38  ;;  %v1322_v15 = vsel %vm4839_vm9, %v3371_v21, -3e+38  ;;  %v1352_v38 = vmax.f32 %v1315_v61, %v1316_v62 }
 0x16a   : > { %v1323_v16 = vsel %vm4835_vm8, %v3373_v22, -3e+38  ;;  %v1324_v17 = vsel %vm4839_vm9, %v6574_v32, -3e+38  ;;  %v1325_v18 = vsel %vm4835_vm8, %v6575_v28, -3e+38  ;;  %v1359_v57 = vmax.f32 %v1317_v9, %v1318_v11 }
 0x16b   : > { %v1326_v20 = vsel %vm4839_vm9, %v6665_v49, -3e+38  ;;  %v1327_v21 = vsel %vm4835_vm8, %v6666_v43, -3e+38  ;;  %v1328_v22 = vsel %vm4839_vm9, %v6667_v63, -3e+38  ;;  %v1366_v26 = vmax.f32 %v1319_v30, %v1320_v10 }
 0x16c   : > { %v1373_v0 = vmax.f32 %v1321_v12, %v1322_v15  ;;  %v1380_v61 = vmax.f32 %v1323_v16, %v1324_v17  ;;  %v1335_v1 = vsel %vm4835_vm8, %v6634_v6, -3e+38  ;;  %v1336_v62 = vsel %vm4839_vm9, %v6635_v36, -3e+38  ;;  %v6672_v9 = vld [vmem:[#allocation26_spill] sm:$0xff]  ;;  %v6673_v10 = vld [vmem:[#allocation27_spill] sm:$0xff] }
 0x16d   : > { %v1337_v11 = vsel %vm4835_vm8, %v6672_v9, -3e+38  ;;  %v1387_v30 = vmax.f32 %v1325_v18, %v1326_v20  ;;  %v1338_v49 = vsel %vm4839_vm9, %v6673_v10, -3e+38  ;;  %v6674_v43 = vld [vmem:[#allocation28_spill] sm:$0xff]  ;;  %v6675_v15 = vld [vmem:[#allocation29_spill] sm:$0xff]  ;;  %v1394_v16 = vmax.f32 %v1327_v21, %v1328_v22 }
 0x16e   : > { %v1339_v12 = vsel %vm4835_vm8, %v6674_v43, -3e+38  ;;  %v1340_v6 = vsel %vm4839_vm9, %v6675_v15, -3e+38  ;;  %v6676_v17 = vld [vmem:[#allocation30_spill] sm:$0xff]  ;;  %v1346_v20 = vrot.slane %v1345_v37, 4 }
 0x16f   : > { %v1341_v36 = vsel %vm4835_vm8, %v6676_v17, -3e+38  ;;  %v1342_v18 = vsel %vm4839_vm9, %v6643_v59, -3e+38  ;;  %v1353_v63 = vrot.slane %v1352_v38, 4  ;;  %v1360_v9 = vrot.slane %v1359_v57, 4 }
 0x170   : > { %v1367_v10 = vrot.slane %v1366_v26, 4  ;;  %v1374_v35 = vrot.slane %v1373_v0, 4  ;;  %v1381_v41 = vrot.slane %v1380_v61, 4  ;;  %v1347_v43 = vmax.f32 %v1345_v37, %v1346_v20  ;;  %s5590_s15 = scalar_select %p2154_p8, 1, 0 }
 0x171   : > { %v1354_v14 = vmax.f32 %v1352_v38, %v1353_v63  ;;  %v1388_v19 = vrot.slane %v1387_v30, 4  ;;  %v1395_v51 = vrot.slane %v1394_v16, 4  ;;  %v1361_v15 = vmax.f32 %v1359_v57, %v1360_v9 }
 0x172   : > { %v1368_v21 = vmax.f32 %v1366_v26, %v1367_v10  ;;  %v1375_v22 = vmax.f32 %v1373_v0, %v1374_v35  ;;  %v1382_v45 = vmax.f32 %v1380_v61, %v1381_v41  ;;  %v1348_v13 = vrot.slane %v1347_v43, 2 }
 0x173   : > { %v1355_v17 = vrot.slane %v1354_v14, 2  ;;  %v1389_v32 = vmax.f32 %v1387_v30, %v1388_v19  ;;  %v1396_v28 = vmax.f32 %v1394_v16, %v1395_v51  ;;  %v1362_v53 = vrot.slane %v1361_v15, 2 }
 0x174   : > { %v1369_v59 = vrot.slane %v1368_v21, 2  ;;  %v1376_v60 = vrot.slane %v1375_v22, 2  ;;  %v1383_v50 = vrot.slane %v1382_v45, 2  ;;  %v1349_v31 = vmax.f32 %v1347_v43, %v1348_v13  ;;  %v6677_v13 = vld [vmem:[#allocation33_spill] sm:$0xff] }
 0x175   : > { %v1356_v55 = vmax.f32 %v1354_v14, %v1355_v17  ;;  %v1390_v42 = vrot.slane %v1389_v32, 2  ;;  %v1397_v27 = vrot.slane %v1396_v28, 2  ;;  %v1363_v37 = vmax.f32 %v1361_v15, %v1362_v53 }
 0x176   : > { %v1370_v38 = vmax.f32 %v1368_v21, %v1369_v59  ;;  %v1377_v20 = vmax.f32 %v1375_v22, %v1376_v60  ;;  %v1384_v63 = vmax.f32 %v1382_v45, %v1383_v50  ;;  %v1350_v57 = vrot.slane %v1349_v31, 1 }
 0x177   : > { %v1357_v26 = vrot.slane %v1356_v55, 1  ;;  %v1391_v35 = vmax.f32 %v1389_v32, %v1390_v42  ;;  %v1398_v41 = vmax.f32 %v1396_v28, %v1397_v27  ;;  %v1364_v0 = vrot.slane %v1363_v37, 1 }
 0x178   : > { %v1371_v61 = vrot.slane %v1370_v38, 1  ;;  %v1378_v19 = vrot.slane %v1377_v20, 1  ;;  %v1385_v51 = vrot.slane %v1384_v63, 1  ;;  %v1343_v30 = vsel %vm4835_vm8, %v6644_v40, -3e+38 }
 0x179   : > { %v1344_v14 = vsel %vm4839_vm9, %v6677_v13, -3e+38  ;;  %v4944_v53 = vmax.f32 %v1349_v31, %v1350_v57  ;;  %v4946_v60 = vmax.f32 %v1356_v55, %v1357_v26  ;;  %v4948_v50 = vmax.f32 %v1363_v37, %v1364_v0 }
 0x17a   : > { %v4950_v42 = vmax.f32 %v1370_v38, %v1371_v61  ;;  %v1392_v27 = vrot.slane %v1391_v35, 1  ;;  %v1399_v32 = vrot.slane %v1398_v41, 1  ;;  %v4952_v28 = vmax.f32 %v1377_v20, %v1378_v19 }
 0x17b   : > { %v4954_v45 = vmax.f32 %v1384_v63, %v1385_v51  ;;  %v6678_v40 = vsel %vm4839_vm9, %v6669_v34, -3e+38  ;;  %v6679_v31 = vsel %vm4835_vm8, %v6668_v54, -3e+38  ;;  %v6680_v16 = vsel %vm4839_vm9, %v6671_v58, -3e+38 }
 0x17c   : > { %v1401_v55 = vmax.f32 %v6679_v31, %v6678_v40  ;;  %v6681_v9 = vsel %vm4835_vm8, %v6670_v29, -3e+38  ;;  %v6682_v43 = vsel %vm4839_vm9, %v6633_v23, -3e+38  ;;  %v6683_v34 = vsel %vm4835_vm8, %v6632_v52, -3e+38 }
 0x17d   : > { %v1408_v10 = vmax.f32 %v6681_v9, %v6680_v16  ;;  %v1415_v15 = vmax.f32 %v6683_v34, %v6682_v43  ;;  %v1422_v54 = vmax.f32 %v1335_v1, %v1336_v62  ;;  %v1429_v21 = vmax.f32 %v1337_v11, %v1338_v49 }
 0x17e   : > { %v1436_v22 = vmax.f32 %v1339_v12, %v1340_v6  ;;  %v1402_v17 = vrot.slane %v1401_v55, 4  ;;  %v1443_v58 = vmax.f32 %v1341_v36, %v1342_v18  ;;  %v1450_v37 = vmax.f32 %v1343_v30, %v1344_v14 }
 0x17f   : > { %v1409_v59 = vrot.slane %v1408_v10, 4  ;;  %v1416_v38 = vrot.slane %v1415_v15, 4  ;;  %v1423_v20 = vrot.slane %v1422_v54, 4  ;;  %v1430_v29 = vrot.slane %v1429_v21, 4 }
 0x180   : > { %v1437_v63 = vrot.slane %v1436_v22, 4  ;;  %v1403_v57 = vmax.f32 %v1401_v55, %v1402_v17  ;;  %v1444_v26 = vrot.slane %v1443_v58, 4  ;;  %v1451_v23 = vrot.slane %v1450_v37, 4 }
 0x181   : > { %v1410_v7 = vmax.f32 %v1408_v10, %v1409_v59  ;;  %v1417_v0 = vmax.f32 %v1415_v15, %v1416_v38  ;;  %v1424_v4 = vmax.f32 %v1422_v54, %v1423_v20  ;;  %v1431_v61 = vmax.f32 %v1429_v21, %v1430_v29 }
 0x182   : > { %v1438_v52 = vmax.f32 %v1436_v22, %v1437_v63  ;;  %v1404_v19 = vrot.slane %v1403_v57, 2  ;;  %v1445_v62 = vmax.f32 %v1443_v58, %v1444_v26  ;;  %v1452_v11 = vmax.f32 %v1450_v37, %v1451_v23 }
 0x183   : > { %v1411_v1 = vrot.slane %v1410_v7, 2  ;;  %v1418_v49 = vrot.slane %v1417_v0, 2  ;;  %v1425_v12 = vrot.slane %v1424_v4, 2  ;;  %v1432_v6 = vrot.slane %v1431_v61, 2 }
 0x184   : > { %v1439_v36 = vrot.slane %v1438_v52, 2  ;;  %v1405_v18 = vmax.f32 %v1403_v57, %v1404_v19  ;;  %v1446_v30 = vrot.slane %v1445_v62, 2  ;;  %v1453_v13 = vrot.slane %v1452_v11, 2 }
 0x185   : > { %v1412_v51 = vmax.f32 %v1410_v7, %v1411_v1  ;;  %v1419_v14 = vmax.f32 %v1417_v0, %v1418_v49  ;;  %v1426_v40 = vmax.f32 %v1424_v4, %v1425_v12  ;;  %v1433_v31 = vmax.f32 %v1431_v61, %v1432_v6  ;;  %v6684_v1 = vld [vmem:[#allocation37_spill] sm:$0xff]  ;;  %v6686_v12 = vld [vmem:[#allocation35_spill] sm:$0xff] }
 0x186   : > { %v1440_v55 = vmax.f32 %v1438_v52, %v1439_v36  ;;  %v1406_v16 = vrot.slane %v1405_v18, 1  ;;  %v1447_v10 = vmax.f32 %v1445_v62, %v1446_v30  ;;  %v1454_v43 = vmax.f32 %v1452_v11, %v1453_v13  ;;  %v6685_v11 = vld [vmem:[#allocation38_spill] sm:$0xff]  ;;  %v6689_v13 = vld [vmem:[#allocation40_spill] sm:$0xff] }
 0x187   : > { %v1413_v9 = vrot.slane %v1412_v51, 1  ;;  %v1420_v34 = vrot.slane %v1419_v14, 1  ;;  %v1427_v15 = vrot.slane %v1426_v40, 1  ;;  %v1434_v54 = vrot.slane %v1433_v31, 1 }
 0x188   : > { %v1441_v21 = vrot.slane %v1440_v55, 1  ;;  %v1393_v22 = vmax.f32 %v1391_v35, %v1392_v27  ;;  %v1400_v17 = vmax.f32 %v1398_v41, %v1399_v32  ;;  %v1448_v59 = vrot.slane %v1447_v10, 1 }
 0x189   : > { %v1455_v58 = vrot.slane %v1454_v43, 1  ;;  %v1407_v37 = vmax.f32 %v1405_v18, %v1406_v16  ;;  %v1414_v38 = vmax.f32 %v1412_v51, %v1413_v9  ;;  %v1421_v20 = vmax.f32 %v1419_v14, %v1420_v34  ;;  %v6688_v18 = vld [vmem:[#allocation39_spill] sm:$0xff]  ;;  %v6690_v14 = vld [vmem:[#allocation41_spill] sm:$0xff]  ;;  %v6692_v9 = vld [vmem:[#allocation44_spill] sm:$0xff] }
 0x18a   : > { %v1428_v29 = vmax.f32 %v1426_v40, %v1427_v15  ;;  %v1435_v63 = vmax.f32 %v1433_v31, %v1434_v54  ;;  %v1442_v57 = vmax.f32 %v1440_v55, %v1441_v21  ;;  %v1449_v7 = vmax.f32 %v1447_v10, %v1448_v59  ;;  %v6691_v55 = vld [vmem:[#allocation42_spill] sm:$0xff]  ;;  %v6696_v59 = vld [vmem:[#allocation48_spill] sm:$0xff] }
 0x18b   : > { %v1456_v26 = vmax.f32 %v1454_v43, %v1455_v58  ;;  %v4982_v23 = vmul.f32 %v4849_v46, %v4944_v53  ;;  %v4986_v0 = vmul.f32 %v4849_v46, %v4946_v60  ;;  %v4990_v35 = vmul.f32 %v4849_v46, %v4948_v50  ;;  %v6693_v43 = vld [vmem:[#allocation45_spill] sm:$0xff]  ;;  %v6694_v15 = vld [vmem:[#allocation46_spill] sm:$0xff] }
 0x18c   : > { %v4994_v41 = vmul.f32 %v4849_v46, %v4950_v42  ;;  %v4998_v27 = vmul.f32 %v4849_v46, %v4952_v28  ;;  %v5002_v53 = vmul.f32 %v4849_v46, %v4954_v45  ;;  %v5005_v32 = vmul.f32 %v4849_v46, %v1393_v22  ;;  %v6695_v22 = vld [vmem:[#allocation47_spill] sm:$0xff] }
 0x18d   : > { %v5008_v60 = vmul.f32 %v4849_v46, %v1400_v17  ;;  %v5011_v50 = vmul.f32 %v4849_v46, %v1407_v37  ;;  %v5014_v42 = vmul.f32 %v4849_v46, %v1414_v38  ;;  %v5017_v4 = vmul.f32 %v4849_v46, %v1421_v20  ;;  %v6697_v37 = vld [vmem:[#allocation49_spill] sm:$0xff] }
 0x18e   : > { %v5020_v28 = vmul.f32 %v4849_v46, %v1428_v29  ;;  %v5023_v45 = vmul.f32 %v4849_v46, %v1435_v63  ;;  %v5026_v61 = vmul.f32 %v4849_v46, %v1442_v57  ;;  %v5029_v52 = vmul.f32 %v4849_v46, %v1449_v7  ;;  %v6698_v29 = vld [vmem:[#allocation43_spill] sm:$0xff]  ;;  %v6699_v57 = vld [vmem:[#allocation50_spill] sm:$0xff] }
 0x18f   : > { %v5032_v19 = vmul.f32 %v4849_v46, %v1456_v26  ;;  %v1607_v62 = vrot.slane %v6684_v1, 6  ;;  %v1610_v49 = vrot.slane %v6685_v11, 5  ;;  %v6687_v6 = vrot.slane %v6664_v44, 7  ;;  %v6700_v26 = vld [vmem:[#allocation51_spill] sm:$0xff] }
 0x190   : > { %v1613_v51 = vrot.slane %v6688_v18, 4  ;;  %v1616_v46 = vrot.slane %v6689_v13, 3  ;;  %vm1617_vm14 = vcmask 1045509   ;;  %v1619_v40 = vrot.slane %v6690_v14, 2  ;;  %v6704_v13 = vld [vmem:[#allocation54_spill] sm:$0xff]  ;;  %v6705_v14 = vld [vmem:[#allocation55_spill] sm:$0xff] }
 0x191   : > { %v1606_v36 = vsel %vm1605_vm10, %v6687_v6, %v6686_v12  ;;  %vm1620_vm15 = vcmask 1046534   ;;  %v1622_v16 = vrot.slane %v6691_v55, 1  ;;  %vm1623_vm0 = vcmask 1047559   ;;  %v6702_v6 = vld [vmem:[#allocation53_spill] sm:$0xff] }
 0x192   : > { %v1609_v30 = vsel %vm1608_vm11, %v1607_v62, %v1606_v36  ;;  %v1625_v10 = vrot.slane %v6692_v9, 7  ;;  %v1627_v34 = vrot.slane %v6693_v43, 6  ;;  %v1629_v54 = vrot.slane %v6694_v15, 5  ;;  %v6707_v9 = vld [vmem:[#allocation57_spill] sm:$0xff]  ;;  %v6708_v15 = vld [vmem:[#allocation59_spill] sm:$0xff] }
 0x193   : > { %v1612_v31 = vsel %vm1611_vm12, %v1610_v49, %v1609_v30  ;;  %v1631_v17 = vrot.slane %v6695_v22, 4  ;;  %v1633_v58 = vrot.slane %v6696_v59, 3  ;;  %v1635_v38 = vrot.slane %v6697_v37, 2  ;;  %v6701_v49 = vld [vmem:[#allocation52_spill] sm:$0xff] }
 0x194   : > { %v1615_v44 = vsel %vm1614_vm13, %v1613_v51, %v1612_v31  ;;  %v1626_v63 = vsel %vm1605_vm10, %v1625_v10, %v6698_v29  ;;  %v1637_v7 = vrot.slane %v6699_v57, 1  ;;  %v1639_v1 = vrot.slane %v6700_v26, 7  ;;  %v6703_v51 = vld [vmem:[#allocation34_spill] sm:$0xff] }
 0x195   : > { %v1618_v21 = vsel %vm1617_vm14, %v1616_v46, %v1615_v44  ;;  %v1628_v11 = vsel %vm1608_vm11, %v1627_v34, %v1626_v63  ;;  %v1641_v12 = vrot.slane %v6701_v49, 6  ;;  %v1643_v36 = vrot.slane %v6702_v6, 5  ;;  %v6711_v29 = vld [vmem:[#allocation62_spill] sm:$0xff]  ;;  %v6714_v6 = vld [vmem:[#allocation64_spill] sm:$0xff] }
 0x196   : > { %v1621_v20 = vsel %vm1620_vm15, %v1619_v40, %v1618_v21  ;;  %v1630_v18 = vsel %vm1611_vm12, %v1629_v54, %v1628_v11  ;;  %v1640_v30 = vsel %vm1605_vm10, %v1639_v1, %v6703_v51  ;;  %v1645_v46 = vrot.slane %v6704_v13, 4  ;;  %v6709_v21 = vld [vmem:[#allocation60_spill] sm:$0xff]  ;;  %v6713_v11 = vld [vmem:[#allocation63_spill] sm:$0xff] }
 0x197   : > { %v5060_v62 = vsel %vm1623_vm0, %v1622_v16, %v1621_v20  ;;  %v1647_v40 = vrot.slane %v6705_v14, 3  ;;  %v1632_v31 = vsel %vm1614_vm13, %v1631_v17, %v1630_v18  ;;  %v1642_v55 = vsel %vm1608_vm11, %v1641_v12, %v1640_v30  ;;  %v6706_v16 = vld [vmem:[#allocation56_spill] sm:$0xff]  ;;  %v6710_v20 = vld [vmem:[#allocation61_spill] sm:$0xff] }
 0x198   : > { %v1649_v44 = vrot.slane %v6706_v16, 2  ;;  %v1651_v10 = vrot.slane %v6707_v9, 1  ;;  %v1634_v43 = vsel %vm1617_vm14, %v1633_v58, %v1632_v31  ;;  %v1644_v34 = vsel %vm1611_vm12, %v1643_v36, %v1642_v55  ;;  %v6712_v58 = vld [vmem:[#allocation58_spill] sm:$0xff]  ;;  %v6715_v18 = vld [vmem:[#allocation65_spill] sm:$0xff]  ;;  %v6716_v13 = vld [vmem:[#allocation68_spill] sm:$0xff] }
 0x199   : > { %v1653_v54 = vrot.slane %v6708_v15, 7  ;;  %v1655_v22 = vrot.slane %v6709_v21, 6  ;;  %v1636_v59 = vsel %vm1620_vm15, %v1635_v38, %v1634_v43  ;;  %v1646_v37 = vsel %vm1614_vm13, %v1645_v46, %v1644_v34  ;;  %v6717_v14 = vld [vmem:[#allocation69_spill] sm:$0xff]  ;;  %v6718_v55 = vld [vmem:[#allocation70_spill] sm:$0xff]  ;;  %v6720_v43 = vld [vmem:[#allocation72_spill] sm:$0xff] }
 0x19a   : > { %v1657_v17 = vrot.slane %v6710_v20, 5  ;;  %v1659_v63 = vrot.slane %v6711_v29, 4  ;;  %v5083_v57 = vsel %vm1623_vm0, %v1637_v7, %v1636_v59  ;;  %v1648_v26 = vsel %vm1617_vm14, %v1647_v40, %v1646_v37  ;;  %v6722_v21 = vld [vmem:[#allocation73_spill] sm:$0xff]  ;;  %v6723_v59 = vld [vmem:[#allocation74_spill] sm:$0xff]  ;;  %v6724_v29 = vld [vmem:[#allocation76_spill] sm:$0xff] }
 0x19b   : > { %v1654_v1 = vsel %vm1605_vm10, %v1653_v54, %v6712_v58  ;;  %v1661_v49 = vrot.slane %v6713_v11, 3  ;;  %v1650_v12 = vsel %vm1620_vm15, %v1649_v44, %v1648_v26  ;;  %v1663_v36 = vrot.slane %v6714_v6, 2  ;;  %v6719_v44 = vld [vmem:[#allocation71_spill] sm:$0xff]  ;;  %v6725_v26 = vld [vmem:[#allocation77_spill] sm:$0xff] }
 0x19c   : > { %v1656_v38 = vsel %vm1608_vm11, %v1655_v22, %v1654_v1  ;;  %v1665_v51 = vrot.slane %v6715_v18, 1  ;;  %v5094_v30 = vsel %vm1623_vm0, %v1651_v10, %v1650_v12  ;;  %v1667_v46 = vrot.slane %v6716_v13, 7  ;;  %v6721_v54 = vld [vmem:[#allocation67_spill] sm:$0xff]  ;;  %v6729_v13 = vld [vmem:[#allocation80_spill] sm:$0xff] }
 0x19d   : > { %v1658_v7 = vsel %vm1611_vm12, %v1657_v17, %v1656_v38  ;;  %v1669_v40 = vrot.slane %v6717_v14, 6  ;;  %v1671_v16 = vrot.slane %v6718_v55, 5  ;;  %v1673_v9 = vrot.slane %v6719_v44, 4  ;;  %v6727_v38 = vld [vmem:[#allocation79_spill] sm:$0xff]  ;;  %v6730_v14 = vld [vmem:[#allocation81_spill] sm:$0xff]  ;;  %v6731_v55 = vld [vmem:[#allocation82_spill] sm:$0xff] }
 0x19e   : > { %v1660_v31 = vsel %vm1614_vm13, %v1659_v63, %v1658_v7  ;;  %v1675_v34 = vrot.slane %v6720_v43, 3  ;;  %v1668_v10 = vsel %vm1605_vm10, %v1667_v46, %v6721_v54  ;;  %v1677_v22 = vrot.slane %v6722_v21, 2  ;;  %v6728_v7 = vld [vmem:[#allocation75_spill] sm:$0xff]  ;;  %v6734_v21 = vld [vmem:[#allocation86_spill] sm:$0xff] }
 0x19f   : > { %v1662_v15 = vsel %vm1617_vm14, %v1661_v49, %v1660_v31  ;;  %v1679_v37 = vrot.slane %v6723_v59, 1  ;;  %v1670_v17 = vsel %vm1608_vm11, %v1669_v40, %v1668_v10  ;;  %v1681_v63 = vrot.slane %v6724_v29, 7  ;;  %v6726_v49 = vld [vmem:[#allocation78_spill] sm:$0xff] }
 0x1a0   : > { %v1664_v20 = vsel %vm1620_vm15, %v1663_v36, %v1662_v15  ;;  %v1683_v58 = vrot.slane %v6725_v26, 6  ;;  %v1672_v11 = vsel %vm1611_vm12, %v1671_v16, %v1670_v17  ;;  %v1685_v12 = vrot.slane %v6726_v49, 5  ;;  %v6732_v16 = vld [vmem:[#allocation84_spill] sm:$0xff] }
 0x1a1   : > { %v5113_v1 = vsel %vm1623_vm0, %v1665_v51, %v1664_v20  ;;  %v1687_v6 = vrot.slane %v6727_v38, 4  ;;  %v1674_v18 = vsel %vm1614_vm13, %v1673_v9, %v1672_v11  ;;  %v1682_v36 = vsel %vm1605_vm10, %v1681_v63, %v6728_v7  ;;  %v6733_v9 = vld [vmem:[#allocation85_spill] sm:$0xff]  ;;  %v6736_v63 = vld [vmem:[#allocation87_spill] sm:$0xff]  ;;  %v6737_v11 = vld [vmem:[#allocation88_spill] sm:$0xff] }
 0x1a2   : > { %v1689_v46 = vrot.slane %v6729_v13, 3  ;;  %v1691_v40 = vrot.slane %v6730_v14, 2  ;;  %v1676_v31 = vsel %vm1617_vm14, %v1675_v34, %v1674_v18  ;;  %v1684_v51 = vsel %vm1608_vm11, %v1683_v58, %v1682_v36  ;;  %v6735_v34 = vld [vmem:[#allocation66_spill] sm:$0xff] }
 0x1a3   : > { %v1693_v44 = vrot.slane %v6731_v55, 1  ;;  %v1695_v43 = vrot.slane %v6732_v16, 7  ;;  %v1678_v15 = vsel %vm1620_vm15, %v1677_v22, %v1676_v31  ;;  %v1686_v54 = vsel %vm1611_vm12, %v1685_v12, %v1684_v51  ;;  %v6738_v12 = vld [vmem:[#allocation89_spill] sm:$0xff]  ;;  %v6739_v7 = vld [vmem:[#allocation90_spill] sm:$0xff] }
 0x1a4   : > { %v1697_v10 = vrot.slane %v6733_v9, 6  ;;  %v1699_v59 = vrot.slane %v6734_v21, 5  ;;  %v5132_v20 = vsel %vm1623_vm0, %v1679_v37, %v1678_v15  ;;  %v1688_v17 = vsel %vm1614_vm13, %v1687_v6, %v1686_v54  ;;  %v6740_v6 = vld [vmem:[#allocation92_spill] sm:$0xff]  ;;  %v6742_v55 = vld [vmem:[#allocation94_spill] sm:$0xff]  ;;  %v6743_v15 = vld [vmem:[#allocation91_spill] sm:$0xff] }
 0x1a5   : > { %v1696_v29 = vsel %vm1605_vm10, %v1695_v43, %v6735_v34  ;;  %v1701_v26 = vrot.slane %v6736_v63, 4  ;;  %v1690_v58 = vsel %vm1617_vm14, %v1689_v46, %v1688_v17  ;;  %v1703_v49 = vrot.slane %v6737_v11, 3  ;;  %v6741_v46 = vld [vmem:[#allocation93_spill] sm:$0xff]  ;;  %v6744_v54 = vld [vmem:[#allocation95_spill] sm:$0xff] }
 0x1a6   : > { %v1698_v22 = vsel %vm1608_vm11, %v1697_v10, %v1696_v29  ;;  %v1705_v38 = vrot.slane %v6738_v12, 2  ;;  %v1692_v18 = vsel %vm1620_vm15, %v1691_v40, %v1690_v58  ;;  %v1707_v36 = vrot.slane %v6739_v7, 1  ;;  %v6745_v10 = vld [vmem:[#allocation96_spill] sm:$0xff]  ;;  %v6746_v17 = vld [vmem:[#allocation97_spill] sm:$0xff]  ;;  %v6747_v29 = vld [vmem:[#allocation98_spill] sm:$0xff] }
 0x1a7   : > { %v1700_v37 = vsel %vm1611_vm12, %v1699_v59, %v1698_v22  ;;  %v1709_v13 = vrot.slane %v6740_v6, 7  ;;  %v5147_v14 = vsel %vm1623_vm0, %v1693_v44, %v1692_v18  ;;  %v1711_v51 = vrot.slane %v6741_v46, 6  ;;  %v6748_v22 = vld [vmem:[#allocation14_spill] sm:$0xff] }
 0x1a8   : > { %v1702_v31 = vsel %vm1614_vm13, %v1701_v26, %v1700_v37  ;;  %v1713_v16 = vrot.slane %v6742_v55, 5  ;;  %v1715_v9 = vrot.slane %v6744_v54, 4  ;;  %v1717_v21 = vrot.slane %v6745_v10, 3  ;;  %v6750_v37 = vld [vmem:[#allocation100_spill] sm:$0xff]  ;;  %v6754_v55 = vld [vmem:[#allocation103_spill] sm:$0xff] }
 0x1a9   : > { %v1704_v43 = vsel %vm1617_vm14, %v1703_v49, %v1702_v31  ;;  %v1710_v40 = vsel %vm1605_vm10, %v1709_v13, %v6743_v15  ;;  %v1719_v34 = vrot.slane %v6746_v17, 2  ;;  %v1721_v63 = vrot.slane %v6747_v29, 1  ;;  %v6749_v49 = vld [vmem:[#allocation83_spill] sm:$0xff]  ;;  %v6752_v13 = vld [vmem:[#allocation102_spill] sm:$0xff]  ;;  %v6758_v29 = vld [vmem:[#allocation108_spill] sm:$0xff] }
 0x1aa   : > { %v1706_v59 = vsel %vm1620_vm15, %v1705_v38, %v1704_v43  ;;  %v1712_v44 = vsel %vm1608_vm11, %v1711_v51, %v1710_v40  ;;  %v1723_v11 = vrot.slane %v6748_v22, 7  ;;  %v1725_v12 = vrot.slane %v6749_v49, 6  ;;  %v6751_v38 = vld [vmem:[#allocation101_spill] sm:$0xff] }
 0x1ab   : > { %v5162_v26 = vsel %vm1623_vm0, %v1707_v36, %v1706_v59  ;;  %v1714_v58 = vsel %vm1611_vm12, %v1713_v16, %v1712_v44  ;;  %v1727_v7 = vrot.slane %v6750_v37, 5  ;;  %v1729_v6 = vrot.slane %v6751_v38, 4  ;;  %v6753_v51 = vld [vmem:[#allocation13_spill] sm:$0xff]  ;;  %v6755_v16 = vld [vmem:[#allocation104_spill] sm:$0xff]  ;;  %v6757_v59 = vld [vmem:[#allocation107_spill] sm:$0xff] }
 0x1ac   : > { %v1716_v18 = vsel %vm1614_vm13, %v1715_v9, %v1714_v58  ;;  %v1731_v31 = vrot.slane %v6752_v13, 3  ;;  %v1724_v36 = vsel %vm1605_vm10, %v1723_v11, %v6753_v51  ;;  %v1733_v43 = vrot.slane %v6754_v55, 2  ;;  %v6756_v9 = vld [vmem:[#allocation106_spill] sm:$0xff]  ;;  %v6759_v22 = vld [vmem:[#allocation109_spill] sm:$0xff] }
 0x1ad   : > { %v1718_v46 = vsel %vm1617_vm14, %v1717_v21, %v1716_v18  ;;  %v1735_v15 = vrot.slane %v6755_v16, 1  ;;  %v1726_v54 = vsel %vm1608_vm11, %v1725_v12, %v1724_v36  ;;  %v1737_v10 = vrot.slane %v6756_v9, 7  ;;  %v6760_v49 = vld [vmem:[#allocation105_spill] sm:$0xff]  ;;  %v6761_v18 = vld [vmem:[#allocation110_spill] sm:$0xff] }
 0x1ae   : > { %v1720_v40 = vsel %vm1620_vm15, %v1719_v34, %v1718_v46  ;;  %v1739_v44 = vrot.slane %v6757_v59, 6  ;;  %v1728_v21 = vsel %vm1611_vm12, %v1727_v7, %v1726_v54  ;;  %v1741_v58 = vrot.slane %v6758_v29, 5  ;;  %v6762_v38 = vld [vmem:[#allocation22_spill] sm:$0xff]  ;;  %v6763_v7 = vld [vmem:[#allocation23_spill] sm:$0xff] }
 0x1af   : > { %v5181_v17 = vsel %vm1623_vm0, %v1721_v63, %v1720_v40  ;;  %v1743_v11 = vrot.slane %v6759_v22, 4  ;;  %v1730_v34 = vsel %vm1614_vm13, %v1729_v6, %v1728_v21  ;;  %v1738_v12 = vsel %vm1605_vm10, %v1737_v10, %v6760_v49 }
 0x1b0   : > { %v1745_v37 = vrot.slane %v6761_v18, 3  ;;  %v1747_v13 = vrot.slane %v6762_v38, 2  ;;  %v1732_v63 = vsel %vm1617_vm14, %v1731_v31, %v1730_v34  ;;  %v1740_v46 = vsel %vm1608_vm11, %v1739_v44, %v1738_v12 }
 0x1b1   : > { %v1749_v51 = vrot.slane %v6763_v7, 1  ;;  %v1751_v36 = vrot.slane %v4777_v56, 7  ;;  %v6764_v55 = vstv %s4780_s19  ;;  %v6767_v6 = vstv %s4782_s20  ;;  %v6779_v7 = vld [vmem:[#allocation32_spill] sm:$0xff]  ;;  %s2156_s19 = scvt.s32.f32 %s5590_s15  ;;  %s5608_s20 = sld [smem:[#allocation4 + %s2165_s18]] }
 0x1b2   : > { %vm5198_vm1 = vcmp.ge.s32.totalorder %v6654_v33, %v6764_v55  ;;  %vm5205_vm2 = vcmp.lt.s32.totalorder %v6654_v33, %v6767_v6  ;;  %v1734_v31 = vsel %vm1620_vm15, %v1733_v43, %v1732_v63  ;;  %v1742_v54 = vsel %vm1611_vm12, %v1741_v58, %v1740_v46  ;;  %v6777_v63 = vld [vmem:[#allocation31_spill] sm:$0xff] }
 0x1b3   : > { %v1753_v9 = vrot.slane %v4786_v39, 6  ;;  %v1755_v56 = vrot.slane %v4790_v48, 5  ;;  %v6770_v10 = vmov %v6764_v55  ;;  %v6773_v44 = vmov %v6767_v6  ;;  %v6780_v55 = vld [vmem:[#allocation99_spill] sm:$0xff]  ;;  %vm5282_vm5 = vmand %vm5198_vm1, %vm5205_vm2 }
 0x1b4   : > { %vm5216_vm3 = vcmp.ge.s32.totalorder %v6655_v47, %v6770_v10  ;;  %vm5223_vm4 = vcmp.lt.s32.totalorder %v6655_v47, %v6773_v44  ;;  %v5228_v43 = vsel %vm1623_vm0, %v1735_v15, %v1734_v31  ;;  %v1744_v29 = vsel %vm1614_vm13, %v1743_v11, %v1742_v54  ;;  %v6781_v6 = vld [vmem:[#allocation11_spill] sm:$0xff]  ;;  %v6782_v54 = vld [vmem:[#allocation12_spill] sm:$0xff] }
 0x1b5   : > { %v1752_v39 = vsel %vm1605_vm10, %v1751_v36, %v4773_v3  ;;  %v1757_v48 = vrot.slane %v4793_v8, 4  ;;  %v1746_v58 = vsel %vm1617_vm14, %v1745_v37, %v1744_v29  ;;  %v1759_v34 = vrot.slane %v4796_v24, 3  ;;  %v6776_v37 = vld [vmem:[#allocation25_spill] sm:$0xff]  ;;  %vm5296_vm6 = vmand %vm5216_vm3, %vm5223_vm4 }
 0x1b6   : > { %v1754_v22 = vsel %vm1608_vm11, %v1753_v9, %v1752_v39  ;;  %v1761_v49 = vrot.slane %v4799_v25, 2  ;;  %v1748_v12 = vsel %vm1620_vm15, %v1747_v13, %v1746_v58  ;;  %v1763_v18 = vrot.slane %v4802_v5, 1  ;;  %v6778_v25 = vld [vmem:[#allocation24_spill] sm:$0xff] }
 0x1b7   : > { %v1756_v15 = vsel %vm1611_vm12, %v1755_v56, %v1754_v22  ;;  %v1765_v11 = vrot.slane %v4808_v2, 7  ;;  %v5243_v3 = vsel %vm1623_vm0, %v1749_v51, %v1748_v12  ;;  %v1767_v38 = vrot.slane %v6776_v37, 6  ;;  %p2244_p9 = scmp.gt.s32.totalorder %s5670_s24, %s5608_s20 }
 0x1b8   : > { %v1758_v8 = vsel %vm1614_vm13, %v1757_v48, %v1756_v15  ;;  %v1769_v46 = vrot.slane %v6777_v63, 5  ;;  %v1771_v36 = vrot.slane %v6779_v7, 4  ;;  %v1773_v5 = vrot.slane %v6780_v55, 3 }
 0x1b9   : > { %v1760_v24 = vsel %vm1617_vm14, %v1759_v34, %v1758_v8  ;;  %v1766_v13 = vsel %vm1605_vm10, %v1765_v11, %v6778_v25  ;;  %v1775_v31 = vrot.slane %v6781_v6, 2  ;;  %v1777_v9 = vrot.slane %v6782_v54, 1  ;;  %s5710_s23 = scalar_select %p2244_p9, 1, 0 }
 0x1ba   : > { %v1762_v2 = vsel %vm1620_vm15, %v1761_v49, %v1760_v24  ;;  %v1768_v51 = vsel %vm1608_vm11, %v1767_v38, %v1766_v13  ;;  %v1779_v44 = vrot.slane %v4986_v0, 7  ;;  %v1781_v29 = vrot.slane %v4990_v35, 6 }
 0x1bb   : > { %v5258_v56 = vsel %vm1623_vm0, %v1763_v18, %v1762_v2  ;;  %v1770_v10 = vsel %vm1611_vm12, %v1769_v46, %v1768_v51  ;;  %v1783_v48 = vrot.slane %v4994_v41, 5  ;;  %v1785_v58 = vrot.slane %v4998_v27, 4 }
 0x1bc   : > { %v1772_v39 = vsel %vm1614_vm13, %v1771_v36, %v1770_v10  ;;  %v1787_v22 = vrot.slane %v5002_v53, 3  ;;  %v1780_v49 = vsel %vm1605_vm10, %v1779_v44, %v4982_v23  ;;  %v1789_v12 = vrot.slane %v5005_v32, 2 }
 0x1bd   : > { %v1774_v34 = vsel %vm1617_vm14, %v1773_v5, %v1772_v39  ;;  %v1791_v15 = vrot.slane %v5008_v60, 1  ;;  %v1782_v35 = vsel %vm1608_vm11, %v1781_v29, %v1780_v49  ;;  %v1793_v41 = vrot.slane %v5014_v42, 7 }
 0x1be   : > { %v1776_v0 = vsel %vm1620_vm15, %v1775_v31, %v1774_v34  ;;  %v1795_v27 = vrot.slane %v5017_v4, 6  ;;  %v1784_v32 = vsel %vm1611_vm12, %v1783_v48, %v1782_v35  ;;  %v1797_v60 = vrot.slane %v5020_v28, 5 }
 0x1bf   : > { %v5287_v53 = vsel %vm1623_vm0, %v1777_v9, %v1776_v0  ;;  %v1799_v42 = vrot.slane %v5023_v45, 4  ;;  %v1786_v16 = vsel %vm1614_vm13, %v1785_v58, %v1784_v32  ;;  %v1794_v40 = vsel %vm1605_vm10, %v1793_v41, %v5011_v50 }
 0x1c0   : > { %v1801_v18 = vrot.slane %v5026_v61, 3  ;;  %v1803_v11 = vrot.slane %v5029_v52, 2  ;;  %v1788_v28 = vsel %vm1617_vm14, %v1787_v22, %v1786_v16  ;;  %v1796_v45 = vsel %vm1608_vm11, %v1795_v27, %v1794_v40 }
 0x1c1   : > { %v1805_v59 = vrot.slane %v5032_v19, 1  ;;  %v1821_v21 = vsel %vm5282_vm5, %v5060_v62, -3e+38  ;;  %v1790_v50 = vsel %vm1620_vm15, %v1789_v12, %v1788_v28  ;;  %v1798_v61 = vsel %vm1611_vm12, %v1797_v60, %v1796_v45 }
 0x1c2   : > { %v1822_v52 = vsel %vm5296_vm6, %v5083_v57, -3e+38  ;;  %v1823_v19 = vsel %vm5282_vm5, %v5094_v30, -3e+38  ;;  %v5327_v8 = vsel %vm1623_vm0, %v1791_v15, %v1790_v50  ;;  %v1800_v37 = vsel %vm1614_vm13, %v1799_v42, %v1798_v61 }
 0x1c3   : > { %v1824_v38 = vsel %vm5296_vm6, %v5113_v1, -3e+38  ;;  %v1825_v63 = vsel %vm5282_vm5, %v5132_v20, -3e+38  ;;  %v1802_v46 = vsel %vm1617_vm14, %v1801_v18, %v1800_v37  ;;  %v1826_v24 = vsel %vm5296_vm6, %v5147_v14, -3e+38 }
 0x1c4   : > { %v1827_v25 = vsel %vm5282_vm5, %v5162_v26, -3e+38  ;;  %v1828_v13 = vsel %vm5296_vm6, %v5181_v17, -3e+38  ;;  %v1804_v7 = vsel %vm1620_vm15, %v1803_v11, %v1802_v46  ;;  %v1829_v36 = vsel %vm5282_vm5, %v5228_v43, -3e+38 }
 0x1c5   : > { %v1830_v55 = vsel %vm5296_vm6, %v5243_v3, -3e+38  ;;  %v1831_v5 = vsel %vm5282_vm5, %v5258_v56, -3e+38  ;;  %v5362_v2 = vsel %vm1623_vm0, %v1805_v59, %v1804_v7  ;;  %v1832_v51 = vsel %vm5296_vm6, %v5287_v53, -3e+38 }
 0x1c6   : > { %v1833_v6 = vsel %vm5282_vm5, %v5327_v8, -3e+38  ;;  %v1835_v31 = vmax.f32 %v1821_v21, %v1822_v52  ;;  %v1834_v54 = vsel %vm5296_vm6, %v5362_v2, -3e+38  ;;  %v1842_v9 = vmax.f32 %v1823_v19, %v1824_v38 }
 0x1c7   : > { %v1849_v10 = vmax.f32 %v1825_v63, %v1826_v24  ;;  %v1856_v44 = vmax.f32 %v1827_v25, %v1828_v13  ;;  %v1863_v39 = vmax.f32 %v1829_v36, %v1830_v55  ;;  %v1870_v48 = vmax.f32 %v1831_v5, %v1832_v51 }
 0x1c8   : > { %v1836_v29 = vrot.slane %v1835_v31, 4  ;;  %v1877_v58 = vmax.f32 %v1833_v6, %v1834_v54  ;;  %v1843_v22 = vrot.slane %v1842_v9, 4  ;;  %v1887_v12 = vstv %s1886_s26  ;;  %s2246_s26 = scvt.s32.f32 %s5710_s23 }
 0x1c9   : > { %v1850_v34 = vrot.slane %v1849_v10, 4  ;;  %v1857_v49 = vrot.slane %v1856_v44, 4  ;;  %v1864_v0 = vrot.slane %v1863_v39, 4  ;;  %v1871_v35 = vrot.slane %v1870_v48, 4 }
 0x1ca   : > { %v1837_v15 = vmax.f32 %v1835_v31, %v1836_v29  ;;  %v1878_v41 = vrot.slane %v1877_v58, 4  ;;  %v1844_v27 = vmax.f32 %v1842_v9, %v1843_v22  ;;  %v1899_v60 = vstv %s5336_s12  ;;  %s5733_s12 = sld [smem:[#allocation4 + %s2255_s22]] }
 0x1cb   : > { %v1851_v23 = vmax.f32 %v1849_v10, %v1850_v34  ;;  %v1858_v32 = vmax.f32 %v1856_v44, %v1857_v49  ;;  %v1865_v4 = vmax.f32 %v1863_v39, %v1864_v0  ;;  %v1872_v16 = vmax.f32 %v1870_v48, %v1871_v35 }
 0x1cc   : > { %v1838_v42 = vrot.slane %v1837_v15, 2  ;;  %v1879_v40 = vmax.f32 %v1877_v58, %v1878_v41  ;;  %v1845_v18 = vrot.slane %v1844_v27, 2  ;;  %vm5377_vm7 = vcmp.ge.s32.totalorder %v6654_v33, %v1899_v60 }
 0x1cd   : > { %v1852_v11 = vrot.slane %v1851_v23, 2  ;;  %v1859_v28 = vrot.slane %v1858_v32, 2  ;;  %v1866_v21 = vrot.slane %v1865_v4, 2  ;;  %v1873_v50 = vrot.slane %v1872_v16, 2 }
 0x1ce   : > { %v1839_v59 = vmax.f32 %v1837_v15, %v1838_v42  ;;  %v1880_v61 = vrot.slane %v1879_v40, 2  ;;  %v1846_v52 = vmax.f32 %v1844_v27, %v1845_v18  ;;  %vm5382_vm8 = vcmp.ge.s32.totalorder %v6655_v47, %v1899_v60 }
 0x1cf   : > { %v1853_v19 = vmax.f32 %v1851_v23, %v1852_v11  ;;  %v1860_v37 = vmax.f32 %v1858_v32, %v1859_v28  ;;  %v1867_v46 = vmax.f32 %v1865_v4, %v1866_v21  ;;  %v1874_v24 = vmax.f32 %v1872_v16, %v1873_v50 }
 0x1d0   : > { %v1840_v63 = vrot.slane %v1839_v59, 1  ;;  %v1881_v25 = vmax.f32 %v1879_v40, %v1880_v61  ;;  %v1847_v13 = vrot.slane %v1846_v52, 1  ;;  %v1902_v55 = vstv %s5338_s25  ;;  %s2257_s25 = sadd.s32 12, %s3331_s16 }
 0x1d1   : > { %v1854_v7 = vrot.slane %v1853_v19, 1  ;;  %v1861_v36 = vrot.slane %v1860_v37, 1  ;;  %v1868_v51 = vrot.slane %v1867_v46, 1  ;;  %v1875_v6 = vrot.slane %v1874_v24, 1  ;;  %s5773_s27 = sld [smem:[#allocation4 + %s2257_s25]] }
 0x1d2   : > { %v1841_v5 = vmax.f32 %v1839_v59, %v1840_v63  ;;  %v1882_v31 = vrot.slane %v1881_v25, 1  ;;  %v1848_v54 = vmax.f32 %v1846_v52, %v1847_v13  ;;  %vm1903_vm9 = vcmp.lt.s32.totalorder %v6654_v33, %v1902_v55 }
 0x1d3   : > { %v1855_v9 = vmax.f32 %v1853_v19, %v1854_v7  ;;  %v1862_v10 = vmax.f32 %v1860_v37, %v1861_v36  ;;  %v1869_v44 = vmax.f32 %v1867_v46, %v1868_v51  ;;  %v1876_v29 = vmax.f32 %v1874_v24, %v1875_v6  ;;  %vm5399_vm0 = vmand %vm5377_vm7, %vm1903_vm9 }
 0x1d4   : > { %v1883_v39 = vmax.f32 %v1881_v25, %v1882_v31  ;;  %v5395_v48 = vmul.f32 %v1887_v12, %v1841_v5  ;;  %v5403_v22 = vmul.f32 %v1887_v12, %v1848_v54  ;;  %vm1904_vm1 = vcmp.lt.s32.totalorder %v6655_v47, %v1902_v55 }
 0x1d5   : > { %v5405_v34 = vmul.f32 %v1887_v12, %v1855_v9  ;;  %v5407_v49 = vmul.f32 %v1887_v12, %v1862_v10  ;;  %v5412_v15 = vmul.f32 %v1887_v12, %v1869_v44  ;;  %v5414_v0 = vmul.f32 %v1887_v12, %v1876_v29  ;;  %vm5420_vm2 = vmand %vm5382_vm8, %vm1904_vm1 }
 0x1d6   : > { %v5416_v35 = vmul.f32 %v1887_v12, %v1883_v39  ;;  %v1911_v27 = vsel %vm5399_vm0, %v5060_v62, -3e+38  ;;  %v1912_v23 = vsel %vm5420_vm2, %v5083_v57, -3e+38  ;;  %v1913_v12 = vsel %vm5399_vm0, %v5094_v30, -3e+38 }
 0x1d7   : > { %v1914_v32 = vsel %vm5420_vm2, %v5113_v1, -3e+38  ;;  %v5437_v60 = vstv %s1976_s29  ;;  %v1915_v42 = vsel %vm5399_vm0, %v5132_v20, -3e+38  ;;  %v1916_v4 = vsel %vm5420_vm2, %v5147_v14, -3e+38  ;;  %p2334_p10 = scmp.gt.s32.totalorder %s5773_s27, %s5733_s12 }
 0x1d8   : > { %v1917_v16 = vsel %vm5399_vm0, %v5162_v26, -3e+38  ;;  %v1925_v40 = vmax.f32 %v1911_v27, %v1912_v23  ;;  %v1918_v18 = vsel %vm5420_vm2, %v5181_v17, -3e+38  ;;  %v1919_v11 = vsel %vm5399_vm0, %v5228_v43, -3e+38 }
 0x1d9   : > { %v1920_v28 = vsel %vm5420_vm2, %v5243_v3, -3e+38  ;;  %v1932_v45 = vmax.f32 %v1913_v12, %v1914_v32  ;;  %v1921_v59 = vsel %vm5399_vm0, %v5258_v56, -3e+38  ;;  %v1922_v21 = vsel %vm5420_vm2, %v5287_v53, -3e+38 }
 0x1da   : > { %v1923_v50 = vsel %vm5399_vm0, %v5327_v8, -3e+38  ;;  %v1939_v61 = vmax.f32 %v1915_v42, %v1916_v4  ;;  %v1924_v52 = vsel %vm5420_vm2, %v5362_v2, -3e+38  ;;  %v1926_v19 = vrot.slane %v1925_v40, 4 }
 0x1db   : > { %v1933_v37 = vrot.slane %v1932_v45, 4  ;;  %v1946_v38 = vmax.f32 %v1917_v16, %v1918_v18  ;;  %v1953_v46 = vmax.f32 %v1919_v11, %v1920_v28  ;;  %v1960_v24 = vmax.f32 %v1921_v59, %v1922_v21  ;;  %s5804_s29 = scalar_select %p2334_p10, 1, 0 }
 0x1dc   : > { %v1940_v63 = vrot.slane %v1939_v61, 4  ;;  %v1967_v25 = vmax.f32 %v1923_v50, %v1924_v52  ;;  %v1927_v13 = vmax.f32 %v1925_v40, %v1926_v19  ;;  %v1989_v55 = vstv %s5410_s30  ;;  %s5827_s30 = sld [smem:[#allocation4 + %s2345_s28]] }
 0x1dd   : > { %v1934_v7 = vmax.f32 %v1932_v45, %v1933_v37  ;;  %v1947_v36 = vrot.slane %v1946_v38, 4  ;;  %v1954_v51 = vrot.slane %v1953_v46, 4  ;;  %v1961_v6 = vrot.slane %v1960_v24, 4  ;;  %s2336_s16 = scvt.s32.f32 %s5804_s29 }
 0x1de   : > { %v1941_v5 = vmax.f32 %v1939_v61, %v1940_v63  ;;  %v1968_v31 = vrot.slane %v1967_v25, 4  ;;  %v1928_v54 = vrot.slane %v1927_v13, 2  ;;  %vm5473_vm3 = vcmp.ge.s32.totalorder %v6654_v33, %v1989_v55 }
 0x1df   : > { %v1935_v9 = vrot.slane %v1934_v7, 2  ;;  %v1948_v10 = vmax.f32 %v1946_v38, %v1947_v36  ;;  %v1955_v39 = vmax.f32 %v1953_v46, %v1954_v51  ;;  %v1962_v58 = vmax.f32 %v1960_v24, %v1961_v6 }
 0x1e0   : > { %v1942_v29 = vrot.slane %v1941_v5, 2  ;;  %v1969_v41 = vmax.f32 %v1967_v25, %v1968_v31  ;;  %v1929_v27 = vmax.f32 %v1927_v13, %v1928_v54  ;;  %vm5478_vm4 = vcmp.ge.s32.totalorder %v6655_v47, %v1989_v55 }
 0x1e1   : > { %v1936_v23 = vmax.f32 %v1934_v7, %v1935_v9  ;;  %v1949_v12 = vrot.slane %v1948_v10, 2  ;;  %v1956_v4 = vrot.slane %v1955_v39, 2  ;;  %v1963_v16 = vrot.slane %v1962_v58, 2 }
 0x1e2   : > { %v1943_v42 = vmax.f32 %v1941_v5, %v1942_v29  ;;  %v1970_v40 = vrot.slane %v1969_v41, 2  ;;  %v1930_v18 = vrot.slane %v1929_v27, 1  ;;  %v1992_v45 = vstv %s5469_s0  ;;  %s5869_s0 = sld [smem:[#allocation4 + %s2347_s4]] }
 0x1e3   : > { %v1937_v11 = vrot.slane %v1936_v23, 1  ;;  %v1950_v28 = vmax.f32 %v1948_v10, %v1949_v12  ;;  %v1957_v21 = vmax.f32 %v1955_v39, %v1956_v4  ;;  %v1964_v50 = vmax.f32 %v1962_v58, %v1963_v16 }
 0x1e4   : > { %v1944_v59 = vrot.slane %v1943_v42, 1  ;;  %v1971_v61 = vmax.f32 %v1969_v41, %v1970_v40  ;;  %v1931_v52 = vmax.f32 %v1929_v27, %v1930_v18  ;;  %vm1993_vm5 = vcmp.lt.s32.totalorder %v6654_v33, %v1992_v45 }
 0x1e5   : > { %v1938_v19 = vmax.f32 %v1936_v23, %v1937_v11  ;;  %v1951_v37 = vrot.slane %v1950_v28, 1  ;;  %v1958_v63 = vrot.slane %v1957_v21, 1  ;;  %v1965_v46 = vrot.slane %v1964_v50, 1  ;;  %vm5488_vm6 = vmand %vm5473_vm3, %vm1993_vm5 }
 0x1e6   : > { %v1945_v38 = vmax.f32 %v1943_v42, %v1944_v59  ;;  %v1972_v24 = vrot.slane %v1971_v61, 1  ;;  %v5493_v7 = vmul.f32 %v5437_v60, %v1931_v52  ;;  %vm1994_vm7 = vcmp.lt.s32.totalorder %v6655_v47, %v1992_v45 }
 0x1e7   : > { %v1952_v13 = vmax.f32 %v1950_v28, %v1951_v37  ;;  %v5496_v36 = vmul.f32 %v5437_v60, %v1938_v19  ;;  %v1959_v55 = vmax.f32 %v1957_v21, %v1958_v63  ;;  %v1966_v5 = vmax.f32 %v1964_v50, %v1965_v46  ;;  %vm5506_vm8 = vmand %vm5478_vm4, %vm1994_vm7 }
 0x1e8   : > { %v1973_v51 = vmax.f32 %v1971_v61, %v1972_v24  ;;  %v5502_v6 = vmul.f32 %v5437_v60, %v1945_v38  ;;  %v2001_v9 = vsel %vm5488_vm6, %v5060_v62, -3e+38  ;;  %v2002_v10 = vsel %vm5506_vm8, %v5083_v57, -3e+38  ;;  %p2424_p11 = scmp.gt.s32.totalorder %s5869_s0, %s5827_s30 }
 0x1e9   : > { %v5516_v54 = vmul.f32 %v5437_v60, %v1952_v13  ;;  %v2003_v44 = vsel %vm5488_vm6, %v5094_v30, -3e+38  ;;  %v5528_v29 = vmul.f32 %v5437_v60, %v1959_v55  ;;  %v5531_v39 = vmul.f32 %v5437_v60, %v1966_v5 }
 0x1ea   : > { %v5534_v58 = vmul.f32 %v5437_v60, %v1973_v51  ;;  %v2004_v41 = vsel %vm5506_vm8, %v5113_v1, -3e+38  ;;  %v2005_v27 = vsel %vm5488_vm6, %v5132_v20, -3e+38  ;;  %v2006_v23 = vsel %vm5506_vm8, %v5147_v14, -3e+38 }
 0x1eb   : > { %v2007_v60 = vsel %vm5488_vm6, %v5162_v26, -3e+38  ;;  %v2015_v12 = vmax.f32 %v2001_v9, %v2002_v10  ;;  %v2008_v32 = vsel %vm5506_vm8, %v5181_v17, -3e+38  ;;  %v2009_v42 = vsel %vm5488_vm6, %v5228_v43, -3e+38 }
 0x1ec   : > { %v2010_v4 = vsel %vm5506_vm8, %v5243_v3, -3e+38  ;;  %v2022_v16 = vmax.f32 %v2003_v44, %v2004_v41  ;;  %v2011_v40 = vsel %vm5488_vm6, %v5258_v56, -3e+38  ;;  %v2012_v18 = vsel %vm5506_vm8, %v5287_v53, -3e+38 }
 0x1ed   : > { %v2013_v11 = vsel %vm5488_vm6, %v5327_v8, -3e+38  ;;  %v2029_v28 = vmax.f32 %v2005_v27, %v2006_v23  ;;  %v2014_v45 = vsel %vm5506_vm8, %v5362_v2, -3e+38  ;;  %v2016_v59 = vrot.slane %v2015_v12, 4 }
 0x1ee   : > { %v2023_v21 = vrot.slane %v2022_v16, 4  ;;  %v2036_v50 = vmax.f32 %v2007_v60, %v2008_v32  ;;  %v2043_v52 = vmax.f32 %v2009_v42, %v2010_v4  ;;  %v2050_v19 = vmax.f32 %v2011_v40, %v2012_v18  ;;  %s5902_s7 = scalar_select %p2424_p11, 1, 0 }
 0x1ef   : > { %v2030_v61 = vrot.slane %v2029_v28, 4  ;;  %v2057_v37 = vmax.f32 %v2013_v11, %v2014_v45  ;;  %v2017_v38 = vmax.f32 %v2015_v12, %v2016_v59  ;;  %v2067_v24 = vstv %s2066_s14 }
 0x1f0   : > { %v2024_v63 = vmax.f32 %v2022_v16, %v2023_v21  ;;  %v2037_v46 = vrot.slane %v2036_v50, 4  ;;  %v2044_v13 = vrot.slane %v2043_v52, 4  ;;  %v2051_v55 = vrot.slane %v2050_v19, 4  ;;  %s2426_s9 = scvt.s32.f32 %s5902_s7 }
 0x1f1   : > { %v2031_v25 = vmax.f32 %v2029_v28, %v2030_v61  ;;  %v2058_v5 = vrot.slane %v2057_v37, 4  ;;  %v2018_v51 = vrot.slane %v2017_v38, 2  ;;  %v2079_v10 = vstv %s5539_s11 }
 0x1f2   : > { %v2025_v31 = vrot.slane %v2024_v63, 2  ;;  %v2038_v9 = vmax.f32 %v2036_v50, %v2037_v46  ;;  %v2045_v41 = vmax.f32 %v2043_v52, %v2044_v13  ;;  %v2052_v27 = vmax.f32 %v2050_v19, %v2051_v55 }
 0x1f3   : > { %v2032_v44 = vrot.slane %v2031_v25, 2  ;;  %v2059_v23 = vmax.f32 %v2057_v37, %v2058_v5  ;;  %v2019_v60 = vmax.f32 %v2017_v38, %v2018_v51  ;;  %vm5578_vm9 = vcmp.ge.s32.totalorder %v6654_v33, %v2079_v10 }
 0x1f4   : > { %v2026_v12 = vmax.f32 %v2024_v63, %v2025_v31  ;;  %v2039_v32 = vrot.slane %v2038_v9, 2  ;;  %v2046_v16 = vrot.slane %v2045_v41, 2  ;;  %v2053_v40 = vrot.slane %v2052_v27, 2 }
 0x1f5   : > { %v2033_v4 = vmax.f32 %v2031_v25, %v2032_v44  ;;  %v2060_v18 = vrot.slane %v2059_v23, 2  ;;  %v2020_v11 = vrot.slane %v2019_v60, 1  ;;  %vm5583_vm0 = vcmp.ge.s32.totalorder %v6655_v47, %v2079_v10 }
 0x1f6   : > { %v2027_v28 = vrot.slane %v2026_v12, 1  ;;  %v2040_v45 = vmax.f32 %v2038_v9, %v2039_v32  ;;  %v2047_v50 = vmax.f32 %v2045_v41, %v2046_v16  ;;  %v2054_v61 = vmax.f32 %v2052_v27, %v2053_v40 }
 0x1f7   : > { %v2034_v21 = vrot.slane %v2033_v4, 1  ;;  %v2061_v52 = vmax.f32 %v2059_v23, %v2060_v18  ;;  %v2021_v19 = vmax.f32 %v2019_v60, %v2020_v11  ;;  %v2082_v63 = vstv %s5541_s13  ;;  %s6243_s13 = scalar_lea.vmem %s6314_s3, %s3059_s10 }
 0x1f8   : > { %v2028_v37 = vmax.f32 %v2026_v12, %v2027_v28  ;;  %v2041_v38 = vrot.slane %v2040_v45, 1  ;;  %v2048_v25 = vrot.slane %v2047_v50, 1  ;;  %v2055_v13 = vrot.slane %v2054_v61, 1 }
 0x1f9   : > { %v2035_v46 = vmax.f32 %v2033_v4, %v2034_v21  ;;  %v2062_v55 = vrot.slane %v2061_v52, 1  ;;  %v5594_v51 = vmul.f32 %v2067_v24, %v2021_v19  ;;  %vm2083_vm1 = vcmp.lt.s32.totalorder %v6654_v33, %v2082_v63 }
 0x1fa   : > { %v2042_v5 = vmax.f32 %v2040_v45, %v2041_v38  ;;  %v5596_v31 = vmul.f32 %v2067_v24, %v2028_v37  ;;  %v2049_v9 = vmax.f32 %v2047_v50, %v2048_v25  ;;  %v2056_v10 = vmax.f32 %v2054_v61, %v2055_v13  ;;  %vm5604_vm2 = vmand %vm5578_vm9, %vm2083_vm1 }
 0x1fb   : > { %v2063_v44 = vmax.f32 %v2061_v52, %v2062_v55  ;;  %v5600_v41 = vmul.f32 %v2067_v24, %v2035_v46  ;;  %vm2084_vm3 = vcmp.lt.s32.totalorder %v6655_v47, %v2082_v63  ;;  %v2091_v60 = vsel %vm5604_vm2, %v5060_v62, -3e+38 }
 0x1fc   : > { %v5610_v23 = vmul.f32 %v2067_v24, %v2042_v5  ;;  %v2093_v12 = vsel %vm5604_vm2, %v5094_v30, -3e+38  ;;  %v5619_v32 = vmul.f32 %v2067_v24, %v2049_v9  ;;  %v5621_v42 = vmul.f32 %v2067_v24, %v2056_v10  ;;  %vm5627_vm4 = vmand %vm5583_vm0, %vm2084_vm3 }
 0x1fd   : > { %v5623_v4 = vmul.f32 %v2067_v24, %v2063_v44  ;;  %v2095_v40 = vsel %vm5604_vm2, %v5132_v20, -3e+38  ;;  %v2092_v18 = vsel %vm5627_vm4, %v5083_v57, -3e+38  ;;  %v2094_v24 = vsel %vm5627_vm4, %v5113_v1, -3e+38 }
 0x1fe   : > { %6809 = vst [vmem:[#allocation36_spill] sm:$0xff] %v5610_v23  ;;  %6810 = vst [vmem:[#allocation15_spill] sm:$0xff] %v5619_v32  ;;  %v2096_v11 = vsel %vm5627_vm4, %v5147_v14, -3e+38  ;;  %v5644_v28 = vstv %s2156_s19  ;;  %v2097_v45 = vsel %vm5604_vm2, %v5162_v26, -3e+38  ;;  %v2105_v50 = vmax.f32 %v2091_v60, %v2092_v18 }
 0x1ff   : > { %6811 = vst [vmem:[#allocation16_spill] sm:$0xff] %v5621_v42  ;;  %6812 = vst [vmem:[#allocation17_spill] sm:$0xff] %v5623_v4  ;;  %v2098_v59 = vsel %vm5627_vm4, %v5181_v17, -3e+38  ;;  %v2099_v21 = vsel %vm5604_vm2, %v5228_v43, -3e+38  ;;  %v2112_v37 = vmax.f32 %v2093_v12, %v2094_v24  ;;  %v2119_v25 = vmax.f32 %v2095_v40, %v2096_v11 }
 0x200   : > { %v2100_v61 = vsel %vm5627_vm4, %v5243_v3, -3e+38  ;;  %v2101_v52 = vsel %vm5604_vm2, %v5258_v56, -3e+38  ;;  %v2102_v19 = vsel %vm5627_vm4, %v5287_v53, -3e+38  ;;  %v2126_v55 = vmax.f32 %v2097_v45, %v2098_v59 }
 0x201   : > { %v2103_v38 = vsel %vm5604_vm2, %v5327_v8, -3e+38  ;;  %v2104_v63 = vsel %vm5627_vm4, %v5362_v2, -3e+38  ;;  %v2106_v46 = vrot.slane %v2105_v50, 4  ;;  %v2113_v13 = vrot.slane %v2112_v37, 4 }
 0x202   : > { %v2133_v5 = vmax.f32 %v2099_v21, %v2100_v61  ;;  %v2140_v9 = vmax.f32 %v2101_v52, %v2102_v19  ;;  %v2120_v44 = vrot.slane %v2119_v25, 4  ;;  %v2147_v60 = vmax.f32 %v2103_v38, %v2104_v63 }
 0x203   : > { %v2107_v10 = vmax.f32 %v2105_v50, %v2106_v46  ;;  %v2169_v12 = vstv %s5608_s20  ;;  %v2114_v18 = vmax.f32 %v2112_v37, %v2113_v13  ;;  %v2127_v24 = vrot.slane %v2126_v55, 4 }
 0x204   : > { %v2134_v27 = vrot.slane %v2133_v5, 4  ;;  %v2141_v4 = vrot.slane %v2140_v9, 4  ;;  %v2121_v32 = vmax.f32 %v2119_v25, %v2120_v44  ;;  %v2148_v16 = vrot.slane %v2147_v60, 4 }
 0x205   : > { %v2108_v42 = vrot.slane %v2107_v10, 2  ;;  %vm5674_vm5 = vcmp.ge.s32.totalorder %v6654_v33, %v2169_v12  ;;  %v2115_v11 = vrot.slane %v2114_v18, 2  ;;  %v2128_v45 = vmax.f32 %v2126_v55, %v2127_v24 }
 0x206   : > { %v2135_v59 = vmax.f32 %v2133_v5, %v2134_v27  ;;  %v2142_v21 = vmax.f32 %v2140_v9, %v2141_v4  ;;  %v2122_v61 = vrot.slane %v2121_v32, 2  ;;  %v2149_v52 = vmax.f32 %v2147_v60, %v2148_v16 }
 0x207   : > { %v2109_v50 = vmax.f32 %v2107_v10, %v2108_v42  ;;  %vm5679_vm6 = vcmp.ge.s32.totalorder %v6655_v47, %v2169_v12  ;;  %v2116_v37 = vmax.f32 %v2114_v18, %v2115_v11  ;;  %v2129_v38 = vrot.slane %v2128_v45, 2 }
 0x208   : > { %v2136_v63 = vrot.slane %v2135_v59, 2  ;;  %v2143_v46 = vrot.slane %v2142_v21, 2  ;;  %v2123_v13 = vmax.f32 %v2121_v32, %v2122_v61  ;;  %v2150_v44 = vrot.slane %v2149_v52, 2 }
 0x209   : > { %v2110_v25 = vrot.slane %v2109_v50, 1  ;;  %v2172_v55 = vstv %s5670_s24  ;;  %v2117_v5 = vrot.slane %v2116_v37, 1  ;;  %v2130_v4 = vmax.f32 %v2128_v45, %v2129_v38 }
 0x20a   : > { %v2137_v42 = vmax.f32 %v2135_v59, %v2136_v63  ;;  %v2144_v9 = vmax.f32 %v2142_v21, %v2143_v46  ;;  %v2124_v60 = vrot.slane %v2123_v13, 1  ;;  %v2151_v12 = vmax.f32 %v2149_v52, %v2150_v44 }
 0x20b   : > { %v2111_v10 = vmax.f32 %v2109_v50, %v2110_v25  ;;  %vm2173_vm7 = vcmp.lt.s32.totalorder %v6654_v33, %v2172_v55  ;;  %v2118_v18 = vmax.f32 %v2116_v37, %v2117_v5  ;;  %v2131_v24 = vrot.slane %v2130_v4, 1 }
 0x20c   : > { %v2138_v27 = vrot.slane %v2137_v42, 1  ;;  %v2145_v16 = vrot.slane %v2144_v9, 1  ;;  %v2125_v32 = vmax.f32 %v2123_v13, %v2124_v60  ;;  %v2152_v11 = vrot.slane %v2151_v12, 1  ;;  %vm5693_vm9 = vmand %vm5674_vm5, %vm2173_vm7 }
 0x20d   : > { %v5688_v61 = vmul.f32 %v5644_v28, %v2111_v10  ;;  %vm2174_vm8 = vcmp.lt.s32.totalorder %v6655_v47, %v2172_v55  ;;  %v2132_v59 = vmax.f32 %v2130_v4, %v2131_v24  ;;  %v5699_v52 = vmul.f32 %v5644_v28, %v2118_v18 }
 0x20e   : > { %v2139_v21 = vmax.f32 %v2137_v42, %v2138_v27  ;;  %v2146_v50 = vmax.f32 %v2144_v9, %v2145_v16  ;;  %vm5703_vm0 = vmand %vm5679_vm6, %vm2174_vm8  ;;  %v2153_v40 = vmax.f32 %v2151_v12, %v2152_v11  ;;  %v5713_v38 = vmul.f32 %v5644_v28, %v2125_v32 }
 0x20f   : > { %6819 = vst [vmem:[#allocation18_spill] sm:$0xff] %v5688_v61  ;;  %6822 = vst [vmem:[#allocation19_spill] sm:$0xff] %v5699_v52  ;;  %v2181_v63 = vsel %vm5693_vm9, %v5060_v62, -3e+38  ;;  %v2182_v19 = vsel %vm5703_vm0, %v5083_v57, -3e+38  ;;  %v5722_v46 = vmul.f32 %v5644_v28, %v2132_v59  ;;  %v2259_v61 = vstv %s5733_s12 }
 0x210   : > { %6825 = vst [vmem:[#allocation20_spill] sm:$0xff] %v5713_v38  ;;  %v5725_v25 = vmul.f32 %v5644_v28, %v2139_v21  ;;  %v5728_v13 = vmul.f32 %v5644_v28, %v2146_v50  ;;  %v2183_v44 = vsel %vm5693_vm9, %v5094_v30, -3e+38  ;;  %v5737_v55 = vmul.f32 %v5644_v28, %v2153_v40 }
 0x211   : > { %6826 = vst [vmem:[#allocation21_spill] sm:$0xff] %v5722_v46  ;;  %v2184_v5 = vsel %vm5703_vm0, %v5113_v1, -3e+38  ;;  %v2185_v4 = vsel %vm5693_vm9, %v5132_v20, -3e+38  ;;  %v2195_v60 = vmax.f32 %v2181_v63, %v2182_v19  ;;  %vm5777_vm1 = vcmp.ge.s32.totalorder %v6654_v33, %v2259_v61 }
 0x212   : > { %6827 = vst [vmem:[#allocation26_spill] sm:$0xff] %v5725_v25  ;;  %6828 = vst [vmem:[#allocation27_spill] sm:$0xff] %v5728_v13  ;;  %v2186_v42 = vsel %vm5703_vm0, %v5147_v14, -3e+38  ;;  %v2187_v9 = vsel %vm5693_vm9, %v5162_v26, -3e+38  ;;  %v2202_v27 = vmax.f32 %v2183_v44, %v2184_v5  ;;  %v2247_v25 = vstv %s2246_s26 }
 0x213   : > { %6829 = vst [vmem:[#allocation28_spill] sm:$0xff] %v5737_v55  ;;  %v2188_v28 = vsel %vm5703_vm0, %v5181_v17, -3e+38  ;;  %v2189_v10 = vsel %vm5693_vm9, %v5228_v43, -3e+38  ;;  %v2196_v11 = vrot.slane %v2195_v60, 4  ;;  %v2209_v59 = vmax.f32 %v2185_v4, %v2186_v42 }
 0x214   : > { %v2190_v12 = vsel %vm5703_vm0, %v5243_v3, -3e+38  ;;  %v2191_v18 = vsel %vm5693_vm9, %v5258_v56, -3e+38  ;;  %v2192_v24 = vsel %vm5703_vm0, %v5287_v53, -3e+38  ;;  %v2216_v50 = vmax.f32 %v2187_v9, %v2188_v28 }
 0x215   : > { %v2193_v16 = vsel %vm5693_vm9, %v5327_v8, -3e+38  ;;  %v2194_v32 = vsel %vm5703_vm0, %v5362_v2, -3e+38  ;;  %v2203_v21 = vrot.slane %v2202_v27, 4  ;;  %v2223_v40 = vmax.f32 %v2189_v10, %v2190_v12 }
 0x216   : > { %v2230_v63 = vmax.f32 %v2191_v18, %v2192_v24  ;;  %v2197_v19 = vmax.f32 %v2195_v60, %v2196_v11  ;;  %v2210_v55 = vrot.slane %v2209_v59, 4  ;;  %v2237_v13 = vmax.f32 %v2193_v16, %v2194_v32 }
 0x217   : > { %v2204_v44 = vmax.f32 %v2202_v27, %v2203_v21  ;;  %v2217_v45 = vrot.slane %v2216_v50, 4  ;;  %v2224_v5 = vrot.slane %v2223_v40, 4  ;;  %vm5782_vm2 = vcmp.ge.s32.totalorder %v6655_v47, %v2259_v61 }
 0x218   : > { %v2231_v46 = vrot.slane %v2230_v63, 4  ;;  %v2198_v38 = vrot.slane %v2197_v19, 2  ;;  %v2211_v37 = vmax.f32 %v2209_v59, %v2210_v55  ;;  %v2238_v52 = vrot.slane %v2237_v13, 4 }
 0x219   : > { %v2205_v4 = vrot.slane %v2204_v44, 2  ;;  %v2218_v42 = vmax.f32 %v2216_v50, %v2217_v45  ;;  %v2225_v23 = vmax.f32 %v2223_v40, %v2224_v5 }
 0x21a   : > { %v2232_v9 = vmax.f32 %v2230_v63, %v2231_v46  ;;  %v2199_v28 = vmax.f32 %v2197_v19, %v2198_v38  ;;  %v2212_v10 = vrot.slane %v2211_v37, 2  ;;  %v2239_v60 = vmax.f32 %v2237_v13, %v2238_v52 }
 0x21b   : > { %v2206_v18 = vmax.f32 %v2204_v44, %v2205_v4  ;;  %v2219_v24 = vrot.slane %v2218_v42, 2  ;;  %v2226_v55 = vrot.slane %v2225_v23, 2  ;;  %v2262_v63 = vstv %s5773_s27 }
 0x21c   : > { %v2233_v27 = vrot.slane %v2232_v9, 2  ;;  %v2200_v16 = vrot.slane %v2199_v28, 1  ;;  %v2213_v32 = vmax.f32 %v2211_v37, %v2212_v10  ;;  %v2240_v11 = vrot.slane %v2239_v60, 2 }
 0x21d   : > { %v2207_v46 = vrot.slane %v2206_v18, 1  ;;  %v2220_v52 = vmax.f32 %v2218_v42, %v2219_v24  ;;  %v2227_v13 = vmax.f32 %v2225_v23, %v2226_v55  ;;  %vm2263_vm3 = vcmp.lt.s32.totalorder %v6654_v33, %v2262_v63 }
 0x21e   : > { %v2234_v59 = vmax.f32 %v2232_v9, %v2233_v27  ;;  %v2201_v21 = vmax.f32 %v2199_v28, %v2200_v16  ;;  %v2214_v50 = vrot.slane %v2213_v32, 1  ;;  %v2241_v40 = vmax.f32 %v2239_v60, %v2240_v11  ;;  %vm5797_vm4 = vmand %vm5777_vm1, %vm2263_vm3 }
 0x21f   : > { %v2208_v19 = vmax.f32 %v2206_v18, %v2207_v46  ;;  %v2221_v44 = vrot.slane %v2220_v52, 1  ;;  %v2228_v45 = vrot.slane %v2227_v13, 1  ;;  %vm2264_vm5 = vcmp.lt.s32.totalorder %v6655_v47, %v2262_v63 }
 0x220   : > { %v2235_v5 = vrot.slane %v2234_v59, 1  ;;  %v2215_v61 = vmax.f32 %v2213_v32, %v2214_v50  ;;  %v2242_v37 = vrot.slane %v2241_v40, 1  ;;  %v5789_v4 = vmul.f32 %v2247_v25, %v2201_v21  ;;  %vm5820_vm6 = vmand %vm5782_vm2, %vm2264_vm5 }
 0x221   : > { %v2222_v23 = vmax.f32 %v2220_v52, %v2221_v44  ;;  %v2229_v42 = vmax.f32 %v2227_v13, %v2228_v45  ;;  %v5793_v28 = vmul.f32 %v2247_v25, %v2208_v19  ;;  %v2271_v24 = vsel %vm5797_vm4, %v5060_v62, -3e+38 }
 0x222   : > { %6834 = vst [vmem:[#allocation29_spill] sm:$0xff] %v5789_v4  ;;  %v2236_v9 = vmax.f32 %v2234_v59, %v2235_v5  ;;  %v2243_v60 = vmax.f32 %v2241_v40, %v2242_v37  ;;  %v5806_v18 = vmul.f32 %v2247_v25, %v2215_v61  ;;  %v2273_v32 = vsel %vm5797_vm4, %v5094_v30, -3e+38 }
 0x223   : > { %6835 = vst [vmem:[#allocation30_spill] sm:$0xff] %v5793_v28  ;;  %v5812_v55 = vmul.f32 %v2247_v25, %v2222_v23  ;;  %v5814_v12 = vmul.f32 %v2247_v25, %v2229_v42  ;;  %v2272_v46 = vsel %vm5820_vm6, %v5083_v57, -3e+38  ;;  %v2274_v38 = vsel %vm5820_vm6, %v5113_v1, -3e+38 }
 0x224   : > { %6838 = vst [vmem:[#allocation33_spill] sm:$0xff] %v5806_v18  ;;  %v5816_v27 = vmul.f32 %v2247_v25, %v2236_v9  ;;  %v5830_v11 = vmul.f32 %v2247_v25, %v2243_v60  ;;  %v2275_v52 = vsel %vm5797_vm4, %v5132_v20, -3e+38  ;;  %v2276_v13 = vsel %vm5820_vm6, %v5147_v14, -3e+38 }
 0x225   : > { %6839 = vst [vmem:[#allocation37_spill] sm:$0xff] %v5812_v55  ;;  %6840 = vst [vmem:[#allocation38_spill] sm:$0xff] %v5814_v12  ;;  %v2277_v25 = vsel %vm5797_vm4, %v5162_v26, -3e+38  ;;  %v2278_v59 = vsel %vm5820_vm6, %v5181_v17, -3e+38  ;;  %v2285_v21 = vmax.f32 %v2271_v24, %v2272_v46  ;;  %v2292_v19 = vmax.f32 %v2273_v32, %v2274_v38 }
 0x226   : > { %6841 = vst [vmem:[#allocation35_spill] sm:$0xff] %v5816_v27  ;;  %6844 = vst [vmem:[#allocation39_spill] sm:$0xff] %v5830_v11  ;;  %v2279_v50 = vsel %vm5797_vm4, %v5228_v43, -3e+38  ;;  %v2280_v40 = vsel %vm5820_vm6, %v5243_v3, -3e+38  ;;  %v2299_v61 = vmax.f32 %v2275_v52, %v2276_v13  ;;  %v2306_v42 = vmax.f32 %v2277_v25, %v2278_v59 }
 0x227   : > { %v2281_v63 = vsel %vm5797_vm4, %v5258_v56, -3e+38  ;;  %v2282_v44 = vsel %vm5820_vm6, %v5287_v53, -3e+38  ;;  %v2283_v45 = vsel %vm5797_vm4, %v5327_v8, -3e+38  ;;  %v2313_v9 = vmax.f32 %v2279_v50, %v2280_v40 }
 0x228   : > { %v2284_v5 = vsel %vm5820_vm6, %v5362_v2, -3e+38  ;;  %v2286_v37 = vrot.slane %v2285_v21, 4  ;;  %v2293_v23 = vrot.slane %v2292_v19, 4  ;;  %v2300_v60 = vrot.slane %v2299_v61, 4 }
 0x229   : > { %v2320_v24 = vmax.f32 %v2281_v63, %v2282_v44  ;;  %v2327_v32 = vmax.f32 %v2283_v45, %v2284_v5  ;;  %v2337_v46 = vstv %s2336_s16  ;;  %v2307_v10 = vrot.slane %v2306_v42, 4 }
 0x22a   : > { %v2287_v38 = vmax.f32 %v2285_v21, %v2286_v37  ;;  %v2294_v11 = vmax.f32 %v2292_v19, %v2293_v23  ;;  %v2314_v27 = vrot.slane %v2313_v9, 4  ;;  %v2301_v12 = vmax.f32 %v2299_v61, %v2300_v60 }
 0x22b   : > { %v2321_v55 = vrot.slane %v2320_v24, 4  ;;  %v2328_v16 = vrot.slane %v2327_v32, 4  ;;  %v2349_v18 = vstv %s5827_s30  ;;  %v2308_v28 = vmax.f32 %v2306_v42, %v2307_v10 }
 0x22c   : > { %v2288_v52 = vrot.slane %v2287_v38, 2  ;;  %v2295_v13 = vrot.slane %v2294_v11, 2  ;;  %v2315_v4 = vmax.f32 %v2313_v9, %v2314_v27  ;;  %v2302_v25 = vrot.slane %v2301_v12, 2 }
 0x22d   : > { %v2322_v59 = vmax.f32 %v2320_v24, %v2321_v55  ;;  %v2329_v50 = vmax.f32 %v2327_v32, %v2328_v16  ;;  %vm5873_vm7 = vcmp.ge.s32.totalorder %v6654_v33, %v2349_v18  ;;  %v2309_v19 = vrot.slane %v2308_v28, 2 }
 0x22e   : > { %v2289_v21 = vmax.f32 %v2287_v38, %v2288_v52  ;;  %v2296_v63 = vmax.f32 %v2294_v11, %v2295_v13  ;;  %v2316_v44 = vrot.slane %v2315_v4, 2  ;;  %v2303_v45 = vmax.f32 %v2301_v12, %v2302_v25 }
 0x22f   : > { %v2323_v5 = vrot.slane %v2322_v59, 2  ;;  %v2330_v61 = vrot.slane %v2329_v50, 2  ;;  %vm5878_vm8 = vcmp.ge.s32.totalorder %v6655_v47, %v2349_v18  ;;  %v2310_v23 = vmax.f32 %v2308_v28, %v2309_v19 }
 0x230   : > { %v2290_v55 = vrot.slane %v2289_v21, 1  ;;  %v2297_v37 = vrot.slane %v2296_v63, 1  ;;  %v2317_v42 = vmax.f32 %v2315_v4, %v2316_v44  ;;  %v2304_v9 = vrot.slane %v2303_v45, 1 }
 0x231   : > { %v2324_v60 = vmax.f32 %v2322_v59, %v2323_v5  ;;  %v2331_v24 = vmax.f32 %v2329_v50, %v2330_v61  ;;  %v2352_v32 = vstv %s5869_s0  ;;  %v2311_v12 = vrot.slane %v2310_v23, 1 }
 0x232   : > { %v2291_v11 = vmax.f32 %v2289_v21, %v2290_v55  ;;  %v2298_v38 = vmax.f32 %v2296_v63, %v2297_v37  ;;  %v2318_v10 = vrot.slane %v2317_v42, 1  ;;  %v2305_v16 = vmax.f32 %v2303_v45, %v2304_v9 }
 0x233   : > { %v2325_v18 = vrot.slane %v2324_v60, 1  ;;  %v2332_v52 = vrot.slane %v2331_v24, 1  ;;  %vm2353_vm9 = vcmp.lt.s32.totalorder %v6654_v33, %v2352_v32  ;;  %v2312_v13 = vmax.f32 %v2310_v23, %v2311_v12 }
 0x234   : > { %v2319_v25 = vmax.f32 %v2317_v42, %v2318_v10  ;;  %v5886_v28 = vmul.f32 %v2337_v46, %v2291_v11  ;;  %v5888_v4 = vmul.f32 %v2337_v46, %v2298_v38  ;;  %vm5892_vm0 = vmand %vm5873_vm7, %vm2353_vm9  ;;  %v5896_v63 = vmul.f32 %v2337_v46, %v2305_v16 }
 0x235   : > { %v2326_v50 = vmax.f32 %v2324_v60, %v2325_v18  ;;  %v2333_v21 = vmax.f32 %v2331_v24, %v2332_v52  ;;  %vm2354_vm1 = vcmp.lt.s32.totalorder %v6655_v47, %v2352_v32  ;;  %v5904_v33 = vmul.f32 %v2337_v46, %v2312_v13 }
 0x236   : > { %v5906_v19 = vmul.f32 %v2337_v46, %v2319_v25  ;;  %vm5910_vm2 = vmand %vm5878_vm8, %vm2354_vm1  ;;  %v2361_v44 = vsel %vm5892_vm0, %v5060_v62, -3e+38  ;;  %v2363_v47 = vsel %vm5892_vm0, %v5094_v30, -3e+38  ;;  %v2365_v62 = vsel %vm5892_vm0, %v5132_v20, -3e+38 }
 0x237   : > { %v5920_v45 = vmul.f32 %v2337_v46, %v2326_v50  ;;  %v5922_v5 = vmul.f32 %v2337_v46, %v2333_v21  ;;  %v2362_v61 = vsel %vm5910_vm2, %v5083_v57, -3e+38  ;;  %v2364_v27 = vsel %vm5910_vm2, %v5113_v1, -3e+38 }
 0x238   : > { %v2366_v30 = vsel %vm5910_vm2, %v5147_v14, -3e+38  ;;  %v2367_v46 = vsel %vm5892_vm0, %v5162_v26, -3e+38  ;;  %v2375_v55 = vmax.f32 %v2361_v44, %v2362_v61  ;;  %v2368_v57 = vsel %vm5910_vm2, %v5181_v17, -3e+38 }
 0x239   : > { %v2369_v1 = vsel %vm5892_vm0, %v5228_v43, -3e+38  ;;  %v2370_v20 = vsel %vm5910_vm2, %v5243_v3, -3e+38  ;;  %v2382_v37 = vmax.f32 %v2363_v47, %v2364_v27  ;;  %v2371_v14 = vsel %vm5892_vm0, %v5258_v56, -3e+38 }
 0x23a   : > { %v2372_v26 = vsel %vm5910_vm2, %v5287_v53, -3e+38  ;;  %v2373_v17 = vsel %vm5892_vm0, %v5327_v8, -3e+38  ;;  %v2389_v23 = vmax.f32 %v2365_v62, %v2366_v30  ;;  %v2374_v43 = vsel %vm5910_vm2, %v5362_v2, -3e+38 }
 0x23b   : > { %v2376_v3 = vrot.slane %v2375_v55, 4  ;;  %v2383_v42 = vrot.slane %v2382_v37, 4  ;;  %v2396_v9 = vmax.f32 %v2367_v46, %v2368_v57  ;;  %v2403_v24 = vmax.f32 %v2369_v1, %v2370_v20 }
 0x23c   : > { %v2390_v60 = vrot.slane %v2389_v23, 4  ;;  %v2410_v32 = vmax.f32 %v2371_v14, %v2372_v26  ;;  %v2417_v56 = vmax.f32 %v2373_v17, %v2374_v43  ;;  %v2427_v53 = vstv %s2426_s9 }
 0x23d   : > { %v2377_v11 = vmax.f32 %v2375_v55, %v2376_v3  ;;  %v2384_v38 = vmax.f32 %v2382_v37, %v2383_v42  ;;  %v2397_v12 = vrot.slane %v2396_v9, 4  ;;  %v2404_v16 = vrot.slane %v2403_v24, 4 }
 0x23e   : > { %v2391_v10 = vmax.f32 %v2389_v23, %v2390_v60  ;;  %v2411_v18 = vrot.slane %v2410_v32, 4  ;;  %v2418_v8 = vrot.slane %v2417_v56, 4  ;;  %v2931_v2 = vpack.c.bf16 %v5395_v48, %v5395_v48 }
 0x23f   : > { %v2378_v52 = vrot.slane %v2377_v11, 2  ;;  %v2385_v13 = vrot.slane %v2384_v38, 2  ;;  %v2398_v25 = vmax.f32 %v2396_v9, %v2397_v12  ;;  %v2405_v50 = vmax.f32 %v2403_v24, %v2404_v16 }
 0x240   : > { %v2392_v59 = vrot.slane %v2391_v10, 2  ;;  %v2412_v21 = vmax.f32 %v2410_v32, %v2411_v18  ;;  %v2419_v40 = vmax.f32 %v2417_v56, %v2418_v8  ;;  %v2932_v27 = vpack.c.bf16 %v5403_v22, %v5403_v22 }
 0x241   : > { %v2379_v44 = vmax.f32 %v2377_v11, %v2378_v52  ;;  %v2386_v47 = vmax.f32 %v2384_v38, %v2385_v13  ;;  %v2399_v61 = vrot.slane %v2398_v25, 2  ;;  %v2406_v30 = vrot.slane %v2405_v50, 2 }
 0x242   : > { %v2393_v62 = vmax.f32 %v2391_v10, %v2392_v59  ;;  %v2413_v46 = vrot.slane %v2412_v21, 2  ;;  %v2420_v55 = vrot.slane %v2419_v40, 2  ;;  %v2933_v37 = vpack.c.bf16 %v5405_v34, %v5405_v34 }
 0x243   : > { %v2380_v57 = vrot.slane %v2379_v44, 1  ;;  %v2387_v1 = vrot.slane %v2386_v47, 1  ;;  %v2400_v20 = vmax.f32 %v2398_v25, %v2399_v61  ;;  %v2407_v26 = vmax.f32 %v2405_v50, %v2406_v30  ;;  %v6854_v30 = vld [vmem:[#allocation15_spill] sm:$0xff] }
 0x244   : > { %v2394_v14 = vrot.slane %v2393_v62, 1  ;;  %v2414_v17 = vmax.f32 %v2412_v21, %v2413_v46  ;;  %v2421_v23 = vmax.f32 %v2419_v40, %v2420_v55  ;;  %v2934_v9 = vpack.c.bf16 %v5407_v49, %v5407_v49  ;;  %v6855_v46 = vld [vmem:[#allocation16_spill] sm:$0xff]  ;;  %v6856_v55 = vld [vmem:[#allocation17_spill] sm:$0xff] }
 0x245   : > { %v2381_v43 = vmax.f32 %v2379_v44, %v2380_v57  ;;  %v2388_v3 = vmax.f32 %v2386_v47, %v2387_v1  ;;  %v2401_v42 = vrot.slane %v2400_v20, 1  ;;  %v2408_v24 = vrot.slane %v2407_v26, 1  ;;  %v6857_v57 = vld [vmem:[#allocation18_spill] sm:$0xff]  ;;  %v6858_v1 = vld [vmem:[#allocation19_spill] sm:$0xff] }
 0x246   : > { %v2395_v60 = vmax.f32 %v2393_v62, %v2394_v14  ;;  %v2415_v32 = vrot.slane %v2414_v17, 1  ;;  %v2422_v56 = vrot.slane %v2421_v23, 1  ;;  %v2935_v10 = vpack.c.bf16 %v5412_v15, %v5412_v15  ;;  %v6853_v62 = vld [vmem:[#allocation36_spill] sm:$0xff]  ;;  %v6860_v14 = vld [vmem:[#allocation21_spill] sm:$0xff] }
 0x247   : > { %v2402_v11 = vmax.f32 %v2400_v20, %v2401_v42  ;;  %v5969_v38 = vmul.f32 %v2427_v53, %v2381_v43  ;;  %v5971_v12 = vmul.f32 %v2427_v53, %v2388_v3  ;;  %v2409_v16 = vmax.f32 %v2407_v26, %v2408_v24  ;;  %v6859_v20 = vld [vmem:[#allocation20_spill] sm:$0xff]  ;;  %v6862_v43 = vld [vmem:[#allocation27_spill] sm:$0xff]  ;;  %v6864_v24 = vld [vmem:[#allocation29_spill] sm:$0xff] }
 0x248   : > { %v2416_v18 = vmax.f32 %v2414_v17, %v2415_v32  ;;  %v2423_v8 = vmax.f32 %v2421_v23, %v2422_v56  ;;  %v5975_v52 = vmul.f32 %v2427_v53, %v2395_v60  ;;  %v2936_v25 = vpack.c.bf16 %v5414_v0, %v5414_v0  ;;  %v6861_v17 = vld [vmem:[#allocation26_spill] sm:$0xff]  ;;  %v6863_v42 = vld [vmem:[#allocation28_spill] sm:$0xff] }
 0x249   : > { %v5977_v13 = vmul.f32 %v2427_v53, %v2402_v11  ;;  %v2937_v59 = vpack.c.bf16 %v5416_v35, %v5416_v35  ;;  %v2938_v50 = vpack.c.bf16 %v5493_v7, %v5493_v7  ;;  %v5985_v21 = vmul.f32 %v2427_v53, %v2409_v16  ;;  %v6865_v56 = vld [vmem:[#allocation30_spill] sm:$0xff]  ;;  %v6866_v16 = vld [vmem:[#allocation33_spill] sm:$0xff] }
 0x24a   : > { %v5987_v40 = vmul.f32 %v2427_v53, %v2416_v18  ;;  %v5989_v15 = vmul.f32 %v2427_v53, %v2423_v8  ;;  %v2939_v44 = vpack.c.bf16 %v5496_v36, %v5496_v36  ;;  %v2940_v47 = vpack.c.bf16 %v5502_v6, %v5502_v6  ;;  %v6867_v8 = vld [vmem:[#allocation37_spill] sm:$0xff] }
 0x24b   : > { %v2941_v0 = vpack.c.bf16 %v5516_v54, %v5516_v54  ;;  %v2942_v35 = vpack.c.bf16 %v5528_v29, %v5528_v29  ;;  %v2943_v7 = vpack.c.bf16 %v5531_v39, %v5531_v39  ;;  %v2944_v61 = vpack.c.bf16 %v5534_v58, %v5534_v58 }
 0x24c   : > { %v2945_v53 = vpack.c.bf16 %v5594_v51, %v5594_v51  ;;  %v2946_v36 = vpack.c.bf16 %v5596_v31, %v5596_v31  ;;  %v2947_v6 = vpack.c.bf16 %v5600_v41, %v5600_v41  ;;  %v2948_v54 = vpack.c.bf16 %v6853_v62, %v6853_v62 }
 0x24d   : > { %v2949_v29 = vpack.c.bf16 %v6854_v30, %v6854_v30  ;;  %v2950_v39 = vpack.c.bf16 %v6855_v46, %v6855_v46  ;;  %v2951_v58 = vpack.c.bf16 %v6856_v55, %v6856_v55  ;;  %v2952_v51 = vpack.c.bf16 %v6857_v57, %v6857_v57  ;;  %v6868_v30 = vld [vmem:[#allocation38_spill] sm:$0xff]  ;;  %v6869_v55 = vld [vmem:[#allocation35_spill] sm:$0xff] }
 0x24e   : > { %v2953_v31 = vpack.c.bf16 %v6858_v1, %v6858_v1  ;;  %v2954_v41 = vpack.c.bf16 %v6859_v20, %v6859_v20  ;;  %v2955_v26 = vpack.c.bf16 %v6860_v14, %v6860_v14  ;;  %v2956_v23 = vpack.c.bf16 %v6861_v17, %v6861_v17  ;;  %v6870_v1 = vld [vmem:[#allocation39_spill] sm:$0xff] }
 0x24f   : > { %v2957_v3 = vpack.c.bf16 %v6862_v43, %v6862_v43  ;;  %v2958_v60 = vpack.c.bf16 %v6863_v42, %v6863_v42  ;;  %v2959_v32 = vpack.c.bf16 %v6864_v24, %v6864_v24  ;;  %v2960_v11 = vpack.c.bf16 %v6865_v56, %v6865_v56 }
 0x250   : > { %v2961_v18 = vpack.c.bf16 %v6866_v16, %v6866_v16  ;;  %v2962_v62 = vpack.c.bf16 %v6867_v8, %v6867_v8  ;;  %v2963_v46 = vpack.c.bf16 %v6868_v30, %v6868_v30  ;;  %v2964_v57 = vpack.c.bf16 %v6869_v55, %v6869_v55 }
 0x251   : > { %v2965_v20 = vpack.c.bf16 %v6870_v1, %v6870_v1  ;;  %v2966_v14 = vpack.c.bf16 %v5886_v28, %v5886_v28  ;;  %v2967_v17 = vpack.c.bf16 %v5888_v4, %v5888_v4  ;;  %v2968_v43 = vpack.c.bf16 %v5896_v63, %v5896_v63 }
 0x252   : > { %v2969_v42 = vpack.c.bf16 %v5904_v33, %v5904_v33  ;;  %v2970_v24 = vpack.c.bf16 %v5906_v19, %v5906_v19  ;;  %v2971_v56 = vpack.c.bf16 %v5920_v45, %v5920_v45  ;;  %v2972_v16 = vpack.c.bf16 %v5922_v5, %v5922_v5 }
 0x253   : > { %v2973_v28 = vpack.c.bf16 %v5969_v38, %v5969_v38  ;;  %v2974_v4 = vpack.c.bf16 %v5971_v12, %v5971_v12  ;;  %v2975_v63 = vpack.c.bf16 %v5975_v52, %v5975_v52  ;;  %v2976_v33 = vpack.c.bf16 %v5977_v13, %v5977_v13 }
 0x254   : > { %v2977_v19 = vpack.c.bf16 %v5985_v21, %v5985_v21  ;;  %v2978_v45 = vpack.c.bf16 %v5987_v40, %v5987_v40  ;;  %v2979_v5 = vpack.c.bf16 %v5989_v15, %v5989_v15  ;;  %v2631_v38 = vunpack.c.l.b16 %v2931_v2 }
 0x255   : > { %v2632_v12 = vunpack.c.l.b16 %v2932_v27  ;;  %v2633_v52 = vunpack.c.l.b16 %v2933_v37  ;;  %v6085_v13 = vunpack.c.l.b16 %v2934_v9  ;;  %v6087_v21 = vunpack.c.l.b16 %v2935_v10 }
 0x256   : > { %v6089_v40 = vunpack.c.l.b16 %v2936_v25  ;;  %v6091_v15 = vunpack.c.l.b16 %v2937_v59  ;;  %v2638_v48 = vunpack.c.l.b16 %v2938_v50  ;;  %v2639_v2 = vunpack.c.l.b16 %v2939_v44 }
 0x257   : > { %v2640_v8 = vunpack.c.l.b16 %v2940_v47  ;;  %v2641_v22 = vunpack.c.l.b16 %v2941_v0  ;;  %v6093_v27 = vunpack.c.l.b16 %v2942_v35  ;;  %v6095_v30 = vunpack.c.l.b16 %v2943_v7 }
 0x258   : > { %v6097_v34 = vunpack.c.l.b16 %v2944_v61  ;;  %v2645_v37 = vunpack.c.l.b16 %v2945_v53  ;;  %v2646_v49 = vunpack.c.l.b16 %v2946_v36  ;;  %v6099_v9 = vunpack.c.l.b16 %v2947_v6 }
 0x259   : > { %v6101_v10 = vunpack.c.l.b16 %v2948_v54  ;;  %v6103_v25 = vunpack.c.l.b16 %v2949_v29  ;;  %v6105_v59 = vunpack.c.l.b16 %v2950_v39  ;;  %v6107_v50 = vunpack.c.l.b16 %v2951_v58 }
 0x25a   : > { %v6109_v44 = vunpack.c.l.b16 %v2952_v51  ;;  %v6111_v47 = vunpack.c.l.b16 %v2953_v31  ;;  %v6113_v0 = vunpack.c.l.b16 %v2954_v41  ;;  %v6115_v35 = vunpack.c.l.b16 %v2955_v26 }
 0x25b   : > { %v6117_v7 = vunpack.c.l.b16 %v2956_v23  ;;  %v6119_v61 = vunpack.c.l.b16 %v2957_v3  ;;  %v6121_v53 = vunpack.c.l.b16 %v2958_v60  ;;  %v6123_v36 = vunpack.c.l.b16 %v2959_v32 }
 0x25c   : > { %v6125_v6 = vunpack.c.l.b16 %v2960_v11  ;;  %v6127_v54 = vunpack.c.l.b16 %v2961_v18  ;;  %v6129_v29 = vunpack.c.l.b16 %v2962_v62  ;;  %v6131_v39 = vunpack.c.l.b16 %v2963_v46 }
 0x25d   : > { %v6133_v58 = vunpack.c.l.b16 %v2964_v57  ;;  %v6135_v51 = vunpack.c.l.b16 %v2965_v20  ;;  %v6137_v31 = vunpack.c.l.b16 %v2966_v14  ;;  %v6139_v41 = vunpack.c.l.b16 %v2967_v17 }
 0x25e   : > { %v6141_v26 = vunpack.c.l.b16 %v2968_v43  ;;  %v6143_v23 = vunpack.c.l.b16 %v2969_v42  ;;  %v6145_v3 = vunpack.c.l.b16 %v2970_v24  ;;  %v6147_v60 = vunpack.c.l.b16 %v2971_v56 }
 0x25f   : > { %v6149_v32 = vunpack.c.l.b16 %v2972_v16  ;;  %v6151_v11 = vunpack.c.l.b16 %v2973_v28  ;;  %v6153_v18 = vunpack.c.l.b16 %v2974_v4  ;;  %v6155_v62 = vunpack.c.l.b16 %v2975_v63 }
 0x260   : > { %v6157_v46 = vunpack.c.l.b16 %v2976_v33  ;;  %v6159_v55 = vunpack.c.l.b16 %v2977_v19  ;;  %v6161_v57 = vunpack.c.l.b16 %v2978_v45  ;;  %v6163_v1 = vunpack.c.l.b16 %v2979_v5 }
 0x261   : > { %v2680_v20 = vrot.slane %v2632_v12, 7  ;;  %v2682_v14 = vrot.slane %v2633_v52, 6  ;;  %v2684_v17 = vrot.slane %v6085_v13, 5  ;;  %v2686_v43 = vrot.slane %v6087_v21, 4 }
 0x262   : > { %v2688_v42 = vrot.slane %v6089_v40, 3  ;;  %v2690_v24 = vrot.slane %v6091_v15, 2  ;;  %v2692_v56 = vrot.slane %v2639_v2, 7  ;;  %v2694_v28 = vrot.slane %v2640_v8, 6 }
 0x263   : > { %v2681_v16 = vsel %vm1605_vm10, %v2680_v20, %v2631_v38  ;;  %v2696_v4 = vrot.slane %v2641_v22, 5  ;;  %v2698_v63 = vrot.slane %v6093_v27, 4  ;;  %v2700_v45 = vrot.slane %v6095_v30, 3 }
 0x264   : > { %v2683_v33 = vsel %vm1608_vm11, %v2682_v14, %v2681_v16  ;;  %v2693_v19 = vsel %vm1605_vm10, %v2692_v56, %v2638_v48  ;;  %v2702_v5 = vrot.slane %v6097_v34, 2  ;;  %v2704_v13 = vrot.slane %v2646_v49, 7 }
 0x265   : > { %v2685_v12 = vsel %vm1611_vm12, %v2684_v17, %v2683_v33  ;;  %v2695_v52 = vsel %vm1608_vm11, %v2694_v28, %v2693_v19  ;;  %v2706_v21 = vrot.slane %v6099_v9, 6  ;;  %v2708_v15 = vrot.slane %v6101_v10, 5 }
 0x266   : > { %v2687_v38 = vsel %vm1614_vm13, %v2686_v43, %v2685_v12  ;;  %v2697_v40 = vsel %vm1611_vm12, %v2696_v4, %v2695_v52  ;;  %v2710_v48 = vrot.slane %v6103_v25, 4  ;;  %v2705_v22 = vsel %vm1605_vm10, %v2704_v13, %v2645_v37 }
 0x267   : > { %v2689_v2 = vsel %vm1617_vm14, %v2688_v42, %v2687_v38  ;;  %v2699_v8 = vsel %vm1614_vm13, %v2698_v63, %v2697_v40  ;;  %v2712_v27 = vrot.slane %v6105_v59, 3  ;;  %v2707_v49 = vsel %vm1608_vm11, %v2706_v21, %v2705_v22  ;;  %v2787_v22 = vld [vmem:[%s6243_s13 + $0x8] sm:$0xf] }
 0x268   : > { %v6188_v30 = vsel %vm1620_vm15, %v2690_v24, %v2689_v2  ;;  %v2701_v34 = vsel %vm1617_vm14, %v2700_v45, %v2699_v8  ;;  %v2714_v9 = vrot.slane %v6107_v50, 2  ;;  %v2709_v25 = vsel %vm1611_vm12, %v2708_v15, %v2707_v49  ;;  %v2781_v15 = vld [vmem:[%s6243_s13] sm:$0xf]  ;;  %v2796_v49 = vld [vmem:[%s6243_s13 + $0x14] sm:$0xf] }
 0x269   : > { %v6194_v10 = vsel %vm1620_vm15, %v2702_v5, %v2701_v34  ;;  %v2716_v20 = vrot.slane %v6111_v47, 7  ;;  %v2718_v37 = vrot.slane %v6113_v0, 6  ;;  %v2711_v59 = vsel %vm1614_vm13, %v2710_v48, %v2709_v25  ;;  %v2784_v48 = vld [vmem:[%s6243_s13 + $0x4] sm:$0xf] }
 0x26a   : > { %v2720_v14 = vrot.slane %v6115_v35, 5  ;;  %v2722_v17 = vrot.slane %v6117_v7, 4  ;;  %v2724_v50 = vrot.slane %v6119_v61, 3  ;;  %v2713_v43 = vsel %vm1617_vm14, %v2712_v27, %v2711_v59  ;;  %v2790_v27 = vld [vmem:[%s6243_s13 + $0xc] sm:$0xf] }
 0x26b   : > { %v2717_v42 = vsel %vm1605_vm10, %v2716_v20, %v6109_v44  ;;  %v2726_v47 = vrot.slane %v6121_v53, 2  ;;  %v2728_v0 = vrot.slane %v6125_v6, 7  ;;  %v2715_v24 = vsel %vm1620_vm15, %v2714_v9, %v2713_v43 }
 0x26c   : > { %v2719_v56 = vsel %vm1608_vm11, %v2718_v37, %v2717_v42  ;;  %v2730_v16 = vrot.slane %v6127_v54, 6  ;;  %v2732_v35 = vrot.slane %v6129_v29, 5  ;;  %v2734_v28 = vrot.slane %v6131_v39, 4 }
 0x26d   : > { %v2721_v7 = vsel %vm1611_vm12, %v2720_v14, %v2719_v56  ;;  %v2729_v61 = vsel %vm1605_vm10, %v2728_v0, %v6123_v36  ;;  %v2736_v44 = vrot.slane %v6133_v58, 3  ;;  %v2738_v4 = vrot.slane %v6135_v51, 2  ;;  %v2799_v14 = vld [vmem:[%s6243_s13 + $0x18] sm:$0xf] }
 0x26e   : > { %v2723_v53 = vsel %vm1614_vm13, %v2722_v17, %v2721_v7  ;;  %v2731_v6 = vsel %vm1608_vm11, %v2730_v16, %v2729_v61  ;;  %v2740_v54 = vrot.slane %v6139_v41, 7  ;;  %v2742_v33 = vrot.slane %v6141_v26, 6 }
 0x26f   : > { %v2725_v29 = vsel %vm1617_vm14, %v2724_v50, %v2723_v53  ;;  %v2733_v63 = vsel %vm1611_vm12, %v2732_v35, %v2731_v6  ;;  %v2744_v36 = vrot.slane %v6143_v23, 5  ;;  %v2746_v45 = vrot.slane %v6145_v3, 4 }
 0x270   : > { %v2727_v39 = vsel %vm1620_vm15, %v2726_v47, %v2725_v29  ;;  %v2735_v58 = vsel %vm1614_vm13, %v2734_v28, %v2733_v63  ;;  %v2741_v19 = vsel %vm1605_vm10, %v2740_v54, %v6137_v31  ;;  %v2748_v5 = vrot.slane %v6147_v60, 3 }
 0x271   : > { %v2737_v51 = vsel %vm1617_vm14, %v2736_v44, %v2735_v58  ;;  %v2743_v41 = vsel %vm1608_vm11, %v2742_v33, %v2741_v19  ;;  %v2750_v12 = vrot.slane %v6149_v32, 2  ;;  %v2752_v23 = vrot.slane %v6153_v18, 7 }
 0x272   : > { %v2739_v26 = vsel %vm1620_vm15, %v2738_v4, %v2737_v51  ;;  %v2745_v31 = vsel %vm1611_vm12, %v2744_v36, %v2743_v41  ;;  %v2754_v3 = vrot.slane %v6155_v62, 6  ;;  %v2756_v60 = vrot.slane %v6157_v46, 5 }
 0x273   : > { %v2747_v52 = vsel %vm1614_vm13, %v2746_v45, %v2745_v31  ;;  %v2758_v32 = vrot.slane %v6159_v55, 4  ;;  %v2760_v13 = vrot.slane %v6161_v57, 3  ;;  %v2753_v38 = vsel %vm1605_vm10, %v2752_v23, %v6151_v11 }
 0x274   : > { %v2749_v21 = vsel %vm1617_vm14, %v2748_v5, %v2747_v52  ;;  %v2762_v18 = vrot.slane %v6163_v1, 2  ;;  %v2764_v62 = vpack.c.b16 %v6188_v30, %v6188_v30  ;;  %v2755_v46 = vsel %vm1608_vm11, %v2754_v3, %v2753_v38  ;;  %v2793_v30 = vld [vmem:[%s6243_s13 + $0x10] sm:$0xf] }
 0x275   : > { %v2751_v40 = vsel %vm1620_vm15, %v2750_v12, %v2749_v21  ;;  %v2765_v55 = vpack.c.b16 %v6194_v10, %v6194_v10  ;;  %v2766_v57 = vpack.c.b16 %v2715_v24, %v2715_v24  ;;  %v2757_v2 = vsel %vm1611_vm12, %v2756_v60, %v2755_v46 }
 0x276   : > { %v2767_v8 = vpack.c.b16 %v2727_v39, %v2727_v39  ;;  %v2768_v11 = vpack.c.b16 %v2739_v26, %v2739_v26  ;;  %v2769_v1 = vpack.c.b16 %v2751_v40, %v2751_v40  ;;  %v2759_v34 = vsel %vm1614_vm13, %v2758_v32, %v2757_v2 }
 0x277   : > { %vm2778_vm10 = vcmask 1043456   ;;  %vm2779_vm11 = vsmask.f32 3328  ;;  %v2761_v9 = vsel %vm1617_vm14, %v2760_v13, %v2759_v34 }
 0x278   : > { %vm6272_vm12 = vmand %vm2778_vm10, %vm2779_vm11  ;;  %v2763_v25 = vsel %vm1620_vm15, %v2762_v18, %v2761_v9 }
 0x279   : > { %v2782_v20 = vsel %vm6272_vm12, %v2764_v62, %v2781_v15  ;;  %v2785_v37 = vsel %vm6272_vm12, %v2765_v55, %v2784_v48  ;;  %v2788_v59 = vsel %vm6272_vm12, %v2766_v57, %v2787_v22  ;;  %v2770_v17 = vpack.c.b16 %v2763_v25, %v2763_v25 }
 0x27a   : > { %2783 = vst [vmem:[%s6243_s13] sm:$0xf] %v2782_v20  ;;  %2786 = vst [vmem:[%s6243_s13 + $0x4] sm:$0xf] %v2785_v37  ;;  %v2791_v50 = vsel %vm6272_vm12, %v2767_v8, %v2790_v27  ;;  %v2794_v43 = vsel %vm6272_vm12, %v2768_v11, %v2793_v30  ;;  %v2797_v42 = vsel %vm6272_vm12, %v2769_v1, %v2796_v49 }
 0x27b   : > { %2789 = vst [vmem:[%s6243_s13 + $0x8] sm:$0xf] %v2788_v59  ;;  %2792 = vst [vmem:[%s6243_s13 + $0xc] sm:$0xf] %v2791_v50  ;;  %v2800_v47 = vsel %vm6272_vm12, %v2770_v17, %v2799_v14 }
 0x27c   : > { %2795 = vst [vmem:[%s6243_s13 + $0x10] sm:$0xf] %v2794_v43  ;;  %2798 = vst [vmem:[%s6243_s13 + $0x14] sm:$0xf] %v2797_v42 }
 0x27d   : > { %2801 = vst [vmem:[%s6243_s13 + $0x18] sm:$0xf] %v2800_v47 }
 0x27e PF: > { %p19_p3 = scmp.ge.s32.totalorder %s3262_s8, 10   ;;  %s6873_s0 = smov %s3185_s5 }
 0x27f   : > { %s6874_s5 = smov %s3189_s6  ;;  %s6875_s6 = smov %s3280_s17 }
 0x280   : > { %s6876_s7 = smov %s3262_s8  ;;  %21 = sbr.rel (!%p19_p3) target bundleno = 22 (0x16), region = 64 }
 0x287   :  { %2823 = vsyncpa [#allocation6], 1 }
 0x288   :  { %2825 = vsyncpa [#allocation6 + $0x1], 1 }

</bundles_post_ra>
